<compile_context>
chip_gen: v7x
topology: tpu7x:2x2x1
jax: 0.10.0
libtpu: 0.0.40
codegen_flags: <defaults>
</compile_context>

<pallas_src>
import functools

import jax
import jax.numpy as jnp
from jax.experimental import pallas as pl
from jax.experimental.pallas import tpu as pltpu

EPS = 1e-5  # PyTorch BatchNorm1d default eps


def _bn_relu(v, gamma, beta, inv_m):
  """Training-mode BatchNorm1d over the M lane axis + ReLU, fused to one
  per-channel scale/shift.  Statistics are accumulated in f32 even when the
  activation `v` is bf16 (single-pass E[x^2]-E[x]^2 cancellation safety)."""
  vf = v.astype(jnp.float32)                                # no-op on the f32 path
  mean = jnp.sum(vf, axis=1, keepdims=True) * inv_m         # (C, 1)
  ex2 = jnp.sum(vf * vf, axis=1, keepdims=True) * inv_m     # (C, 1)
  var = ex2 - mean * mean                                   # biased variance
  scale = gamma * jax.lax.rsqrt(var + EPS)                  # (C, 1) f32
  shift = beta - mean * scale                               # (C, 1) f32
  # Apply in the activation dtype: one mul + one add + one max per element.
  return jnp.maximum(v * scale.astype(v.dtype) + shift.astype(v.dtype), 0.0)


def _scorenet_kernel(cxyz_ref, wpc_ref, wblk_ref, vecs_ref, wob_ref, out_ref,
                     *, n_blocks, hidden, acts_dtype):
  H = hidden
  ad = acts_dtype
  cxyz = cxyz_ref[...]                                # (c_dim, M), acts dtype
  M = cxyz.shape[1]
  inv_m = 1.0 / M                                     # true column count (no lane padding)
  vecs = vecs_ref[...]                                # (H, 3 + 6*n_blocks) f32

  def col(j):                                         # (H, 1) f32 per-channel vector
    return vecs[:, j:j + 1]

  def colc(j):                                        # same, in the activation dtype
    return col(j).astype(ad)

  # net = relu(conv_p(c_xyz));  conv_p rows are wpc[:H].
  net = jnp.maximum(
      jnp.dot(wpc_ref[0:H, :], cxyz, preferred_element_type=jnp.float32)
      + col(0), 0.0).astype(ad)

  # ResnetBlockConv1d x n_blocks (in_dim == out_dim -> identity shortcut).
  # Static unroll is fine at this block count / hidden size (no spill pressure);
  # use lax.fori_loop(..., unroll=True) if hidden_dim / n_blocks are scaled up.
  for i in range(n_blocks):
    base = 1 + 6 * i
    h = _bn_relu(net, col(base), col(base + 1), inv_m)                 # relu(bn_0(x))
    h = jnp.dot(wblk_ref[i], h,
                preferred_element_type=jnp.float32).astype(ad) + colc(base + 2)   # fc_0
    h = _bn_relu(h, col(base + 3), col(base + 4), inv_m)               # relu(bn_1(net))
    dx = jnp.dot(wblk_ref[n_blocks + i], h,
                 preferred_element_type=jnp.float32).astype(ad) + colc(base + 5)  # fc_1 (+fc_c bias)
    # fc_c(c_xyz): tiny K=4 matmul issued per block (no resident cond slab).
    cnd = jnp.dot(wpc_ref[(i + 1) * H:(i + 2) * H, :], cxyz,
                  preferred_element_type=jnp.float32).astype(ad)
    net = net + dx + cnd                                               # x + dx + fc_c(c)

  # out = conv_out(relu(bn_out(net)))
  h = _bn_relu(net, col(1 + 6 * n_blocks), col(2 + 6 * n_blocks), inv_m)
  wo = wob_ref[:, :H].astype(ad)                      # (D, H)
  bo = wob_ref[:, H:H + 1]                            # (D, 1) f32
  out_ref[...] = jnp.dot(wo, h, preferred_element_type=jnp.float32) + bo


def init_params(key, in_dim, hidden_dim, n_blocks):
  c_dim = in_dim + 1
  ks = jax.random.split(key, 10)

  def u(k, shape, scale=0.1):
    return jax.random.uniform(k, shape, jnp.float32, -scale, scale)

  return dict(
      wp=u(ks[0], (hidden_dim, c_dim)),                         # conv_p.weight (out, in)
      bp=u(ks[1], (hidden_dim,)),
      bn0g=jnp.ones((n_blocks, hidden_dim), jnp.float32),
      bn0b=jnp.zeros((n_blocks, hidden_dim), jnp.float32),
      bn1g=jnp.ones((n_blocks, hidden_dim), jnp.float32),
      bn1b=jnp.zeros((n_blocks, hidden_dim), jnp.float32),
      w0=u(ks[2], (n_blocks, hidden_dim, hidden_dim)),          # fc_0.weight per block
      b0=u(ks[3], (n_blocks, hidden_dim)),
      # NOTE: the PyTorch __init__ zero-inits fc_1.weight; small random values
      # are used here so the whole compute path is numerically exercised.
      w1=u(ks[4], (n_blocks, hidden_dim, hidden_dim), 0.05),    # fc_1.weight per block
      b1=u(ks[5], (n_blocks, hidden_dim)),
      wc=u(ks[6], (n_blocks, hidden_dim, c_dim)),               # fc_c.weight per block
      bc=u(ks[7], (n_blocks, hidden_dim)),
      bng=jnp.ones((hidden_dim,), jnp.float32),
      bnb=jnp.zeros((hidden_dim,), jnp.float32),
      wo=u(ks[8], (in_dim, hidden_dim)),                        # conv_out.weight (out, in)
      bo=u(ks[9], (in_dim,)),
  )


def _pack_params(params, n_blocks, act_dtype):
  H, c_dim = params["wp"].shape
  # Stacked conditioner weights: conv_p rows on top, then fc_c of every block
  # (MXU inputs -> activation dtype).
  wpc = jnp.concatenate(
      [params["wp"], params["wc"].reshape(n_blocks * H, c_dim)],
      axis=0).astype(act_dtype)
  # fc_0 weights at [0, nb), fc_1 weights at [nb, 2*nb)  (MXU inputs).
  wblk = jnp.concatenate([params["w0"], params["w1"]], axis=0).astype(act_dtype)
  # All (H,) per-channel vectors as columns of one (H, 3 + 6*nb) f32 table; the
  # fc_1 and fc_c biases of each block are pre-combined (they sum into the same
  # tensor), so only one bias broadcast is emitted per block.
  cols = [params["bp"]]
  for i in range(n_blocks):
    cols += [params["bn0g"][i], params["bn0b"][i], params["b0"][i],
             params["bn1g"][i], params["bn1b"][i],
             params["b1"][i] + params["bc"][i]]
  cols += [params["bng"], params["bnb"]]
  vecs = jnp.stack(cols, axis=1).astype(jnp.float32)             # (H, 3 + 6*nb)
  # conv_out weight with its bias appended as the last column (kept f32; the
  # weight half is cast in-kernel, the bias column is added to the f32 output).
  wob = jnp.concatenate([params["wo"], params["bo"][:, None]],
                        axis=1).astype(jnp.float32)              # (D, H+1)
  return wpc, wblk, vecs, wob


def _build_cxyz(x, c):
  # Glue: p = x.transpose(1,2); c_xyz = cat([p, c_expand], dim=1), flattened to
  # the kernel's (c_dim, M) layout with M = B*N on the lane axis.  This is a
  # few-KB XLA-side shuffle at c_dim=4; allow_input_fusion could fold it into
  # the kernel input but is omitted to keep lowering simple.
  B, N, D = x.shape
  p = jnp.transpose(x, (0, 2, 1)).astype(jnp.float32)            # (B, D, N)
  sig = jnp.broadcast_to(c.reshape(B, 1, 1).astype(jnp.float32), (B, 1, N))
  cxyz = jnp.concatenate([p, sig], axis=1)                       # (B, D+1, N)
  return jnp.transpose(cxyz, (1, 0, 2)).reshape(D + 1, B * N)    # (c_dim, M)


def _tpu_defaults():
  """(use_bf16_activations, physical VMEM bytes) for the local TPU generation."""
  use_bf16 = True                 # v6e / v7x: bf16-native VPU/EUP/MXU
  vmem_cap = 64 * 2**20           # conservative default (v7x per-core VMEM)
  try:
    kind = jax.devices()[0].device_kind.lower()
  except Exception:
    kind = ""
  # v5e and older have no bf16 VALU/EUP: bf16 activations would only add converts.
  if any(t in kind for t in ("v2", "v3", "v4", "v5")):
    use_bf16 = False
  if any(t in kind for t in ("v2", "v3", "v4", "v5", "v6")):
    vmem_cap = 128 * 2**20
  try:
    vmem_cap = int(pltpu.get_tpu_info().vmem_capacity_bytes)
  except Exception:
    pass
  return use_bf16, vmem_cap


@functools.partial(jax.jit, static_argnames=("n_blocks", "use_bf16", "vmem_cap"))
def scorenet_forward(x, c, params, *, n_blocks, use_bf16=False,
                     vmem_cap=64 * 2**20):
  B, N, D = x.shape
  M = B * N
  c_dim = D + 1
  H = params["wp"].shape[0]
  act_dtype = jnp.bfloat16 if use_bf16 else jnp.float32
  abytes = 2 if use_bf16 else 4

  cxyz = _build_cxyz(x, c).astype(act_dtype)
  wpc, wblk, vecs, wob = _pack_params(params, n_blocks, act_dtype)

  # VMEM budget: everything is resident (no grid => no double-buffered blocks).
  # Peak live activations ~ net + h/dx + cnd (+ one f32 BN-stats temp), plus
  # cxyz and the f32 output slab.  1.3x headroom, capped at 85% of physical VMEM.
  act_bytes = M * (H * (4 * abytes + 4) + c_dim * abytes + 4 * D)
  par_bytes = sum(int(a.size) * a.dtype.itemsize for a in (wpc, wblk, vecs, wob))
  vmem_limit = int(min(int(0.85 * vmem_cap),
                       max(4 * 2**20, int(1.3 * (act_bytes + par_bytes)))))

  out = pl.pallas_call(
      functools.partial(_scorenet_kernel, n_blocks=n_blocks, hidden=H,
                        acts_dtype=act_dtype),
      out_shape=jax.ShapeDtypeStruct((D, M), jnp.float32),
      in_specs=[pl.BlockSpec(memory_space=pltpu.MemorySpace.VMEM)] * 5,
      out_specs=pl.BlockSpec(memory_space=pltpu.MemorySpace.VMEM),
      compiler_params=pltpu.CompilerParams(vmem_limit_bytes=vmem_limit),
  )(cxyz, wpc, wblk, vecs, wob)
  # (D, M) -> (B, N, D) to match the PyTorch module's output layout.
  return out.reshape(D, B, N).transpose(1, 2, 0)


def scorenet_reference(x, c, params, *, n_blocks):
  # Pure-JAX f32 reference of the same forward pass (for validation).
  B, N, D = x.shape
  cxyz = _build_cxyz(x, c)                                       # (c_dim, M)
  hi = jax.lax.Precision.HIGHEST

  def bn(v, g, b):
    m = v.mean(1, keepdims=True)
    var = ((v - m) ** 2).mean(1, keepdims=True)
    return (v - m) / jnp.sqrt(var + EPS) * g[:, None] + b[:, None]

  net = jnp.maximum(
      jnp.dot(params["wp"], cxyz, precision=hi) + params["bp"][:, None], 0.0)
  for i in range(n_blocks):
    h = jnp.maximum(bn(net, params["bn0g"][i], params["bn0b"][i]), 0.0)
    h = jnp.dot(params["w0"][i], h, precision=hi) + params["b0"][i][:, None]
    h = jnp.maximum(bn(h, params["bn1g"][i], params["bn1b"][i]), 0.0)
    dx = jnp.dot(params["w1"][i], h, precision=hi) + params["b1"][i][:, None]
    net = (net + dx + jnp.dot(params["wc"][i], cxyz, precision=hi)
           + params["bc"][i][:, None])
  h = jnp.maximum(bn(net, params["bng"], params["bnb"]), 0.0)
  out = jnp.dot(params["wo"], h, precision=hi) + params["bo"][:, None]
  return out.reshape(D, B, N).transpose(1, 2, 0)


if __name__ == "__main__":
  IN_DIM = 3        # xyz coordinates (== out_dim)
  HIDDEN = 32       # small hidden size for the test
  N_BLOCKS = 5
  B, N = 2, 64      # batch, npoints  -> M = 128 lanes (lane-dense, no padding)

  key = jax.random.PRNGKey(0)
  kx, kc, kp = jax.random.split(key, 3)
  x = jax.random.normal(kx, (B, N, IN_DIM), jnp.float32)      # (bs, npoints, 3)
  c = jax.random.uniform(kc, (B, 1), jnp.float32, 0.1, 1.0)   # (bs, 1) sigma
  params = init_params(kp, IN_DIM, HIDDEN, N_BLOCKS)

  # NOTE: BatchNorm1d running-mean/var buffer updates are stateful training-side
  # effects that do not affect the forward output and are intentionally omitted.
  use_bf16, vmem_cap = _tpu_defaults()

  ref = scorenet_reference(x, c, params, n_blocks=N_BLOCKS)

  # 1) f32 path: runs on every generation; tight check of kernel semantics
  #    (incl. the single-pass fused-BN algebra).
  out_f32 = jax.block_until_ready(scorenet_forward(
      x, c, params, n_blocks=N_BLOCKS, use_bf16=False, vmem_cap=vmem_cap))
  assert out_f32.shape == (B, N, IN_DIM), out_f32.shape
  assert jnp.allclose(out_f32, ref, atol=1e-2, rtol=1e-2), \
      float(jnp.max(jnp.abs(out_f32 - ref)))

  # 2) Production config on bf16-native chips (v6e/v7x): bf16-resident
  #    activations.  BN's 1/sigma amplifies bf16 quantization of low-variance
  #    channels at these toy-init scales, so the bf16 path is checked at a
  #    correspondingly looser tolerance (stats themselves stay f32).
  if use_bf16:
    out_bf = jax.block_until_ready(scorenet_forward(
        x, c, params, n_blocks=N_BLOCKS, use_bf16=True, vmem_cap=vmem_cap))
    assert out_bf.shape == (B, N, IN_DIM), out_bf.shape
    assert jnp.allclose(out_bf, ref, atol=2e-1, rtol=2e-1), \
        float(jnp.max(jnp.abs(out_bf - ref)))

  print("KERNEL_OK")
</pallas_src>

<mosaic_0001>
module attributes {stable_mosaic.version = 11 : i64} {
  func.func @_scorenet_kernel(%arg0: memref<4x128xf32, #tpu.memory_space<vmem>>, %arg1: memref<192x4xf32, #tpu.memory_space<vmem>>, %arg2: memref<10x32x32xf32, #tpu.memory_space<vmem>>, %arg3: memref<32x33xf32, #tpu.memory_space<vmem>>, %arg4: memref<3x33xf32, #tpu.memory_space<vmem>>, %arg5: memref<3x128xf32, #tpu.memory_space<vmem>>) attributes {dimension_semantics = [], scalar_prefetch = 0 : i64, scratch_operands = 0 : i64, tpu.core_type = #tpu.core_type<tc>} {
    %c0 = arith.constant 0 : index
    %c0_0 = arith.constant 0 : index
    %0 = vector.load %arg0[%c0, %c0_0] : memref<4x128xf32, #tpu.memory_space<vmem>>, vector<4x128xf32>
    %c0_1 = arith.constant 0 : index
    %c0_2 = arith.constant 0 : index
    %1 = vector.load %arg3[%c0_1, %c0_2] : memref<32x33xf32, #tpu.memory_space<vmem>>, vector<32x33xf32>
    %c0_3 = arith.constant 0 : index
    %c0_4 = arith.constant 0 : index
    %2 = vector.load %arg1[%c0_3, %c0_4] : memref<192x4xf32, #tpu.memory_space<vmem>>, vector<32x4xf32>
    %cst = arith.constant dense<0.000000e+00> : vector<32x128xf32>
    %3 = tpu.matmul %2, %0, %cst {dimension_numbers = #tpu.dot_dimension_numbers<[1], [0], [0], [1], [0, 0, 1, 1], [], []>} : vector<32x4xf32>, vector<4x128xf32>, vector<32x128xf32> -> vector<32x128xf32>
    %4 = vector.extract_strided_slice %1 {offsets = [0, 0], sizes = [32, 1], strides = [1, 1]} : vector<32x33xf32> to vector<32x1xf32>
    %5 = vector.broadcast %4 : vector<32x1xf32> to vector<32x128xf32>
    %6 = arith.addf %3, %5 : vector<32x128xf32>
    %cst_5 = arith.constant 0.000000e+00 : f32
    %7 = vector.broadcast %cst_5 : f32 to vector<32x128xf32>
    %8 = arith.maximumf %6, %7 : vector<32x128xf32>
    %9 = vector.extract_strided_slice %1 {offsets = [0, 1], sizes = [32, 1], strides = [1, 1]} : vector<32x33xf32> to vector<32x1xf32>
    %10 = vector.extract_strided_slice %1 {offsets = [0, 2], sizes = [32, 1], strides = [1, 1]} : vector<32x33xf32> to vector<32x1xf32>
    %cst_6 = arith.constant dense<0.000000e+00> : vector<32xf32>
    %11 = vector.multi_reduction <add>, %8, %cst_6 [1] : vector<32x128xf32> to vector<32xf32>
    %12 = vector.shape_cast %11 : vector<32xf32> to vector<32x1xf32>
    %cst_7 = arith.constant 7.812500e-03 : f32
    %13 = vector.broadcast %cst_7 : f32 to vector<32x1xf32>
    %14 = arith.mulf %12, %13 : vector<32x1xf32>
    %15 = arith.mulf %8, %8 : vector<32x128xf32>
    %cst_8 = arith.constant dense<0.000000e+00> : vector<32xf32>
    %16 = vector.multi_reduction <add>, %15, %cst_8 [1] : vector<32x128xf32> to vector<32xf32>
    %17 = vector.shape_cast %16 : vector<32xf32> to vector<32x1xf32>
    %cst_9 = arith.constant 7.812500e-03 : f32
    %18 = vector.broadcast %cst_9 : f32 to vector<32x1xf32>
    %19 = arith.mulf %17, %18 : vector<32x1xf32>
    %20 = arith.mulf %14, %14 : vector<32x1xf32>
    %21 = arith.subf %19, %20 : vector<32x1xf32>
    %cst_10 = arith.constant 9.99999974E-6 : f32
    %22 = vector.broadcast %cst_10 : f32 to vector<32x1xf32>
    %23 = arith.addf %21, %22 : vector<32x1xf32>
    %24 = math.rsqrt %23 : vector<32x1xf32>
    %25 = arith.mulf %9, %24 : vector<32x1xf32>
    %26 = arith.mulf %14, %25 : vector<32x1xf32>
    %27 = arith.subf %10, %26 : vector<32x1xf32>
    %28 = vector.broadcast %25 : vector<32x1xf32> to vector<32x128xf32>
    %29 = arith.mulf %8, %28 : vector<32x128xf32>
    %30 = vector.broadcast %27 : vector<32x1xf32> to vector<32x128xf32>
    %31 = arith.addf %29, %30 : vector<32x128xf32>
    %cst_11 = arith.constant 0.000000e+00 : f32
    %32 = vector.broadcast %cst_11 : f32 to vector<32x128xf32>
    %33 = arith.maximumf %31, %32 : vector<32x128xf32>
    %c0_12 = arith.constant 0 : index
    %c0_13 = arith.constant 0 : index
    %c0_14 = arith.constant 0 : index
    %34 = vector.load %arg2[%c0_12, %c0_13, %c0_14] : memref<10x32x32xf32, #tpu.memory_space<vmem>>, vector<1x32x32xf32>
    %35 = vector.shape_cast %34 : vector<1x32x32xf32> to vector<32x32xf32>
    %cst_15 = arith.constant dense<0.000000e+00> : vector<32x128xf32>
    %36 = tpu.matmul %35, %33, %cst_15 {dimension_numbers = #tpu.dot_dimension_numbers<[1], [0], [0], [1], [0, 0, 1, 1], [], []>} : vector<32x32xf32>, vector<32x128xf32>, vector<32x128xf32> -> vector<32x128xf32>
    %37 = vector.extract_strided_slice %1 {offsets = [0, 3], sizes = [32, 1], strides = [1, 1]} : vector<32x33xf32> to vector<32x1xf32>
    %38 = vector.broadcast %37 : vector<32x1xf32> to vector<32x128xf32>
    %39 = arith.addf %36, %38 : vector<32x128xf32>
    %40 = vector.extract_strided_slice %1 {offsets = [0, 4], sizes = [32, 1], strides = [1, 1]} : vector<32x33xf32> to vector<32x1xf32>
    %41 = vector.extract_strided_slice %1 {offsets = [0, 5], sizes = [32, 1], strides = [1, 1]} : vector<32x33xf32> to vector<32x1xf32>
    %cst_16 = arith.constant dense<0.000000e+00> : vector<32xf32>
    %42 = vector.multi_reduction <add>, %39, %cst_16 [1] : vector<32x128xf32> to vector<32xf32>
    %43 = vector.shape_cast %42 : vector<32xf32> to vector<32x1xf32>
    %cst_17 = arith.constant 7.812500e-03 : f32
    %44 = vector.broadcast %cst_17 : f32 to vector<32x1xf32>
    %45 = arith.mulf %43, %44 : vector<32x1xf32>
    %46 = arith.mulf %39, %39 : vector<32x128xf32>
    %cst_18 = arith.constant dense<0.000000e+00> : vector<32xf32>
    %47 = vector.multi_reduction <add>, %46, %cst_18 [1] : vector<32x128xf32> to vector<32xf32>
    %48 = vector.shape_cast %47 : vector<32xf32> to vector<32x1xf32>
    %cst_19 = arith.constant 7.812500e-03 : f32
    %49 = vector.broadcast %cst_19 : f32 to vector<32x1xf32>
    %50 = arith.mulf %48, %49 : vector<32x1xf32>
    %51 = arith.mulf %45, %45 : vector<32x1xf32>
    %52 = arith.subf %50, %51 : vector<32x1xf32>
    %cst_20 = arith.constant 9.99999974E-6 : f32
    %53 = vector.broadcast %cst_20 : f32 to vector<32x1xf32>
    %54 = arith.addf %52, %53 : vector<32x1xf32>
    %55 = math.rsqrt %54 : vector<32x1xf32>
    %56 = arith.mulf %40, %55 : vector<32x1xf32>
    %57 = arith.mulf %45, %56 : vector<32x1xf32>
    %58 = arith.subf %41, %57 : vector<32x1xf32>
    %59 = vector.broadcast %56 : vector<32x1xf32> to vector<32x128xf32>
    %60 = arith.mulf %39, %59 : vector<32x128xf32>
    %61 = vector.broadcast %58 : vector<32x1xf32> to vector<32x128xf32>
    %62 = arith.addf %60, %61 : vector<32x128xf32>
    %cst_21 = arith.constant 0.000000e+00 : f32
    %63 = vector.broadcast %cst_21 : f32 to vector<32x128xf32>
    %64 = arith.maximumf %62, %63 : vector<32x128xf32>
    %c5 = arith.constant 5 : index
    %c0_22 = arith.constant 0 : index
    %c0_23 = arith.constant 0 : index
    %65 = vector.load %arg2[%c5, %c0_22, %c0_23] : memref<10x32x32xf32, #tpu.memory_space<vmem>>, vector<1x32x32xf32>
    %66 = vector.shape_cast %65 : vector<1x32x32xf32> to vector<32x32xf32>
    %cst_24 = arith.constant dense<0.000000e+00> : vector<32x128xf32>
    %67 = tpu.matmul %66, %64, %cst_24 {dimension_numbers = #tpu.dot_dimension_numbers<[1], [0], [0], [1], [0, 0, 1, 1], [], []>} : vector<32x32xf32>, vector<32x128xf32>, vector<32x128xf32> -> vector<32x128xf32>
    %68 = vector.extract_strided_slice %1 {offsets = [0, 6], sizes = [32, 1], strides = [1, 1]} : vector<32x33xf32> to vector<32x1xf32>
    %69 = vector.broadcast %68 : vector<32x1xf32> to vector<32x128xf32>
    %70 = arith.addf %67, %69 : vector<32x128xf32>
    %c32 = arith.constant 32 : index
    %c0_25 = arith.constant 0 : index
    %71 = vector.load %arg1[%c32, %c0_25] : memref<192x4xf32, #tpu.memory_space<vmem>>, vector<32x4xf32>
    %cst_26 = arith.constant dense<0.000000e+00> : vector<32x128xf32>
    %72 = tpu.matmul %71, %0, %cst_26 {dimension_numbers = #tpu.dot_dimension_numbers<[1], [0], [0], [1], [0, 0, 1, 1], [], []>} : vector<32x4xf32>, vector<4x128xf32>, vector<32x128xf32> -> vector<32x128xf32>
    %73 = arith.addf %8, %70 : vector<32x128xf32>
    %74 = arith.addf %73, %72 : vector<32x128xf32>
    %75 = vector.extract_strided_slice %1 {offsets = [0, 7], sizes = [32, 1], strides = [1, 1]} : vector<32x33xf32> to vector<32x1xf32>
    %76 = vector.extract_strided_slice %1 {offsets = [0, 8], sizes = [32, 1], strides = [1, 1]} : vector<32x33xf32> to vector<32x1xf32>
    %cst_27 = arith.constant dense<0.000000e+00> : vector<32xf32>
    %77 = vector.multi_reduction <add>, %74, %cst_27 [1] : vector<32x128xf32> to vector<32xf32>
    %78 = vector.shape_cast %77 : vector<32xf32> to vector<32x1xf32>
    %cst_28 = arith.constant 7.812500e-03 : f32
    %79 = vector.broadcast %cst_28 : f32 to vector<32x1xf32>
    %80 = arith.mulf %78, %79 : vector<32x1xf32>
    %81 = arith.mulf %74, %74 : vector<32x128xf32>
    %cst_29 = arith.constant dense<0.000000e+00> : vector<32xf32>
    %82 = vector.multi_reduction <add>, %81, %cst_29 [1] : vector<32x128xf32> to vector<32xf32>
    %83 = vector.shape_cast %82 : vector<32xf32> to vector<32x1xf32>
    %cst_30 = arith.constant 7.812500e-03 : f32
    %84 = vector.broadcast %cst_30 : f32 to vector<32x1xf32>
    %85 = arith.mulf %83, %84 : vector<32x1xf32>
    %86 = arith.mulf %80, %80 : vector<32x1xf32>
    %87 = arith.subf %85, %86 : vector<32x1xf32>
    %cst_31 = arith.constant 9.99999974E-6 : f32
    %88 = vector.broadcast %cst_31 : f32 to vector<32x1xf32>
    %89 = arith.addf %87, %88 : vector<32x1xf32>
    %90 = math.rsqrt %89 : vector<32x1xf32>
    %91 = arith.mulf %75, %90 : vector<32x1xf32>
    %92 = arith.mulf %80, %91 : vector<32x1xf32>
    %93 = arith.subf %76, %92 : vector<32x1xf32>
    %94 = vector.broadcast %91 : vector<32x1xf32> to vector<32x128xf32>
    %95 = arith.mulf %74, %94 : vector<32x128xf32>
    %96 = vector.broadcast %93 : vector<32x1xf32> to vector<32x128xf32>
    %97 = arith.addf %95, %96 : vector<32x128xf32>
    %cst_32 = arith.constant 0.000000e+00 : f32
    %98 = vector.broadcast %cst_32 : f32 to vector<32x128xf32>
    %99 = arith.maximumf %97, %98 : vector<32x128xf32>
    %c1 = arith.constant 1 : index
    %c0_33 = arith.constant 0 : index
    %c0_34 = arith.constant 0 : index
    %100 = vector.load %arg2[%c1, %c0_33, %c0_34] : memref<10x32x32xf32, #tpu.memory_space<vmem>>, vector<1x32x32xf32>
    %101 = vector.shape_cast %100 : vector<1x32x32xf32> to vector<32x32xf32>
    %cst_35 = arith.constant dense<0.000000e+00> : vector<32x128xf32>
    %102 = tpu.matmul %101, %99, %cst_35 {dimension_numbers = #tpu.dot_dimension_numbers<[1], [0], [0], [1], [0, 0, 1, 1], [], []>} : vector<32x32xf32>, vector<32x128xf32>, vector<32x128xf32> -> vector<32x128xf32>
    %103 = vector.extract_strided_slice %1 {offsets = [0, 9], sizes = [32, 1], strides = [1, 1]} : vector<32x33xf32> to vector<32x1xf32>
    %104 = vector.broadcast %103 : vector<32x1xf32> to vector<32x128xf32>
    %105 = arith.addf %102, %104 : vector<32x128xf32>
    %106 = vector.extract_strided_slice %1 {offsets = [0, 10], sizes = [32, 1], strides = [1, 1]} : vector<32x33xf32> to vector<32x1xf32>
    %107 = vector.extract_strided_slice %1 {offsets = [0, 11], sizes = [32, 1], strides = [1, 1]} : vector<32x33xf32> to vector<32x1xf32>
    %cst_36 = arith.constant dense<0.000000e+00> : vector<32xf32>
    %108 = vector.multi_reduction <add>, %105, %cst_36 [1] : vector<32x128xf32> to vector<32xf32>
    %109 = vector.shape_cast %108 : vector<32xf32> to vector<32x1xf32>
    %cst_37 = arith.constant 7.812500e-03 : f32
    %110 = vector.broadcast %cst_37 : f32 to vector<32x1xf32>
    %111 = arith.mulf %109, %110 : vector<32x1xf32>
    %112 = arith.mulf %105, %105 : vector<32x128xf32>
    %cst_38 = arith.constant dense<0.000000e+00> : vector<32xf32>
    %113 = vector.multi_reduction <add>, %112, %cst_38 [1] : vector<32x128xf32> to vector<32xf32>
    %114 = vector.shape_cast %113 : vector<32xf32> to vector<32x1xf32>
    %cst_39 = arith.constant 7.812500e-03 : f32
    %115 = vector.broadcast %cst_39 : f32 to vector<32x1xf32>
    %116 = arith.mulf %114, %115 : vector<32x1xf32>
    %117 = arith.mulf %111, %111 : vector<32x1xf32>
    %118 = arith.subf %116, %117 : vector<32x1xf32>
    %cst_40 = arith.constant 9.99999974E-6 : f32
    %119 = vector.broadcast %cst_40 : f32 to vector<32x1xf32>
    %120 = arith.addf %118, %119 : vector<32x1xf32>
    %121 = math.rsqrt %120 : vector<32x1xf32>
    %122 = arith.mulf %106, %121 : vector<32x1xf32>
    %123 = arith.mulf %111, %122 : vector<32x1xf32>
    %124 = arith.subf %107, %123 : vector<32x1xf32>
    %125 = vector.broadcast %122 : vector<32x1xf32> to vector<32x128xf32>
    %126 = arith.mulf %105, %125 : vector<32x128xf32>
    %127 = vector.broadcast %124 : vector<32x1xf32> to vector<32x128xf32>
    %128 = arith.addf %126, %127 : vector<32x128xf32>
    %cst_41 = arith.constant 0.000000e+00 : f32
    %129 = vector.broadcast %cst_41 : f32 to vector<32x128xf32>
    %130 = arith.maximumf %128, %129 : vector<32x128xf32>
    %c6 = arith.constant 6 : index
    %c0_42 = arith.constant 0 : index
    %c0_43 = arith.constant 0 : index
    %131 = vector.load %arg2[%c6, %c0_42, %c0_43] : memref<10x32x32xf32, #tpu.memory_space<vmem>>, vector<1x32x32xf32>
    %132 = vector.shape_cast %131 : vector<1x32x32xf32> to vector<32x32xf32>
    %cst_44 = arith.constant dense<0.000000e+00> : vector<32x128xf32>
    %133 = tpu.matmul %132, %130, %cst_44 {dimension_numbers = #tpu.dot_dimension_numbers<[1], [0], [0], [1], [0, 0, 1, 1], [], []>} : vector<32x32xf32>, vector<32x128xf32>, vector<32x128xf32> -> vector<32x128xf32>
    %134 = vector.extract_strided_slice %1 {offsets = [0, 12], sizes = [32, 1], strides = [1, 1]} : vector<32x33xf32> to vector<32x1xf32>
    %135 = vector.broadcast %134 : vector<32x1xf32> to vector<32x128xf32>
    %136 = arith.addf %133, %135 : vector<32x128xf32>
    %c64 = arith.constant 64 : index
    %c0_45 = arith.constant 0 : index
    %137 = vector.load %arg1[%c64, %c0_45] : memref<192x4xf32, #tpu.memory_space<vmem>>, vector<32x4xf32>
    %cst_46 = arith.constant dense<0.000000e+00> : vector<32x128xf32>
    %138 = tpu.matmul %137, %0, %cst_46 {dimension_numbers = #tpu.dot_dimension_numbers<[1], [0], [0], [1], [0, 0, 1, 1], [], []>} : vector<32x4xf32>, vector<4x128xf32>, vector<32x128xf32> -> vector<32x128xf32>
    %139 = arith.addf %74, %136 : vector<32x128xf32>
    %140 = arith.addf %139, %138 : vector<32x128xf32>
    %141 = vector.extract_strided_slice %1 {offsets = [0, 13], sizes = [32, 1], strides = [1, 1]} : vector<32x33xf32> to vector<32x1xf32>
    %142 = vector.extract_strided_slice %1 {offsets = [0, 14], sizes = [32, 1], strides = [1, 1]} : vector<32x33xf32> to vector<32x1xf32>
    %cst_47 = arith.constant dense<0.000000e+00> : vector<32xf32>
    %143 = vector.multi_reduction <add>, %140, %cst_47 [1] : vector<32x128xf32> to vector<32xf32>
    %144 = vector.shape_cast %143 : vector<32xf32> to vector<32x1xf32>
    %cst_48 = arith.constant 7.812500e-03 : f32
    %145 = vector.broadcast %cst_48 : f32 to vector<32x1xf32>
    %146 = arith.mulf %144, %145 : vector<32x1xf32>
    %147 = arith.mulf %140, %140 : vector<32x128xf32>
    %cst_49 = arith.constant dense<0.000000e+00> : vector<32xf32>
    %148 = vector.multi_reduction <add>, %147, %cst_49 [1] : vector<32x128xf32> to vector<32xf32>
    %149 = vector.shape_cast %148 : vector<32xf32> to vector<32x1xf32>
    %cst_50 = arith.constant 7.812500e-03 : f32
    %150 = vector.broadcast %cst_50 : f32 to vector<32x1xf32>
    %151 = arith.mulf %149, %150 : vector<32x1xf32>
    %152 = arith.mulf %146, %146 : vector<32x1xf32>
    %153 = arith.subf %151, %152 : vector<32x1xf32>
    %cst_51 = arith.constant 9.99999974E-6 : f32
    %154 = vector.broadcast %cst_51 : f32 to vector<32x1xf32>
    %155 = arith.addf %153, %154 : vector<32x1xf32>
    %156 = math.rsqrt %155 : vector<32x1xf32>
    %157 = arith.mulf %141, %156 : vector<32x1xf32>
    %158 = arith.mulf %146, %157 : vector<32x1xf32>
    %159 = arith.subf %142, %158 : vector<32x1xf32>
    %160 = vector.broadcast %157 : vector<32x1xf32> to vector<32x128xf32>
    %161 = arith.mulf %140, %160 : vector<32x128xf32>
    %162 = vector.broadcast %159 : vector<32x1xf32> to vector<32x128xf32>
    %163 = arith.addf %161, %162 : vector<32x128xf32>
    %cst_52 = arith.constant 0.000000e+00 : f32
    %164 = vector.broadcast %cst_52 : f32 to vector<32x128xf32>
    %165 = arith.maximumf %163, %164 : vector<32x128xf32>
    %c2 = arith.constant 2 : index
    %c0_53 = arith.constant 0 : index
    %c0_54 = arith.constant 0 : index
    %166 = vector.load %arg2[%c2, %c0_53, %c0_54] : memref<10x32x32xf32, #tpu.memory_space<vmem>>, vector<1x32x32xf32>
    %167 = vector.shape_cast %166 : vector<1x32x32xf32> to vector<32x32xf32>
    %cst_55 = arith.constant dense<0.000000e+00> : vector<32x128xf32>
    %168 = tpu.matmul %167, %165, %cst_55 {dimension_numbers = #tpu.dot_dimension_numbers<[1], [0], [0], [1], [0, 0, 1, 1], [], []>} : vector<32x32xf32>, vector<32x128xf32>, vector<32x128xf32> -> vector<32x128xf32>
    %169 = vector.extract_strided_slice %1 {offsets = [0, 15], sizes = [32, 1], strides = [1, 1]} : vector<32x33xf32> to vector<32x1xf32>
    %170 = vector.broadcast %169 : vector<32x1xf32> to vector<32x128xf32>
    %171 = arith.addf %168, %170 : vector<32x128xf32>
    %172 = vector.extract_strided_slice %1 {offsets = [0, 16], sizes = [32, 1], strides = [1, 1]} : vector<32x33xf32> to vector<32x1xf32>
    %173 = vector.extract_strided_slice %1 {offsets = [0, 17], sizes = [32, 1], strides = [1, 1]} : vector<32x33xf32> to vector<32x1xf32>
    %cst_56 = arith.constant dense<0.000000e+00> : vector<32xf32>
    %174 = vector.multi_reduction <add>, %171, %cst_56 [1] : vector<32x128xf32> to vector<32xf32>
    %175 = vector.shape_cast %174 : vector<32xf32> to vector<32x1xf32>
    %cst_57 = arith.constant 7.812500e-03 : f32
    %176 = vector.broadcast %cst_57 : f32 to vector<32x1xf32>
    %177 = arith.mulf %175, %176 : vector<32x1xf32>
    %178 = arith.mulf %171, %171 : vector<32x128xf32>
    %cst_58 = arith.constant dense<0.000000e+00> : vector<32xf32>
    %179 = vector.multi_reduction <add>, %178, %cst_58 [1] : vector<32x128xf32> to vector<32xf32>
    %180 = vector.shape_cast %179 : vector<32xf32> to vector<32x1xf32>
    %cst_59 = arith.constant 7.812500e-03 : f32
    %181 = vector.broadcast %cst_59 : f32 to vector<32x1xf32>
    %182 = arith.mulf %180, %181 : vector<32x1xf32>
    %183 = arith.mulf %177, %177 : vector<32x1xf32>
    %184 = arith.subf %182, %183 : vector<32x1xf32>
    %cst_60 = arith.constant 9.99999974E-6 : f32
    %185 = vector.broadcast %cst_60 : f32 to vector<32x1xf32>
    %186 = arith.addf %184, %185 : vector<32x1xf32>
    %187 = math.rsqrt %186 : vector<32x1xf32>
    %188 = arith.mulf %172, %187 : vector<32x1xf32>
    %189 = arith.mulf %177, %188 : vector<32x1xf32>
    %190 = arith.subf %173, %189 : vector<32x1xf32>
    %191 = vector.broadcast %188 : vector<32x1xf32> to vector<32x128xf32>
    %192 = arith.mulf %171, %191 : vector<32x128xf32>
    %193 = vector.broadcast %190 : vector<32x1xf32> to vector<32x128xf32>
    %194 = arith.addf %192, %193 : vector<32x128xf32>
    %cst_61 = arith.constant 0.000000e+00 : f32
    %195 = vector.broadcast %cst_61 : f32 to vector<32x128xf32>
    %196 = arith.maximumf %194, %195 : vector<32x128xf32>
    %c7 = arith.constant 7 : index
    %c0_62 = arith.constant 0 : index
    %c0_63 = arith.constant 0 : index
    %197 = vector.load %arg2[%c7, %c0_62, %c0_63] : memref<10x32x32xf32, #tpu.memory_space<vmem>>, vector<1x32x32xf32>
    %198 = vector.shape_cast %197 : vector<1x32x32xf32> to vector<32x32xf32>
    %cst_64 = arith.constant dense<0.000000e+00> : vector<32x128xf32>
    %199 = tpu.matmul %198, %196, %cst_64 {dimension_numbers = #tpu.dot_dimension_numbers<[1], [0], [0], [1], [0, 0, 1, 1], [], []>} : vector<32x32xf32>, vector<32x128xf32>, vector<32x128xf32> -> vector<32x128xf32>
    %200 = vector.extract_strided_slice %1 {offsets = [0, 18], sizes = [32, 1], strides = [1, 1]} : vector<32x33xf32> to vector<32x1xf32>
    %201 = vector.broadcast %200 : vector<32x1xf32> to vector<32x128xf32>
    %202 = arith.addf %199, %201 : vector<32x128xf32>
    %c96 = arith.constant 96 : index
    %c0_65 = arith.constant 0 : index
    %203 = vector.load %arg1[%c96, %c0_65] : memref<192x4xf32, #tpu.memory_space<vmem>>, vector<32x4xf32>
    %cst_66 = arith.constant dense<0.000000e+00> : vector<32x128xf32>
    %204 = tpu.matmul %203, %0, %cst_66 {dimension_numbers = #tpu.dot_dimension_numbers<[1], [0], [0], [1], [0, 0, 1, 1], [], []>} : vector<32x4xf32>, vector<4x128xf32>, vector<32x128xf32> -> vector<32x128xf32>
    %205 = arith.addf %140, %202 : vector<32x128xf32>
    %206 = arith.addf %205, %204 : vector<32x128xf32>
    %207 = vector.extract_strided_slice %1 {offsets = [0, 19], sizes = [32, 1], strides = [1, 1]} : vector<32x33xf32> to vector<32x1xf32>
    %208 = vector.extract_strided_slice %1 {offsets = [0, 20], sizes = [32, 1], strides = [1, 1]} : vector<32x33xf32> to vector<32x1xf32>
    %cst_67 = arith.constant dense<0.000000e+00> : vector<32xf32>
    %209 = vector.multi_reduction <add>, %206, %cst_67 [1] : vector<32x128xf32> to vector<32xf32>
    %210 = vector.shape_cast %209 : vector<32xf32> to vector<32x1xf32>
    %cst_68 = arith.constant 7.812500e-03 : f32
    %211 = vector.broadcast %cst_68 : f32 to vector<32x1xf32>
    %212 = arith.mulf %210, %211 : vector<32x1xf32>
    %213 = arith.mulf %206, %206 : vector<32x128xf32>
    %cst_69 = arith.constant dense<0.000000e+00> : vector<32xf32>
    %214 = vector.multi_reduction <add>, %213, %cst_69 [1] : vector<32x128xf32> to vector<32xf32>
    %215 = vector.shape_cast %214 : vector<32xf32> to vector<32x1xf32>
    %cst_70 = arith.constant 7.812500e-03 : f32
    %216 = vector.broadcast %cst_70 : f32 to vector<32x1xf32>
    %217 = arith.mulf %215, %216 : vector<32x1xf32>
    %218 = arith.mulf %212, %212 : vector<32x1xf32>
    %219 = arith.subf %217, %218 : vector<32x1xf32>
    %cst_71 = arith.constant 9.99999974E-6 : f32
    %220 = vector.broadcast %cst_71 : f32 to vector<32x1xf32>
    %221 = arith.addf %219, %220 : vector<32x1xf32>
    %222 = math.rsqrt %221 : vector<32x1xf32>
    %223 = arith.mulf %207, %222 : vector<32x1xf32>
    %224 = arith.mulf %212, %223 : vector<32x1xf32>
    %225 = arith.subf %208, %224 : vector<32x1xf32>
    %226 = vector.broadcast %223 : vector<32x1xf32> to vector<32x128xf32>
    %227 = arith.mulf %206, %226 : vector<32x128xf32>
    %228 = vector.broadcast %225 : vector<32x1xf32> to vector<32x128xf32>
    %229 = arith.addf %227, %228 : vector<32x128xf32>
    %cst_72 = arith.constant 0.000000e+00 : f32
    %230 = vector.broadcast %cst_72 : f32 to vector<32x128xf32>
    %231 = arith.maximumf %229, %230 : vector<32x128xf32>
    %c3 = arith.constant 3 : index
    %c0_73 = arith.constant 0 : index
    %c0_74 = arith.constant 0 : index
    %232 = vector.load %arg2[%c3, %c0_73, %c0_74] : memref<10x32x32xf32, #tpu.memory_space<vmem>>, vector<1x32x32xf32>
    %233 = vector.shape_cast %232 : vector<1x32x32xf32> to vector<32x32xf32>
    %cst_75 = arith.constant dense<0.000000e+00> : vector<32x128xf32>
    %234 = tpu.matmul %233, %231, %cst_75 {dimension_numbers = #tpu.dot_dimension_numbers<[1], [0], [0], [1], [0, 0, 1, 1], [], []>} : vector<32x32xf32>, vector<32x128xf32>, vector<32x128xf32> -> vector<32x128xf32>
    %235 = vector.extract_strided_slice %1 {offsets = [0, 21], sizes = [32, 1], strides = [1, 1]} : vector<32x33xf32> to vector<32x1xf32>
    %236 = vector.broadcast %235 : vector<32x1xf32> to vector<32x128xf32>
    %237 = arith.addf %234, %236 : vector<32x128xf32>
    %238 = vector.extract_strided_slice %1 {offsets = [0, 22], sizes = [32, 1], strides = [1, 1]} : vector<32x33xf32> to vector<32x1xf32>
    %239 = vector.extract_strided_slice %1 {offsets = [0, 23], sizes = [32, 1], strides = [1, 1]} : vector<32x33xf32> to vector<32x1xf32>
    %cst_76 = arith.constant dense<0.000000e+00> : vector<32xf32>
    %240 = vector.multi_reduction <add>, %237, %cst_76 [1] : vector<32x128xf32> to vector<32xf32>
    %241 = vector.shape_cast %240 : vector<32xf32> to vector<32x1xf32>
    %cst_77 = arith.constant 7.812500e-03 : f32
    %242 = vector.broadcast %cst_77 : f32 to vector<32x1xf32>
    %243 = arith.mulf %241, %242 : vector<32x1xf32>
    %244 = arith.mulf %237, %237 : vector<32x128xf32>
    %cst_78 = arith.constant dense<0.000000e+00> : vector<32xf32>
    %245 = vector.multi_reduction <add>, %244, %cst_78 [1] : vector<32x128xf32> to vector<32xf32>
    %246 = vector.shape_cast %245 : vector<32xf32> to vector<32x1xf32>
    %cst_79 = arith.constant 7.812500e-03 : f32
    %247 = vector.broadcast %cst_79 : f32 to vector<32x1xf32>
    %248 = arith.mulf %246, %247 : vector<32x1xf32>
    %249 = arith.mulf %243, %243 : vector<32x1xf32>
    %250 = arith.subf %248, %249 : vector<32x1xf32>
    %cst_80 = arith.constant 9.99999974E-6 : f32
    %251 = vector.broadcast %cst_80 : f32 to vector<32x1xf32>
    %252 = arith.addf %250, %251 : vector<32x1xf32>
    %253 = math.rsqrt %252 : vector<32x1xf32>
    %254 = arith.mulf %238, %253 : vector<32x1xf32>
    %255 = arith.mulf %243, %254 : vector<32x1xf32>
    %256 = arith.subf %239, %255 : vector<32x1xf32>
    %257 = vector.broadcast %254 : vector<32x1xf32> to vector<32x128xf32>
    %258 = arith.mulf %237, %257 : vector<32x128xf32>
    %259 = vector.broadcast %256 : vector<32x1xf32> to vector<32x128xf32>
    %260 = arith.addf %258, %259 : vector<32x128xf32>
    %cst_81 = arith.constant 0.000000e+00 : f32
    %261 = vector.broadcast %cst_81 : f32 to vector<32x128xf32>
    %262 = arith.maximumf %260, %261 : vector<32x128xf32>
    %c8 = arith.constant 8 : index
    %c0_82 = arith.constant 0 : index
    %c0_83 = arith.constant 0 : index
    %263 = vector.load %arg2[%c8, %c0_82, %c0_83] : memref<10x32x32xf32, #tpu.memory_space<vmem>>, vector<1x32x32xf32>
    %264 = vector.shape_cast %263 : vector<1x32x32xf32> to vector<32x32xf32>
    %cst_84 = arith.constant dense<0.000000e+00> : vector<32x128xf32>
    %265 = tpu.matmul %264, %262, %cst_84 {dimension_numbers = #tpu.dot_dimension_numbers<[1], [0], [0], [1], [0, 0, 1, 1], [], []>} : vector<32x32xf32>, vector<32x128xf32>, vector<32x128xf32> -> vector<32x128xf32>
    %266 = vector.extract_strided_slice %1 {offsets = [0, 24], sizes = [32, 1], strides = [1, 1]} : vector<32x33xf32> to vector<32x1xf32>
    %267 = vector.broadcast %266 : vector<32x1xf32> to vector<32x128xf32>
    %268 = arith.addf %265, %267 : vector<32x128xf32>
    %c128 = arith.constant 128 : index
    %c0_85 = arith.constant 0 : index
    %269 = vector.load %arg1[%c128, %c0_85] : memref<192x4xf32, #tpu.memory_space<vmem>>, vector<32x4xf32>
    %cst_86 = arith.constant dense<0.000000e+00> : vector<32x128xf32>
    %270 = tpu.matmul %269, %0, %cst_86 {dimension_numbers = #tpu.dot_dimension_numbers<[1], [0], [0], [1], [0, 0, 1, 1], [], []>} : vector<32x4xf32>, vector<4x128xf32>, vector<32x128xf32> -> vector<32x128xf32>
    %271 = arith.addf %206, %268 : vector<32x128xf32>
    %272 = arith.addf %271, %270 : vector<32x128xf32>
    %273 = vector.extract_strided_slice %1 {offsets = [0, 25], sizes = [32, 1], strides = [1, 1]} : vector<32x33xf32> to vector<32x1xf32>
    %274 = vector.extract_strided_slice %1 {offsets = [0, 26], sizes = [32, 1], strides = [1, 1]} : vector<32x33xf32> to vector<32x1xf32>
    %cst_87 = arith.constant dense<0.000000e+00> : vector<32xf32>
    %275 = vector.multi_reduction <add>, %272, %cst_87 [1] : vector<32x128xf32> to vector<32xf32>
    %276 = vector.shape_cast %275 : vector<32xf32> to vector<32x1xf32>
    %cst_88 = arith.constant 7.812500e-03 : f32
    %277 = vector.broadcast %cst_88 : f32 to vector<32x1xf32>
    %278 = arith.mulf %276, %277 : vector<32x1xf32>
    %279 = arith.mulf %272, %272 : vector<32x128xf32>
    %cst_89 = arith.constant dense<0.000000e+00> : vector<32xf32>
    %280 = vector.multi_reduction <add>, %279, %cst_89 [1] : vector<32x128xf32> to vector<32xf32>
    %281 = vector.shape_cast %280 : vector<32xf32> to vector<32x1xf32>
    %cst_90 = arith.constant 7.812500e-03 : f32
    %282 = vector.broadcast %cst_90 : f32 to vector<32x1xf32>
    %283 = arith.mulf %281, %282 : vector<32x1xf32>
    %284 = arith.mulf %278, %278 : vector<32x1xf32>
    %285 = arith.subf %283, %284 : vector<32x1xf32>
    %cst_91 = arith.constant 9.99999974E-6 : f32
    %286 = vector.broadcast %cst_91 : f32 to vector<32x1xf32>
    %287 = arith.addf %285, %286 : vector<32x1xf32>
    %288 = math.rsqrt %287 : vector<32x1xf32>
    %289 = arith.mulf %273, %288 : vector<32x1xf32>
    %290 = arith.mulf %278, %289 : vector<32x1xf32>
    %291 = arith.subf %274, %290 : vector<32x1xf32>
    %292 = vector.broadcast %289 : vector<32x1xf32> to vector<32x128xf32>
    %293 = arith.mulf %272, %292 : vector<32x128xf32>
    %294 = vector.broadcast %291 : vector<32x1xf32> to vector<32x128xf32>
    %295 = arith.addf %293, %294 : vector<32x128xf32>
    %cst_92 = arith.constant 0.000000e+00 : f32
    %296 = vector.broadcast %cst_92 : f32 to vector<32x128xf32>
    %297 = arith.maximumf %295, %296 : vector<32x128xf32>
    %c4 = arith.constant 4 : index
    %c0_93 = arith.constant 0 : index
    %c0_94 = arith.constant 0 : index
    %298 = vector.load %arg2[%c4, %c0_93, %c0_94] : memref<10x32x32xf32, #tpu.memory_space<vmem>>, vector<1x32x32xf32>
    %299 = vector.shape_cast %298 : vector<1x32x32xf32> to vector<32x32xf32>
    %cst_95 = arith.constant dense<0.000000e+00> : vector<32x128xf32>
    %300 = tpu.matmul %299, %297, %cst_95 {dimension_numbers = #tpu.dot_dimension_numbers<[1], [0], [0], [1], [0, 0, 1, 1], [], []>} : vector<32x32xf32>, vector<32x128xf32>, vector<32x128xf32> -> vector<32x128xf32>
    %301 = vector.extract_strided_slice %1 {offsets = [0, 27], sizes = [32, 1], strides = [1, 1]} : vector<32x33xf32> to vector<32x1xf32>
    %302 = vector.broadcast %301 : vector<32x1xf32> to vector<32x128xf32>
    %303 = arith.addf %300, %302 : vector<32x128xf32>
    %304 = vector.extract_strided_slice %1 {offsets = [0, 28], sizes = [32, 1], strides = [1, 1]} : vector<32x33xf32> to vector<32x1xf32>
    %305 = vector.extract_strided_slice %1 {offsets = [0, 29], sizes = [32, 1], strides = [1, 1]} : vector<32x33xf32> to vector<32x1xf32>
    %cst_96 = arith.constant dense<0.000000e+00> : vector<32xf32>
    %306 = vector.multi_reduction <add>, %303, %cst_96 [1] : vector<32x128xf32> to vector<32xf32>
    %307 = vector.shape_cast %306 : vector<32xf32> to vector<32x1xf32>
    %cst_97 = arith.constant 7.812500e-03 : f32
    %308 = vector.broadcast %cst_97 : f32 to vector<32x1xf32>
    %309 = arith.mulf %307, %308 : vector<32x1xf32>
    %310 = arith.mulf %303, %303 : vector<32x128xf32>
    %cst_98 = arith.constant dense<0.000000e+00> : vector<32xf32>
    %311 = vector.multi_reduction <add>, %310, %cst_98 [1] : vector<32x128xf32> to vector<32xf32>
    %312 = vector.shape_cast %311 : vector<32xf32> to vector<32x1xf32>
    %cst_99 = arith.constant 7.812500e-03 : f32
    %313 = vector.broadcast %cst_99 : f32 to vector<32x1xf32>
    %314 = arith.mulf %312, %313 : vector<32x1xf32>
    %315 = arith.mulf %309, %309 : vector<32x1xf32>
    %316 = arith.subf %314, %315 : vector<32x1xf32>
    %cst_100 = arith.constant 9.99999974E-6 : f32
    %317 = vector.broadcast %cst_100 : f32 to vector<32x1xf32>
    %318 = arith.addf %316, %317 : vector<32x1xf32>
    %319 = math.rsqrt %318 : vector<32x1xf32>
    %320 = arith.mulf %304, %319 : vector<32x1xf32>
    %321 = arith.mulf %309, %320 : vector<32x1xf32>
    %322 = arith.subf %305, %321 : vector<32x1xf32>
    %323 = vector.broadcast %320 : vector<32x1xf32> to vector<32x128xf32>
    %324 = arith.mulf %303, %323 : vector<32x128xf32>
    %325 = vector.broadcast %322 : vector<32x1xf32> to vector<32x128xf32>
    %326 = arith.addf %324, %325 : vector<32x128xf32>
    %cst_101 = arith.constant 0.000000e+00 : f32
    %327 = vector.broadcast %cst_101 : f32 to vector<32x128xf32>
    %328 = arith.maximumf %326, %327 : vector<32x128xf32>
    %c9 = arith.constant 9 : index
    %c0_102 = arith.constant 0 : index
    %c0_103 = arith.constant 0 : index
    %329 = vector.load %arg2[%c9, %c0_102, %c0_103] : memref<10x32x32xf32, #tpu.memory_space<vmem>>, vector<1x32x32xf32>
    %330 = vector.shape_cast %329 : vector<1x32x32xf32> to vector<32x32xf32>
    %cst_104 = arith.constant dense<0.000000e+00> : vector<32x128xf32>
    %331 = tpu.matmul %330, %328, %cst_104 {dimension_numbers = #tpu.dot_dimension_numbers<[1], [0], [0], [1], [0, 0, 1, 1], [], []>} : vector<32x32xf32>, vector<32x128xf32>, vector<32x128xf32> -> vector<32x128xf32>
    %332 = vector.extract_strided_slice %1 {offsets = [0, 30], sizes = [32, 1], strides = [1, 1]} : vector<32x33xf32> to vector<32x1xf32>
    %333 = vector.broadcast %332 : vector<32x1xf32> to vector<32x128xf32>
    %334 = arith.addf %331, %333 : vector<32x128xf32>
    %c160 = arith.constant 160 : index
    %c0_105 = arith.constant 0 : index
    %335 = vector.load %arg1[%c160, %c0_105] : memref<192x4xf32, #tpu.memory_space<vmem>>, vector<32x4xf32>
    %cst_106 = arith.constant dense<0.000000e+00> : vector<32x128xf32>
    %336 = tpu.matmul %335, %0, %cst_106 {dimension_numbers = #tpu.dot_dimension_numbers<[1], [0], [0], [1], [0, 0, 1, 1], [], []>} : vector<32x4xf32>, vector<4x128xf32>, vector<32x128xf32> -> vector<32x128xf32>
    %337 = arith.addf %272, %334 : vector<32x128xf32>
    %338 = arith.addf %337, %336 : vector<32x128xf32>
    %339 = vector.extract_strided_slice %1 {offsets = [0, 31], sizes = [32, 1], strides = [1, 1]} : vector<32x33xf32> to vector<32x1xf32>
    %340 = vector.extract_strided_slice %1 {offsets = [0, 32], sizes = [32, 1], strides = [1, 1]} : vector<32x33xf32> to vector<32x1xf32>
    %cst_107 = arith.constant dense<0.000000e+00> : vector<32xf32>
    %341 = vector.multi_reduction <add>, %338, %cst_107 [1] : vector<32x128xf32> to vector<32xf32>
    %342 = vector.shape_cast %341 : vector<32xf32> to vector<32x1xf32>
    %cst_108 = arith.constant 7.812500e-03 : f32
    %343 = vector.broadcast %cst_108 : f32 to vector<32x1xf32>
    %344 = arith.mulf %342, %343 : vector<32x1xf32>
    %345 = arith.mulf %338, %338 : vector<32x128xf32>
    %cst_109 = arith.constant dense<0.000000e+00> : vector<32xf32>
    %346 = vector.multi_reduction <add>, %345, %cst_109 [1] : vector<32x128xf32> to vector<32xf32>
    %347 = vector.shape_cast %346 : vector<32xf32> to vector<32x1xf32>
    %cst_110 = arith.constant 7.812500e-03 : f32
    %348 = vector.broadcast %cst_110 : f32 to vector<32x1xf32>
    %349 = arith.mulf %347, %348 : vector<32x1xf32>
    %350 = arith.mulf %344, %344 : vector<32x1xf32>
    %351 = arith.subf %349, %350 : vector<32x1xf32>
    %cst_111 = arith.constant 9.99999974E-6 : f32
    %352 = vector.broadcast %cst_111 : f32 to vector<32x1xf32>
    %353 = arith.addf %351, %352 : vector<32x1xf32>
    %354 = math.rsqrt %353 : vector<32x1xf32>
    %355 = arith.mulf %339, %354 : vector<32x1xf32>
    %356 = arith.mulf %344, %355 : vector<32x1xf32>
    %357 = arith.subf %340, %356 : vector<32x1xf32>
    %358 = vector.broadcast %355 : vector<32x1xf32> to vector<32x128xf32>
    %359 = arith.mulf %338, %358 : vector<32x128xf32>
    %360 = vector.broadcast %357 : vector<32x1xf32> to vector<32x128xf32>
    %361 = arith.addf %359, %360 : vector<32x128xf32>
    %cst_112 = arith.constant 0.000000e+00 : f32
    %362 = vector.broadcast %cst_112 : f32 to vector<32x128xf32>
    %363 = arith.maximumf %361, %362 : vector<32x128xf32>
    %c0_113 = arith.constant 0 : index
    %c0_114 = arith.constant 0 : index
    %364 = vector.load %arg4[%c0_113, %c0_114] : memref<3x33xf32, #tpu.memory_space<vmem>>, vector<3x32xf32>
    %c0_115 = arith.constant 0 : index
    %c32_116 = arith.constant 32 : index
    %365 = vector.load %arg4[%c0_115, %c32_116] : memref<3x33xf32, #tpu.memory_space<vmem>>, vector<3x1xf32>
    %cst_117 = arith.constant dense<0.000000e+00> : vector<3x128xf32>
    %366 = tpu.matmul %364, %363, %cst_117 {dimension_numbers = #tpu.dot_dimension_numbers<[1], [0], [0], [1], [0, 0, 1, 1], [], []>} : vector<3x32xf32>, vector<32x128xf32>, vector<3x128xf32> -> vector<3x128xf32>
    %367 = vector.broadcast %365 : vector<3x1xf32> to vector<3x128xf32>
    %368 = arith.addf %366, %367 : vector<3x128xf32>
    %c0_118 = arith.constant 0 : index
    %c0_119 = arith.constant 0 : index
    %369 = vector.load %arg5[%c0_118, %c0_119] : memref<3x128xf32, #tpu.memory_space<vmem>>, vector<3x128xf32>
    tpu.vector_store %arg5[%c0_118, %c0_119], %368 {strides = array<i32>} : memref<3x128xf32, #tpu.memory_space<vmem>>, vector<3x128xf32>,
    return
  }
}

</mosaic_0001>

<bundles_post_ra>
// kernel: scorenet_forward.1
= control target key start
LH: loop header
LB: loop body
LE: loop exit
PB: predicated region body
PF: predicated region fallthrough
CT: control target
= control target key end

     0   :  { %vm62_vm0 = vcmask 1043456   ;;  %vm49_vm1 = vcmask 31744   ;;  %v4095_v3 = vmov 0   ;;  %v4096_v30 = vmov 1   ;;  %s4097_s11 = smov 1   ;;  %s5102_s0 = inlined_call_operand.vmem [shape: f32[4,128], index: 0, kind: input, shape index: {}]   ;;  %s5103_s1 = inlined_call_operand.vmem [shape: f32[192,4], index: 1, kind: input, shape index: {}]   ;;  %s5104_s3 = inlined_call_operand.vmem [shape: f32[32,33], index: 3, kind: input, shape index: {}]   ;;  %s5105_s2 = inlined_call_operand.vmem [shape: f32[10,32,32], index: 2, kind: input, shape index: {}]   ;;  %s5106_s4 = inlined_call_operand.vmem [shape: f32[3,33], index: 4, kind: input, shape index: {}]   ;;  %s5107_s5 = inlined_call_operand.vmem [shape: f32[3,128], index: 5, kind: output, shape index: {}]  }
   0x1   :  { %v4165_v0 = vld [vmem:[%s5102_s0] sm:$0xf]  ;;  %v26_v2 = vld [vmem:[%s5103_s1 + $0x8] sm:$0xff]  ;;  %3931 = vset.pattern.permute.xlu0 %v4095_v3  ;;  %3932 = vset.pattern.permute.xlu1 %v4095_v3  ;;  %v27_v4 = vld [vmem:[%s5103_s1 + $0x10] sm:$0xff]  ;;  %vm299_vm2 = vcmask 261120   ;;  %vm4130_vm3 = vmmov 0  }
   0x2   :  { %v25_v1 = vld [vmem:[%s5103_s1] sm:$0xff]  ;;  %3549 = vmatprep.subr.msk.mxu1 %vm62_vm0, %v4165_v0  ;;  %v4190_v6 = vld [vmem:[%s5104_s3 + $0x10] sm:$0xff]  ;;  %v4196_v7 = vld [vmem:[%s5104_s3 + $0x8] sm:$0xff] }
   0x3   :  { %3551 = vmatprep.mubr.msk.f32.mxu1 %vm49_vm1, %v25_v1  ;;  %v4182_v5 = vld [vmem:[%s5104_s3] sm:$0xff]  ;;  %3550 = vmatpush3.msk.msra.mxu1 %vm62_vm0, %v4165_v0  ;;  %v28_v8 = vld [vmem:[%s5103_s1 + $0x18] sm:$0xff] }
   0x4   :  { %31 = vperm.xlu0 %3931, %v4182_v5   ;;  %3552 = vmatmul.mubr.msk.f32.vlgmr.msra.gmra.mrb[0].mxu1 %vm49_vm1, %v26_v2  ;;  %v4206_v9 = vld [vmem:[%s5104_s3 + $0x18] sm:$0xff] }
   0x5   :  { %41 = vperm.xlu1 %3932, %v4190_v6   ;;  %3554 = vmatprep.mubr.msk.f32.mxu1 %vm49_vm1, %v27_v4 }
   0x8   :  { %36 = vperm.xlu0 %3931, %v4196_v7   ;;  %3555 = vmatmul.mubr.msk.f32.gmra.mrb[2].mxu1 %vm49_vm1, %v28_v8 }
   0x9   :  { %46 = vperm.xlu1 %3932, %v4206_v9  }
   0xc   :  { %3933 = vset.pattern.permute.xlu0 %v4096_v30 }
   0xd   :  { %3934 = vset.pattern.permute.xlu1 %v4096_v30 }
  0x83   :  { %v32_v10 = vpop.permute.xlu0 %31 }
  0x84   :  { %v42_v17 = vpop.permute.xlu1 %41 }
  0x87   :  { %v37_v11 = vpop.permute.xlu0 %36 }
  0x88   :  { %v47_v24 = vpop.permute.xlu1 %46 }
  0xd7   :  { %v3553_v12 = vpop.f32.mrb[0].mxu1 }
  0xd8   :  { %v138_v13 = vadd.f32 %v3553_v12, %v37_v11  ;;  %v132_v14 = vpop.f32.mrb[1].mxu1  ;;  %v4098_v11 = vmov 2  }
  0xd9   :  { %v133_v15 = vadd.f32 %v132_v14, %v32_v10 }
  0xda   :  { %v4211_v16 = vmax.f32 %v138_v13, 0.0 }
  0xdb   :  { %v4213_v18 = vmax.f32 %v133_v15, 0.0  ;;  %v3556_v19 = vpop.f32.mrb[2].mxu1 }
  0xdc   :  { %157 = vadd.xlane.f32.xlu1 %v4211_v16  ;;  %v142_v20 = vpop.f32.mrb[3].mxu1  ;;  %v168_v23 = vmul.f32 %v4211_v16, %v4211_v16  ;;  %v148_v26 = vadd.f32 %v3556_v19, %v47_v24  ;;  %v279_v24 = vld [vmem:[%s5105_s2] sm:$0xff] }
  0xdd   :  { %v143_v21 = vadd.f32 %v142_v20, %v42_v17  ;;  %155 = vadd.xlane.f32.xlu0 %v4213_v18  ;;  %v167_v27 = vmul.f32 %v4213_v18, %v4213_v18  ;;  %3565 = vmatprep.mubr.msk.f32.mxu1 %vm299_vm2, %v279_v24 }
  0xde   :  { %v4226_v28 = vmax.f32 %v148_v26, 0.0 }
  0xdf   :  { %v4217_v22 = vmax.f32 %v143_v21, 0.0 }
  0xe0   :  { %v170_v29 = vmul.f32 %v4226_v28, %v4226_v28 }
  0xe1   :  { %159 = vadd.xlane.f32.xlu1 %v4217_v22  ;;  %173 = vadd.xlane.f32.xlu0 %v168_v23  ;;  %v169_v25 = vmul.f32 %v4217_v22, %v4217_v22 }
  0xe5   :  { %175 = vadd.xlane.f32.xlu1 %v169_v25  ;;  %171 = vadd.xlane.f32.xlu0 %v167_v27  ;;  %v4099_v25 = vmov 3  }
  0xe9   :  { %161 = vadd.xlane.f32.xlu0 %v4226_v28 }
  0xed   :  { %177 = vadd.xlane.f32.xlu0 %v170_v29 }
 0x169   :  { %v158_v31 = vpop.xlane.xlu1 %157 }
 0x16a   :  { %v156_v32 = vpop.xlane.xlu0 %155  ;;  %v164_v33 = vmul.f32 0.0078125, %v158_v31 }
 0x16b   :  { %v163_v37 = vmul.f32 0.0078125, %v156_v32 }
 0x16c   :  { %v184_v36 = vmul.f32 %v164_v33, %v164_v33 }
 0x16d   :  { %v183_v44 = vmul.f32 %v163_v37, %v163_v37 }
 0x16e   :  { %v160_v34 = vpop.xlane.xlu1 %159  ;;  %v174_v35 = vpop.xlane.xlu0 %173 }
 0x16f   :  { %v165_v38 = vmul.f32 0.0078125, %v160_v34  ;;  %v180_v39 = vmul.f32 0.0078125, %v174_v35 }
 0x171   :  { %v185_v40 = vmul.f32 %v165_v38, %v165_v38  ;;  %v188_v41 = vsub.f32 %v180_v39, %v184_v36 }
 0x172   :  { %v176_v42 = vpop.xlane.xlu1 %175  ;;  %v172_v43 = vpop.xlane.xlu0 %171 }
 0x173   :  { %v192_v45 = vadd.f32 1e-05, %v188_v41  ;;  %v181_v46 = vmul.f32 0.0078125, %v176_v42  ;;  %v179_v47 = vmul.f32 0.0078125, %v172_v43 }
 0x175   :  { %3997 = vrsqrt.f32 %v192_v45  ;;  %v189_v48 = vsub.f32 %v181_v46, %v185_v40  ;;  %v187_v49 = vsub.f32 %v179_v47, %v183_v44 }
 0x176   :  { %v162_v50 = vpop.xlane.xlu0 %161 }
 0x177   :  { %v193_v51 = vadd.f32 1e-05, %v189_v48  ;;  %v191_v52 = vadd.f32 1e-05, %v187_v49  ;;  %v166_v53 = vmul.f32 0.0078125, %v162_v50  ;;  %v280_v49 = vld [vmem:[%s5105_s2 + $0x8] sm:$0xff] }
 0x178   :  { %v281_v50 = vld [vmem:[%s5105_s2 + $0x10] sm:$0xff] }
 0x179   :  { %3999 = vrsqrt.f32 %v193_v51  ;;  %v186_v55 = vmul.f32 %v166_v53, %v166_v53  ;;  %v282_v51 = vld [vmem:[%s5105_s2 + $0x18] sm:$0xff] }
 0x17a   :  { %4001 = vrsqrt.f32 %v191_v52  ;;  %v178_v54 = vpop.xlane.xlu0 %177 }
 0x17b   :  { %v182_v56 = vmul.f32 0.0078125, %v178_v54 }
 0x17d   :  { %v190_v57 = vsub.f32 %v182_v56, %v186_v55 }
 0x17f   :  { %v3998_v58 = vpop.eup %3997  ;;  %v194_v59 = vadd.f32 1e-05, %v190_v57 }
 0x180   :  { %v200_v60 = vmul.f32 %v3998_v58, %v4196_v7 }
 0x181   :  { %4003 = vrsqrt.f32 %v194_v59 }
 0x182   :  { %v204_v61 = vmul.f32 %v200_v60, %v164_v33 }
 0x183   :  { %v4000_v62 = vpop.eup %3999 }
 0x184   :  { %v4002_v63 = vpop.eup %4001  ;;  %213 = vrot.lane.b32.xlu0 %v204_v61, %s4097_s11  ;;  %v201_v3 = vmul.f32 %v4000_v62, %v4190_v6 }
 0x185   :  { %v199_v1 = vmul.f32 %v4002_v63, %v4182_v5 }
 0x186   :  { %v205_v8 = vmul.f32 %v201_v3, %v165_v38 }
 0x187   :  { %v203_v2 = vmul.f32 %v199_v1, %v163_v37 }
 0x188   :  { %229 = vperm.xlu0 %3933, %v199_v1  }
 0x189   :  { %211 = vrot.lane.b32.xlu1 %v203_v2, %s4097_s11 }
 0x18b   :  { %v4004_v4 = vpop.eup %4003 }
 0x18c   :  { %v202_v10 = vmul.f32 %v4004_v4, %v4206_v9  ;;  %3935 = vset.pattern.permute.xlu0 %v4098_v11 }
 0x18d   :  { %215 = vrot.lane.b32.xlu1 %v205_v8, %s4097_s11  ;;  %v4100_v8 = vmov 4  }
 0x18e   :  { %v206_v12 = vmul.f32 %v202_v10, %v166_v53 }
 0x191   :  { %217 = vrot.lane.b32.xlu1 %v206_v12, %s4097_s11 }
 0x195   :  { %234 = vperm.xlu1 %3934, %v200_v60  }
 0x199   :  { %239 = vperm.xlu1 %3934, %v201_v3  }
 0x19d   :  { %244 = vperm.xlu1 %3934, %v202_v10  }
 0x1a1   :  { %3936 = vset.pattern.permute.xlu1 %v4098_v11 }
 0x1f6   :  { %v214_v13 = vpop.permute.xlu0 %213 }
 0x1f7   :  { %v224_v14 = vsub.f32 %v4196_v7, %v214_v13 }
 0x1f9   :  { %258 = vperm.xlu0 %3935, %v224_v14  }
 0x1fb   :  { %v212_v15 = vpop.permute.xlu1 %211 }
 0x1fc   :  { %v223_v17 = vsub.f32 %v4182_v5, %v212_v15 }
 0x1fe   :  { %253 = vperm.xlu1 %3936, %v223_v17  }
 0x1ff   :  { %v216_v19 = vpop.permute.xlu1 %215 }
 0x200   :  { %v225_v20 = vsub.f32 %v4190_v6, %v216_v19 }
 0x202   :  { %263 = vperm.xlu0 %3935, %v225_v20  }
 0x203   :  { %v218_v21 = vpop.permute.xlu1 %217 }
 0x204   :  { %v226_v23 = vsub.f32 %v4206_v9, %v218_v21 }
 0x206   :  { %268 = vperm.xlu1 %3936, %v226_v23   ;;  %3937 = vset.pattern.permute.xlu0 %v4099_v25 }
 0x207   :  { %284 = vperm.xlu0 %3937, %v4182_v5   ;;  %v230_v29 = vpop.permute.xlu0 %229 }
 0x208   :  { %v247_v33 = vmul.f32 %v230_v29, %v4213_v18 }
 0x20a   :  { %3938 = vset.pattern.permute.xlu1 %v4099_v25 }
 0x20b   :  { %288 = vperm.xlu1 %3938, %v4196_v7   ;;  %296 = vperm.xlu0 %3937, %v4206_v9  }
 0x20f   :  { %292 = vperm.xlu1 %3938, %v4190_v6   ;;  %3940 = vset.pattern.permute.xlu0 %v4100_v8 }
 0x213   :  { %3939 = vset.pattern.permute.xlu1 %v4100_v8  ;;  %v3336_v8 = vld [vmem:[%s5105_s2 + $0xa0] sm:$0xff] }
 0x214   :  { %v235_v26 = vpop.permute.xlu1 %234  ;;  %3579 = vmatprep.mubr.msk.f32.mxu0 %vm299_vm2, %v3336_v8 }
 0x215   :  { %v248_v32 = vmul.f32 %v235_v26, %v4211_v16 }
 0x218   :  { %v240_v27 = vpop.permute.xlu1 %239 }
 0x219   :  { %v249_v40 = vmul.f32 %v240_v27, %v4217_v22 }
 0x21c   :  { %v245_v30 = vpop.permute.xlu1 %244 }
 0x21d   :  { %v250_v42 = vmul.f32 %v245_v30, %v4226_v28 }
 0x278   :  { %v259_v31 = vpop.permute.xlu0 %258 }
 0x279   :  { %v272_v34 = vadd.f32 %v259_v31, %v248_v32 }
 0x27b   :  { %v276_v37 = vmax.f32 %v272_v34, 0.0 }
 0x27d   :  { %v254_v35 = vpop.permute.xlu1 %253 }
 0x27e   :  { %v271_v36 = vadd.f32 %v254_v35, %v247_v33 }
 0x280   :  { %v275_v38 = vmax.f32 %v271_v36, 0.0 }
 0x281   :  { %v264_v39 = vpop.permute.xlu0 %263 }
 0x282   :  { %v3748_v41 = vpack.c.bf16 %v276_v37, %v275_v38  ;;  %v273_v43 = vadd.f32 %v264_v39, %v249_v40 }
 0x284   :  { %3749 = vmatprep.subr.bf16.mxu1 %v3748_v41  ;;  %v277_v46 = vmax.f32 %v273_v43, 0.0 }
 0x285   :  { %v269_v44 = vpop.permute.xlu1 %268  ;;  %3751 = vmatpush3.bf16.msra.mxu1 %v3748_v41 }
 0x286   :  { %v274_v45 = vadd.f32 %v269_v44, %v250_v42  ;;  %v285_v54 = vpop.permute.xlu0 %284 }
 0x288   :  { %v278_v47 = vmax.f32 %v274_v45, 0.0 }
 0x28a   :  { %v3752_v48 = vpack.c.bf16 %v278_v47, %v277_v46  ;;  %v289_v52 = vpop.permute.xlu1 %288  ;;  %v297_v63 = vpop.permute.xlu0 %296 }
 0x28c   :  { %3753 = vmatprep.subr.bf16.mxu1 %v3752_v48 }
 0x28d   :  { %3755 = vmatpush3.bf16.msra.mxu1 %v3752_v48 }
 0x28e   :  { %v293_v62 = vpop.permute.xlu1 %292 }
 0x290   :  { %3566 = vmatmul.mubr.msk.f32.vlgmr.msra.gmra.mrb[4].mxu1 %vm299_vm2, %v280_v49 }
 0x291   :  { %3568 = vmatprep.mubr.msk.f32.mxu1 %vm299_vm2, %v281_v50 }
 0x294   :  { %3569 = vmatmul.mubr.msk.f32.gmra.mrb[6].mxu1 %vm299_vm2, %v282_v51 }
 0x363   :  { %v3567_v53 = vpop.f32.mrb[4].mxu1 }
 0x364   :  { %v4267_v55 = vadd.f32 %v3567_v53, %v289_v52  ;;  %v378_v56 = vpop.f32.mrb[5].mxu1 }
 0x365   :  { %v4269_v57 = vadd.f32 %v378_v56, %v285_v54  ;;  %v4101_v54 = vmov 5  }
 0x366   :  { %399 = vadd.xlane.f32.xlu0 %v4267_v55  ;;  %v410_v61 = vmul.f32 %v4267_v55, %v4267_v55 }
 0x367   :  { %v3570_v58 = vpop.f32.mrb[6].mxu1  ;;  %397 = vadd.xlane.f32.xlu1 %v4269_v57  ;;  %v409_v59 = vmul.f32 %v4269_v57, %v4269_v57 }
 0x368   :  { %v388_v60 = vpop.f32.mrb[7].mxu1  ;;  %v4279_v2 = vadd.f32 %v3570_v58, %v297_v63 }
 0x369   :  { %v4277_v1 = vadd.f32 %v388_v60, %v293_v62 }
 0x36a   :  { %413 = vadd.xlane.f32.xlu0 %v409_v59  ;;  %v412_v4 = vmul.f32 %v4279_v2, %v4279_v2 }
 0x36b   :  { %415 = vadd.xlane.f32.xlu1 %v410_v61  ;;  %v411_v3 = vmul.f32 %v4277_v1, %v4277_v1 }
 0x36e   :  { %401 = vadd.xlane.f32.xlu0 %v4277_v1 }
 0x36f   :  { %403 = vadd.xlane.f32.xlu1 %v4279_v2 }
 0x372   :  { %417 = vadd.xlane.f32.xlu0 %v411_v3 }
 0x373   :  { %419 = vadd.xlane.f32.xlu1 %v412_v4  ;;  %v4102_v4 = vmov 6  }
 0x3f3   :  { %v400_v10 = vpop.xlane.xlu0 %399 }
 0x3f4   :  { %v398_v11 = vpop.xlane.xlu1 %397  ;;  %v406_v12 = vmul.f32 0.0078125, %v400_v10 }
 0x3f5   :  { %v405_v13 = vmul.f32 0.0078125, %v398_v11 }
 0x3f6   :  { %v426_v20 = vmul.f32 %v406_v12, %v406_v12 }
 0x3f7   :  { %v425_v14 = vmul.f32 %v405_v13, %v405_v13  ;;  %v414_v15 = vpop.xlane.xlu0 %413 }
 0x3f8   :  { %v421_v17 = vmul.f32 0.0078125, %v414_v15  ;;  %v416_v19 = vpop.xlane.xlu1 %415 }
 0x3f9   :  { %v422_v21 = vmul.f32 0.0078125, %v416_v19 }
 0x3fa   :  { %v429_v23 = vsub.f32 %v421_v17, %v425_v14 }
 0x3fb   :  { %v430_v24 = vsub.f32 %v422_v21, %v426_v20  ;;  %v402_v25 = vpop.xlane.xlu0 %401 }
 0x3fc   :  { %v433_v26 = vadd.f32 1e-05, %v429_v23  ;;  %v407_v27 = vmul.f32 0.0078125, %v402_v25  ;;  %v404_v29 = vpop.xlane.xlu1 %403 }
 0x3fd   :  { %v434_v30 = vadd.f32 1e-05, %v430_v24  ;;  %v408_v31 = vmul.f32 0.0078125, %v404_v29 }
 0x3fe   :  { %4005 = vrsqrt.f32 %v433_v26  ;;  %v427_v33 = vmul.f32 %v407_v27, %v407_v27 }
 0x3ff   :  { %4007 = vrsqrt.f32 %v434_v30  ;;  %v418_v32 = vpop.xlane.xlu0 %417  ;;  %v428_v36 = vmul.f32 %v408_v31, %v408_v31 }
 0x400   :  { %v423_v34 = vmul.f32 0.0078125, %v418_v32  ;;  %v420_v35 = vpop.xlane.xlu1 %419 }
 0x401   :  { %v424_v37 = vmul.f32 0.0078125, %v420_v35  ;;  %v639_v35 = vld [vmem:[%s5103_s1 + $0x20] sm:$0xff] }
 0x402   :  { %v431_v38 = vsub.f32 %v423_v34, %v427_v33 }
 0x403   :  { %v432_v39 = vsub.f32 %v424_v37, %v428_v36  ;;  %v640_v36 = vld [vmem:[%s5103_s1 + $0x28] sm:$0xff]  ;;  %v642_v37 = vld [vmem:[%s5103_s1 + $0x38] sm:$0xff] }
 0x404   :  { %v435_v40 = vadd.f32 1e-05, %v431_v38 }
 0x405   :  { %v436_v41 = vadd.f32 1e-05, %v432_v39 }
 0x406   :  { %4009 = vrsqrt.f32 %v435_v40 }
 0x407   :  { %4011 = vrsqrt.f32 %v436_v41 }
 0x408   :  { %v4006_v42 = vpop.eup %4005 }
 0x409   :  { %v4008_v43 = vpop.eup %4007  ;;  %v441_v44 = vmul.f32 %v4006_v42, %v4182_v5 }
 0x40a   :  { %v442_v45 = vmul.f32 %v4008_v43, %v4196_v7 }
 0x40b   :  { %v445_v46 = vmul.f32 %v441_v44, %v405_v13 }
 0x40c   :  { %v446_v47 = vmul.f32 %v442_v45, %v406_v12 }
 0x40d   :  { %453 = vrot.lane.b32.xlu0 %v445_v46, %s4097_s11 }
 0x40e   :  { %455 = vrot.lane.b32.xlu1 %v446_v47, %s4097_s11 }
 0x410   :  { %v4010_v48 = vpop.eup %4009 }
 0x411   :  { %v4012_v49 = vpop.eup %4011  ;;  %v443_v50 = vmul.f32 %v4010_v48, %v4190_v6 }
 0x412   :  { %v444_v51 = vmul.f32 %v4012_v49, %v4206_v9 }
 0x413   :  { %v447_v52 = vmul.f32 %v443_v50, %v407_v27 }
 0x414   :  { %v448_v53 = vmul.f32 %v444_v51, %v408_v31 }
 0x415   :  { %457 = vrot.lane.b32.xlu1 %v447_v52, %s4097_s11 }
 0x416   :  { %459 = vrot.lane.b32.xlu0 %v448_v53, %s4097_s11 }
 0x419   :  { %471 = vperm.xlu1 %3939, %v441_v44  }
 0x41a   :  { %476 = vperm.xlu0 %3940, %v442_v45  }
 0x41d   :  { %486 = vperm.xlu1 %3939, %v444_v51  }
 0x41e   :  { %481 = vperm.xlu0 %3940, %v443_v50  }
 0x421   :  { %3941 = vset.pattern.permute.xlu1 %v4101_v54 }
 0x422   :  { %3942 = vset.pattern.permute.xlu0 %v4101_v54 }
 0x47f   :  { %v454_v59 = vpop.permute.xlu0 %453 }
 0x480   :  { %v456_v56 = vpop.permute.xlu1 %455  ;;  %v465_v60 = vsub.f32 %v4182_v5, %v454_v59 }
 0x481   :  { %v466_v58 = vsub.f32 %v4196_v7, %v456_v56 }
 0x483   :  { %500 = vperm.xlu1 %3941, %v466_v58  }
 0x487   :  { %v458_v61 = vpop.permute.xlu1 %457  ;;  %495 = vperm.xlu1 %3941, %v465_v60   ;;  %v4103_v60 = vmov 7  }
 0x488   :  { %v467_v62 = vsub.f32 %v4190_v6, %v458_v61  ;;  %v460_v63 = vpop.permute.xlu0 %459 }
 0x489   :  { %v468_v3 = vsub.f32 %v4206_v9, %v460_v63 }
 0x48a   :  { %505 = vperm.xlu0 %3942, %v467_v62  }
 0x48b   :  { %510 = vperm.xlu1 %3941, %v468_v3  }
 0x48e   :  { %3944 = vset.pattern.permute.xlu0 %v4102_v4 }
 0x48f   :  { %531 = vperm.xlu0 %3944, %v4196_v7   ;;  %3943 = vset.pattern.permute.xlu1 %v4102_v4 }
 0x490   :  { %527 = vperm.xlu1 %3943, %v4182_v5  }
 0x493   :  { %3945 = vset.pattern.permute.xlu0 %v4103_v60 }
 0x494   :  { %535 = vperm.xlu1 %3943, %v4190_v6  }
 0x498   :  { %539 = vperm.xlu1 %3943, %v4206_v9   ;;  %v472_v10 = vpop.permute.xlu1 %471 }
 0x499   :  { %v477_v12 = vpop.permute.xlu0 %476  ;;  %v489_v15 = vmul.f32 %v472_v10, %v4269_v57  ;;  %v3337_v57 = vld [vmem:[%s5105_s2 + $0xa8] sm:$0xff] }
 0x49a   :  { %v490_v14 = vmul.f32 %v477_v12, %v4267_v55 }
 0x49c   :  { %v487_v11 = vpop.permute.xlu1 %486  ;;  %3946 = vset.pattern.permute.xlu1 %v4103_v60 }
 0x49d   :  { %v482_v17 = vpop.permute.xlu0 %481  ;;  %v492_v24 = vmul.f32 %v487_v11, %v4279_v2  ;;  %v3339_v2 = vld [vmem:[%s5105_s2 + $0xb8] sm:$0xff] }
 0x49e   :  { %v491_v23 = vmul.f32 %v482_v17, %v4277_v1  ;;  %v3338_v1 = vld [vmem:[%s5105_s2 + $0xb0] sm:$0xff] }
 0x502   :  { %v501_v13 = vpop.permute.xlu1 %500 }
 0x503   :  { %v514_v19 = vadd.f32 %v501_v13, %v490_v14 }
 0x505   :  { %v518_v25 = vmax.f32 %v514_v19, 0.0 }
 0x506   :  { %v496_v20 = vpop.permute.xlu1 %495 }
 0x507   :  { %v513_v21 = vadd.f32 %v496_v20, %v489_v15 }
 0x509   :  { %v517_v26 = vmax.f32 %v513_v21, 0.0  ;;  %v506_v27 = vpop.permute.xlu0 %505 }
 0x50a   :  { %v515_v29 = vadd.f32 %v506_v27, %v491_v23  ;;  %v511_v30 = vpop.permute.xlu1 %510 }
 0x50b   :  { %v516_v31 = vadd.f32 %v511_v30, %v492_v24  ;;  %v3756_v32 = vpack.c.bf16 %v518_v25, %v517_v26 }
 0x50c   :  { %v519_v33 = vmax.f32 %v515_v29, 0.0 }
 0x50d   :  { %v520_v34 = vmax.f32 %v516_v31, 0.0  ;;  %3757 = vmatprep.subr.bf16.mxu0 %v3756_v32 }
 0x50e   :  { %3759 = vmatpush3.bf16.msra.mxu0 %v3756_v32  ;;  %v4345_v39 = vpop.permute.xlu0 %531 }
 0x50f   :  { %v3760_v55 = vpack.c.bf16 %v520_v34, %v519_v33  ;;  %v4343_v38 = vpop.permute.xlu1 %527  ;;  %v3834_v40 = vadd.f32 %v4345_v39, %v4211_v16 }
 0x510   :  { %v3836_v41 = vadd.f32 %v4343_v38, %v4213_v18 }
 0x511   :  { %3761 = vmatprep.subr.bf16.mxu0 %v3760_v55 }
 0x512   :  { %3763 = vmatpush3.bf16.msra.mxu0 %v3760_v55 }
 0x513   :  { %3585 = vmatprep.subr.msk.mxu0 %vm62_vm0, %v4165_v0  ;;  %v4353_v43 = vpop.permute.xlu1 %535 }
 0x514   :  { %v3840_v47 = vadd.f32 %v4353_v43, %v4217_v22 }
 0x515   :  { %3580 = vmatmul.mubr.msk.f32.vlgmr.msra.gmra.mrb[0].mxu0 %vm299_vm2, %v3337_v57 }
 0x516   :  { %3586 = vmatpush3.msk.msra.mxu0 %vm62_vm0, %v4165_v0  ;;  %3582 = vmatprep.mubr.msk.f32.mxu0 %vm299_vm2, %v3338_v1  ;;  %v641_v0 = vld [vmem:[%s5103_s1 + $0x30] sm:$0xff] }
 0x517   :  { %v4377_v52 = vpop.permute.xlu1 %539 }
 0x518   :  { %v3838_v56 = vadd.f32 %v4377_v52, %v4226_v28 }
 0x519   :  { %3583 = vmatmul.mubr.msk.f32.gmra.mrb[2].mxu0 %vm299_vm2, %v3339_v2 }
 0x51a   :  { %3587 = vmatprep.mubr.msk.f32.mxu0 %vm49_vm1, %v639_v35 }
 0x51d   :  { %3588 = vmatmul.mubr.msk.f32.vlgmr.msra.gmra.mrb[0].mxu0 %vm49_vm1, %v640_v36 }
 0x51e   :  { %3590 = vmatprep.mubr.msk.f32.mxu0 %vm49_vm1, %v641_v0 }
 0x521   :  { %3591 = vmatmul.mubr.msk.f32.gmra.mrb[2].mxu0 %vm49_vm1, %v642_v37 }
 0x5f0   :  { %v4351_v42 = vpop.f32.mrb[0].mxu0 }
 0x5f1   :  { %v4356_v44 = vadd.f32 %v3834_v40, %v4351_v42  ;;  %v4358_v45 = vpop.f32.mrb[1].mxu0 }
 0x5f2   :  { %v4361_v46 = vadd.f32 %v3836_v41, %v4358_v45 }
 0x5f3   :  { %750 = vadd.xlane.f32.xlu1 %v4356_v44  ;;  %v761_v51 = vmul.f32 %v4356_v44, %v4356_v44 }
 0x5f4   :  { %748 = vadd.xlane.f32.xlu0 %v4361_v46  ;;  %v4367_v48 = vpop.f32.mrb[2].mxu0  ;;  %v760_v54 = vmul.f32 %v4361_v46, %v4361_v46 }
 0x5f5   :  { %v4369_v49 = vpop.f32.mrb[3].mxu0  ;;  %v4386_v58 = vadd.f32 %v3838_v56, %v4367_v48 }
 0x5f6   :  { %v4372_v50 = vadd.f32 %v3840_v47, %v4369_v49 }
 0x5f7   :  { %v763_v59 = vmul.f32 %v4386_v58, %v4386_v58 }
 0x5f8   :  { %752 = vadd.xlane.f32.xlu1 %v4372_v50  ;;  %766 = vadd.xlane.f32.xlu0 %v761_v51  ;;  %v762_v53 = vmul.f32 %v4372_v50, %v4372_v50 }
 0x5fc   :  { %768 = vadd.xlane.f32.xlu1 %v762_v53  ;;  %764 = vadd.xlane.f32.xlu0 %v760_v54  ;;  %v4104_v53 = vmov 8  }
 0x600   :  { %754 = vadd.xlane.f32.xlu0 %v4386_v58 }
 0x604   :  { %770 = vadd.xlane.f32.xlu0 %v763_v59 }
 0x680   :  { %v751_v61 = vpop.xlane.xlu1 %750 }
 0x681   :  { %v749_v62 = vpop.xlane.xlu0 %748  ;;  %v757_v63 = vmul.f32 0.0078125, %v751_v61 }
 0x682   :  { %v756_v3 = vmul.f32 0.0078125, %v749_v62 }
 0x683   :  { %v777_v10 = vmul.f32 %v757_v63, %v757_v63 }
 0x684   :  { %v776_v14 = vmul.f32 %v756_v3, %v756_v3 }
 0x685   :  { %v753_v4 = vpop.xlane.xlu1 %752  ;;  %v767_v8 = vpop.xlane.xlu0 %766 }
 0x686   :  { %v758_v11 = vmul.f32 0.0078125, %v753_v4  ;;  %v773_v12 = vmul.f32 0.0078125, %v767_v8  ;;  %v3349_v8 = vld [vmem:[%s5105_s2 + $0x20] sm:$0xff] }
 0x687   :  { %3601 = vmatprep.mubr.msk.f32.mxu1 %vm299_vm2, %v3349_v8 }
 0x688   :  { %v781_v13 = vsub.f32 %v773_v12, %v777_v10  ;;  %v778_v19 = vmul.f32 %v758_v11, %v758_v11  ;;  %v4105_v10 = vmov 9  }
 0x689   :  { %v769_v15 = vpop.xlane.xlu1 %768  ;;  %v765_v17 = vpop.xlane.xlu0 %764 }
 0x68a   :  { %v785_v20 = vadd.f32 1e-05, %v781_v13  ;;  %v774_v21 = vmul.f32 0.0078125, %v769_v15  ;;  %v772_v23 = vmul.f32 0.0078125, %v765_v17 }
 0x68c   :  { %4013 = vrsqrt.f32 %v785_v20  ;;  %v782_v24 = vsub.f32 %v774_v21, %v778_v19  ;;  %v780_v25 = vsub.f32 %v772_v23, %v776_v14 }
 0x68d   :  { %v755_v26 = vpop.xlane.xlu0 %754 }
 0x68e   :  { %v786_v27 = vadd.f32 1e-05, %v782_v24  ;;  %v784_v29 = vadd.f32 1e-05, %v780_v25  ;;  %v759_v30 = vmul.f32 0.0078125, %v755_v26 }
 0x690   :  { %4015 = vrsqrt.f32 %v786_v27  ;;  %v779_v32 = vmul.f32 %v759_v30, %v759_v30 }
 0x691   :  { %4017 = vrsqrt.f32 %v784_v29  ;;  %v771_v31 = vpop.xlane.xlu0 %770 }
 0x692   :  { %v775_v33 = vmul.f32 0.0078125, %v771_v31 }
 0x694   :  { %v783_v34 = vsub.f32 %v775_v33, %v779_v32 }
 0x696   :  { %v4014_v55 = vpop.eup %4013  ;;  %v787_v57 = vadd.f32 1e-05, %v783_v34 }
 0x697   :  { %v793_v1 = vmul.f32 %v4014_v55, %v4196_v7 }
 0x698   :  { %4019 = vrsqrt.f32 %v787_v57 }
 0x699   :  { %v797_v2 = vmul.f32 %v793_v1, %v757_v63 }
 0x69a   :  { %v4016_v35 = vpop.eup %4015 }
 0x69b   :  { %v4018_v36 = vpop.eup %4017  ;;  %806 = vrot.lane.b32.xlu0 %v797_v2, %s4097_s11  ;;  %v794_v40 = vmul.f32 %v4016_v35, %v4190_v6  ;;  %v3351_v2 = vld [vmem:[%s5105_s2 + $0x30] sm:$0xff]  ;;  %v3352_v35 = vld [vmem:[%s5105_s2 + $0x38] sm:$0xff] }
 0x69c   :  { %v792_v0 = vmul.f32 %v4018_v36, %v4182_v5 }
 0x69d   :  { %v798_v47 = vmul.f32 %v794_v40, %v758_v11 }
 0x69e   :  { %v796_v37 = vmul.f32 %v792_v0, %v756_v3 }
 0x69f   :  { %822 = vperm.xlu0 %3945, %v792_v0  }
 0x6a0   :  { %804 = vrot.lane.b32.xlu1 %v796_v37, %s4097_s11 }
 0x6a2   :  { %v4020_v41 = vpop.eup %4019 }
 0x6a3   :  { %v795_v51 = vmul.f32 %v4020_v41, %v4206_v9  ;;  %3947 = vset.pattern.permute.xlu0 %v4104_v53 }
 0x6a4   :  { %808 = vrot.lane.b32.xlu1 %v798_v47, %s4097_s11 }
 0x6a5   :  { %v799_v54 = vmul.f32 %v795_v51, %v759_v30 }
 0x6a8   :  { %810 = vrot.lane.b32.xlu1 %v799_v54, %s4097_s11 }
 0x6ac   :  { %827 = vperm.xlu1 %3946, %v793_v1   ;;  %v3350_v1 = vld [vmem:[%s5105_s2 + $0x28] sm:$0xff] }
 0x6b0   :  { %832 = vperm.xlu1 %3946, %v794_v40  }
 0x6b4   :  { %837 = vperm.xlu1 %3946, %v795_v51  }
 0x6b8   :  { %3948 = vset.pattern.permute.xlu1 %v4104_v53 }
 0x70d   :  { %v807_v56 = vpop.permute.xlu0 %806 }
 0x70e   :  { %v817_v59 = vsub.f32 %v4196_v7, %v807_v56 }
 0x710   :  { %851 = vperm.xlu0 %3947, %v817_v59  }
 0x712   :  { %v805_v60 = vpop.permute.xlu1 %804 }
 0x713   :  { %v816_v61 = vsub.f32 %v4182_v5, %v805_v60 }
 0x715   :  { %846 = vperm.xlu1 %3948, %v816_v61  }
 0x716   :  { %v809_v62 = vpop.permute.xlu1 %808 }
 0x717   :  { %v818_v63 = vsub.f32 %v4190_v6, %v809_v62 }
 0x719   :  { %856 = vperm.xlu0 %3947, %v818_v63  }
 0x71a   :  { %v811_v3 = vpop.permute.xlu1 %810 }
 0x71b   :  { %v819_v4 = vsub.f32 %v4206_v9, %v811_v3 }
 0x71d   :  { %861 = vperm.xlu1 %3948, %v819_v4   ;;  %3949 = vset.pattern.permute.xlu0 %v4105_v10  ;;  %v4106_v4 = vmov 10  }
 0x71e   :  { %878 = vperm.xlu0 %3949, %v4182_v5   ;;  %v823_v13 = vpop.permute.xlu0 %822 }
 0x71f   :  { %v840_v19 = vmul.f32 %v4361_v46, %v823_v13 }
 0x721   :  { %3950 = vset.pattern.permute.xlu1 %v4105_v10 }
 0x722   :  { %882 = vperm.xlu1 %3950, %v4196_v7   ;;  %890 = vperm.xlu0 %3949, %v4206_v9  }
 0x726   :  { %886 = vperm.xlu1 %3950, %v4190_v6   ;;  %3952 = vset.pattern.permute.xlu0 %v4106_v4 }
 0x72a   :  { %3951 = vset.pattern.permute.xlu1 %v4106_v4 }
 0x72b   :  { %v828_v11 = vpop.permute.xlu1 %827 }
 0x72c   :  { %v841_v17 = vmul.f32 %v4356_v44, %v828_v11 }
 0x72f   :  { %v833_v12 = vpop.permute.xlu1 %832 }
 0x730   :  { %v842_v27 = vmul.f32 %v4372_v50, %v833_v12 }
 0x733   :  { %v838_v14 = vpop.permute.xlu1 %837 }
 0x734   :  { %v843_v30 = vmul.f32 %v4386_v58, %v838_v14 }
 0x78f   :  { %v852_v15 = vpop.permute.xlu0 %851 }
 0x790   :  { %v865_v20 = vadd.f32 %v852_v15, %v841_v17 }
 0x792   :  { %v869_v24 = vmax.f32 %v865_v20, 0.0 }
 0x794   :  { %v847_v21 = vpop.permute.xlu1 %846 }
 0x795   :  { %v864_v23 = vadd.f32 %v847_v21, %v840_v19 }
 0x797   :  { %v868_v25 = vmax.f32 %v864_v23, 0.0 }
 0x798   :  { %v857_v26 = vpop.permute.xlu0 %856 }
 0x799   :  { %v3764_v29 = vpack.c.bf16 %v869_v24, %v868_v25  ;;  %v866_v31 = vadd.f32 %v857_v26, %v842_v27 }
 0x79b   :  { %3765 = vmatprep.subr.bf16.mxu1 %v3764_v29  ;;  %v870_v34 = vmax.f32 %v866_v31, 0.0 }
 0x79c   :  { %v862_v32 = vpop.permute.xlu1 %861  ;;  %3767 = vmatpush3.bf16.msra.mxu1 %v3764_v29 }
 0x79d   :  { %v867_v33 = vadd.f32 %v862_v32, %v843_v30  ;;  %v879_v37 = vpop.permute.xlu0 %878 }
 0x79f   :  { %v871_v55 = vmax.f32 %v867_v33, 0.0 }
 0x7a1   :  { %v3768_v57 = vpack.c.bf16 %v871_v55, %v870_v34  ;;  %v883_v36 = vpop.permute.xlu1 %882  ;;  %v891_v60 = vpop.permute.xlu0 %890 }
 0x7a3   :  { %3769 = vmatprep.subr.bf16.mxu1 %v3768_v57 }
 0x7a4   :  { %3771 = vmatpush3.bf16.msra.mxu1 %v3768_v57 }
 0x7a5   :  { %v887_v59 = vpop.permute.xlu1 %886 }
 0x7a7   :  { %3602 = vmatmul.mubr.msk.f32.vlgmr.msra.gmra.mrb[8].mxu1 %vm299_vm2, %v3350_v1 }
 0x7a8   :  { %3604 = vmatprep.mubr.msk.f32.mxu1 %vm299_vm2, %v3351_v2 }
 0x7ab   :  { %3605 = vmatmul.mubr.msk.f32.gmra.mrb[10].mxu1 %vm299_vm2, %v3352_v35 }
 0x87a   :  { %v3603_v0 = vpop.f32.mrb[8].mxu1 }
 0x87b   :  { %v4427_v40 = vadd.f32 %v3603_v0, %v883_v36  ;;  %v971_v41 = vpop.f32.mrb[9].mxu1 }
 0x87c   :  { %v4429_v47 = vadd.f32 %v971_v41, %v879_v37 }
 0x87d   :  { %992 = vadd.xlane.f32.xlu0 %v4427_v40  ;;  %v1003_v56 = vmul.f32 %v4427_v40, %v4427_v40 }
 0x87e   :  { %v3606_v51 = vpop.f32.mrb[10].mxu1  ;;  %990 = vadd.xlane.f32.xlu1 %v4429_v47  ;;  %v1002_v53 = vmul.f32 %v4429_v47, %v4429_v47 }
 0x87f   :  { %v981_v54 = vpop.f32.mrb[11].mxu1  ;;  %v4439_v62 = vadd.f32 %v3606_v51, %v891_v60 }
 0x880   :  { %v4437_v61 = vadd.f32 %v981_v54, %v887_v59 }
 0x881   :  { %1006 = vadd.xlane.f32.xlu0 %v1002_v53  ;;  %v1005_v3 = vmul.f32 %v4439_v62, %v4439_v62 }
 0x882   :  { %1008 = vadd.xlane.f32.xlu1 %v1003_v56  ;;  %v1004_v63 = vmul.f32 %v4437_v61, %v4437_v61 }
 0x885   :  { %994 = vadd.xlane.f32.xlu0 %v4437_v61 }
 0x886   :  { %996 = vadd.xlane.f32.xlu1 %v4439_v62 }
 0x889   :  { %1010 = vadd.xlane.f32.xlu0 %v1004_v63 }
 0x88a   :  { %1012 = vadd.xlane.f32.xlu1 %v1005_v3 }
 0x90a   :  { %v993_v8 = vpop.xlane.xlu0 %992 }
 0x90b   :  { %v991_v10 = vpop.xlane.xlu1 %990  ;;  %v999_v11 = vmul.f32 0.0078125, %v993_v8 }
 0x90c   :  { %v998_v12 = vmul.f32 0.0078125, %v991_v10  ;;  %v4464_v10 = vld [vmem:[%s5104_s3] sm:$0xff] }
 0x90d   :  { %v1019_v19 = vmul.f32 %v999_v11, %v999_v11 }
 0x90e   :  { %v1018_v13 = vmul.f32 %v998_v12, %v998_v12  ;;  %v1007_v14 = vpop.xlane.xlu0 %1006 }
 0x90f   :  { %v1014_v15 = vmul.f32 0.0078125, %v1007_v14  ;;  %v1009_v17 = vpop.xlane.xlu1 %1008 }
 0x910   :  { %v1015_v20 = vmul.f32 0.0078125, %v1009_v17  ;;  %v4476_v17 = vld [vmem:[%s5104_s3 + $0x18] sm:$0xff] }
 0x911   :  { %v1022_v21 = vsub.f32 %v1014_v15, %v1018_v13  ;;  %v4470_v13 = vld [vmem:[%s5104_s3 + $0x10] sm:$0xff] }
 0x912   :  { %v1023_v23 = vsub.f32 %v1015_v20, %v1019_v19  ;;  %v995_v24 = vpop.xlane.xlu0 %994  ;;  %v4108_v20 = vmov 12  }
 0x913   :  { %v1026_v25 = vadd.f32 1e-05, %v1022_v21  ;;  %v1000_v26 = vmul.f32 0.0078125, %v995_v24  ;;  %v997_v27 = vpop.xlane.xlu1 %996  ;;  %v3357_v21 = vld [vmem:[%s5105_s2 + $0xc0] sm:$0xff] }
 0x914   :  { %v1027_v29 = vadd.f32 1e-05, %v1023_v23  ;;  %v1001_v30 = vmul.f32 0.0078125, %v997_v27  ;;  %3615 = vmatprep.mubr.msk.f32.mxu1 %vm299_vm2, %v3357_v21 }
 0x915   :  { %4021 = vrsqrt.f32 %v1026_v25  ;;  %v1020_v32 = vmul.f32 %v1000_v26, %v1000_v26 }
 0x916   :  { %4023 = vrsqrt.f32 %v1027_v29  ;;  %v1011_v31 = vpop.xlane.xlu0 %1010  ;;  %v1021_v55 = vmul.f32 %v1001_v30, %v1001_v30 }
 0x917   :  { %v1016_v33 = vmul.f32 0.0078125, %v1011_v31  ;;  %v1013_v34 = vpop.xlane.xlu1 %1012 }
 0x918   :  { %v1017_v57 = vmul.f32 0.0078125, %v1013_v34 }
 0x919   :  { %v1024_v1 = vsub.f32 %v1016_v33, %v1020_v32 }
 0x91a   :  { %v1025_v2 = vsub.f32 %v1017_v57, %v1021_v55 }
 0x91b   :  { %v1028_v35 = vadd.f32 1e-05, %v1024_v1 }
 0x91c   :  { %v1029_v36 = vadd.f32 1e-05, %v1025_v2 }
 0x91d   :  { %4025 = vrsqrt.f32 %v1028_v35 }
 0x91e   :  { %4027 = vrsqrt.f32 %v1029_v36 }
 0x91f   :  { %v4022_v0 = vpop.eup %4021 }
 0x920   :  { %v4024_v37 = vpop.eup %4023  ;;  %v1034_v41 = vmul.f32 %v4022_v0, %v4182_v5  ;;  %v4107_v5 = vmov 11  }
 0x921   :  { %v1035_v51 = vmul.f32 %v4024_v37, %v4196_v7 }
 0x922   :  { %v1038_v53 = vmul.f32 %v1034_v41, %v998_v12 }
 0x923   :  { %v1039_v54 = vmul.f32 %v1035_v51, %v999_v11 }
 0x924   :  { %1046 = vrot.lane.b32.xlu0 %v1038_v53, %s4097_s11  ;;  %v3360_v53 = vld [vmem:[%s5105_s2 + $0xd8] sm:$0xff] }
 0x925   :  { %1048 = vrot.lane.b32.xlu1 %v1039_v54, %s4097_s11  ;;  %v1232_v54 = vld [vmem:[%s5103_s1 + $0x40] sm:$0xff] }
 0x927   :  { %v4026_v56 = vpop.eup %4025 }
 0x928   :  { %v4028_v59 = vpop.eup %4027  ;;  %v1036_v60 = vmul.f32 %v4026_v56, %v4190_v6  ;;  %v4458_v6 = vld [vmem:[%s5104_s3 + $0x8] sm:$0xff] }
 0x929   :  { %v1037_v63 = vmul.f32 %v4028_v59, %v4206_v9  ;;  %v1233_v56 = vld [vmem:[%s5103_s1 + $0x48] sm:$0xff]  ;;  %v1234_v59 = vld [vmem:[%s5103_s1 + $0x50] sm:$0xff] }
 0x92a   :  { %v1040_v3 = vmul.f32 %v1036_v60, %v1000_v26 }
 0x92b   :  { %v1041_v4 = vmul.f32 %v1037_v63, %v1001_v30 }
 0x92c   :  { %1050 = vrot.lane.b32.xlu1 %v1040_v3, %s4097_s11  ;;  %v626_v3 = vadd.f32 nan, %v4345_v39 }
 0x92d   :  { %1052 = vrot.lane.b32.xlu0 %v1041_v4, %s4097_s11  ;;  %v621_v4 = vadd.f32 nan, %v4343_v38 }
 0x930   :  { %1064 = vperm.xlu1 %3951, %v1034_v41  }
 0x931   :  { %1069 = vperm.xlu0 %3952, %v1035_v51  }
 0x934   :  { %1079 = vperm.xlu1 %3951, %v1037_v63  }
 0x935   :  { %1074 = vperm.xlu0 %3952, %v1036_v60   ;;  %v1235_v60 = vld [vmem:[%s5103_s1 + $0x58] sm:$0xff] }
 0x938   :  { %3953 = vset.pattern.permute.xlu1 %v4107_v5 }
 0x939   :  { %3954 = vset.pattern.permute.xlu0 %v4107_v5 }
 0x996   :  { %v1047_v8 = vpop.permute.xlu0 %1046 }
 0x997   :  { %v1049_v7 = vpop.permute.xlu1 %1048  ;;  %v1058_v11 = vsub.f32 %v4464_v10, %v1047_v8  ;;  %v631_v8 = vadd.f32 nan, %v4353_v43 }
 0x998   :  { %v1059_v9 = vsub.f32 %v4458_v6, %v1049_v7  ;;  %v636_v7 = vadd.f32 nan, %v4377_v52 }
 0x99a   :  { %1093 = vperm.xlu1 %3953, %v1059_v9   ;;  %v741_v9 = vadd.f32 %v626_v3, %v4211_v16  ;;  %v743_v39 = vadd.f32 %v636_v7, %v4226_v28 }
 0x99e   :  { %v1051_v12 = vpop.permute.xlu1 %1050  ;;  %1088 = vperm.xlu1 %3953, %v1058_v11   ;;  %v740_v11 = vadd.f32 %v621_v4, %v4213_v18  ;;  %v747_v18 = vadd.f32 %v4367_v48, %v743_v39 }
 0x99f   :  { %v1060_v14 = vsub.f32 %v4470_v13, %v1051_v12  ;;  %v1053_v15 = vpop.permute.xlu0 %1052 }
 0x9a0   :  { %v1061_v19 = vsub.f32 %v4476_v17, %v1053_v15  ;;  %v744_v15 = vadd.f32 %v740_v11, %v4358_v45 }
 0x9a1   :  { %1098 = vperm.xlu0 %3954, %v1060_v14   ;;  %v745_v14 = vadd.f32 %v4351_v42, %v741_v9 }
 0x9a2   :  { %1103 = vperm.xlu1 %3953, %v1061_v19   ;;  %v742_v19 = vadd.f32 %v631_v8, %v4217_v22 }
 0x9a4   :  { %v746_v45 = vadd.f32 %v742_v19, %v4369_v49 }
 0x9a5   :  { %3956 = vset.pattern.permute.xlu0 %v4108_v20 }
 0x9a6   :  { %1124 = vperm.xlu0 %3956, %v4458_v6   ;;  %3955 = vset.pattern.permute.xlu1 %v4108_v20 }
 0x9a7   :  { %1120 = vperm.xlu1 %3955, %v4464_v10  }
 0x9ab   :  { %1128 = vperm.xlu1 %3955, %v4470_v13  }
 0x9af   :  { %1132 = vperm.xlu1 %3955, %v4476_v17   ;;  %v1065_v23 = vpop.permute.xlu1 %1064 }
 0x9b0   :  { %v1070_v25 = vpop.permute.xlu0 %1069  ;;  %v1082_v29 = vmul.f32 %v1065_v23, %v4429_v47  ;;  %v3358_v47 = vld [vmem:[%s5105_s2 + $0xc8] sm:$0xff] }
 0x9b1   :  { %v1083_v27 = vmul.f32 %v1070_v25, %v4427_v40 }
 0x9b3   :  { %v1080_v24 = vpop.permute.xlu1 %1079 }
 0x9b4   :  { %v1075_v30 = vpop.permute.xlu0 %1074  ;;  %v1085_v55 = vmul.f32 %v1080_v24, %v4439_v62  ;;  %v3359_v62 = vld [vmem:[%s5105_s2 + $0xd0] sm:$0xff] }
 0x9b5   :  { %v1084_v34 = vmul.f32 %v1075_v30, %v4437_v61  ;;  %v4497_v61 = vld [vmem:[%s5102_s0] sm:$0xf]  ;;  %v4109_v30 = vmov 13  }
 0x9b6   :  { %3957 = vset.pattern.permute.xlu0 %v4109_v30  ;;  %3958 = vset.pattern.permute.xlu1 %v4109_v30 }
 0xa19   :  { %v1094_v26 = vpop.permute.xlu1 %1093 }
 0xa1a   :  { %v1107_v31 = vadd.f32 %v1094_v26, %v1083_v27 }
 0xa1c   :  { %v1111_v57 = vmax.f32 %v1107_v31, 0.0 }
 0xa1d   :  { %v1089_v32 = vpop.permute.xlu1 %1088 }
 0xa1e   :  { %v1106_v33 = vadd.f32 %v1089_v32, %v1082_v29 }
 0xa20   :  { %v1110_v1 = vmax.f32 %v1106_v33, 0.0  ;;  %v1099_v2 = vpop.permute.xlu0 %1098 }
 0xa21   :  { %v1108_v35 = vadd.f32 %v1099_v2, %v1084_v34  ;;  %v1104_v36 = vpop.permute.xlu1 %1103 }
 0xa22   :  { %v1109_v0 = vadd.f32 %v1104_v36, %v1085_v55  ;;  %v3772_v37 = vpack.c.bf16 %v1111_v57, %v1110_v1 }
 0xa23   :  { %v1112_v41 = vmax.f32 %v1108_v35, 0.0 }
 0xa24   :  { %v1113_v51 = vmax.f32 %v1109_v0, 0.0  ;;  %3773 = vmatprep.subr.bf16.mxu1 %v3772_v37 }
 0xa25   :  { %3775 = vmatpush3.bf16.msra.mxu1 %v3772_v37  ;;  %v4538_v12 = vpop.permute.xlu0 %1124 }
 0xa26   :  { %v3776_v40 = vpack.c.bf16 %v1113_v51, %v1112_v41  ;;  %v4528_v63 = vpop.permute.xlu1 %1120  ;;  %v3842_v38 = vadd.f32 %v4538_v12, %v745_v14 }
 0xa27   :  { %v3844_v52 = vadd.f32 %v4528_v63, %v744_v15 }
 0xa28   :  { %3777 = vmatprep.subr.bf16.mxu1 %v3776_v40 }
 0xa29   :  { %3779 = vmatpush3.bf16.msra.mxu1 %v3776_v40 }
 0xa2a   :  { %3621 = vmatprep.subr.msk.mxu1 %vm62_vm0, %v4497_v61  ;;  %v4532_v5 = vpop.permute.xlu1 %1128 }
 0xa2b   :  { %v3848_v21 = vadd.f32 %v4532_v5, %v746_v45 }
 0xa2c   :  { %3616 = vmatmul.mubr.msk.f32.vlgmr.msra.gmra.mrb[12].mxu1 %vm299_vm2, %v3358_v47 }
 0xa2d   :  { %3622 = vmatpush3.msk.msra.mxu1 %vm62_vm0, %v4497_v61  ;;  %3618 = vmatprep.mubr.msk.f32.mxu1 %vm299_vm2, %v3359_v62 }
 0xa2e   :  { %v4546_v20 = vpop.permute.xlu1 %1132 }
 0xa2f   :  { %v3846_v22 = vadd.f32 %v4546_v20, %v747_v18 }
 0xa30   :  { %3619 = vmatmul.mubr.msk.f32.gmra.mrb[14].mxu1 %vm299_vm2, %v3360_v53 }
 0xa31   :  { %3623 = vmatprep.mubr.msk.f32.mxu1 %vm49_vm1, %v1232_v54 }
 0xa34   :  { %3624 = vmatmul.mubr.msk.f32.vlgmr.msra.gmra.mrb[12].mxu1 %vm49_vm1, %v1233_v56 }
 0xa35   :  { %3626 = vmatprep.mubr.msk.f32.mxu1 %vm49_vm1, %v1234_v59 }
 0xa38   :  { %3627 = vmatmul.mubr.msk.f32.gmra.mrb[14].mxu1 %vm49_vm1, %v1235_v60 }
 0xb07   :  { %v4548_v16 = vpop.f32.mrb[12].mxu1 }
 0xb08   :  { %v4552_v43 = vadd.f32 %v3842_v38, %v4548_v16  ;;  %v4554_v42 = vpop.f32.mrb[13].mxu1 }
 0xb09   :  { %v4558_v28 = vadd.f32 %v3844_v52, %v4554_v42 }
 0xb0a   :  { %1343 = vadd.xlane.f32.xlu1 %v4552_v43  ;;  %v1354_v25 = vmul.f32 %v4552_v43, %v4552_v43 }
 0xb0b   :  { %1341 = vadd.xlane.f32.xlu0 %v4558_v28  ;;  %v4564_v23 = vpop.f32.mrb[14].mxu1  ;;  %v1353_v27 = vmul.f32 %v4558_v28, %v4558_v28 }
 0xb0c   :  { %v4567_v48 = vadd.f32 %v3846_v22, %v4564_v23  ;;  %v4569_v24 = vpop.f32.mrb[15].mxu1 }
 0xb0d   :  { %v4572_v49 = vadd.f32 %v3848_v21, %v4569_v24 }
 0xb0e   :  { %v1356_v29 = vmul.f32 %v4567_v48, %v4567_v48 }
 0xb0f   :  { %1345 = vadd.xlane.f32.xlu1 %v4572_v49  ;;  %1359 = vadd.xlane.f32.xlu0 %v1354_v25  ;;  %v1355_v26 = vmul.f32 %v4572_v49, %v4572_v49 }
 0xb13   :  { %1361 = vadd.xlane.f32.xlu1 %v1355_v26  ;;  %1357 = vadd.xlane.f32.xlu0 %v1353_v27  ;;  %v4110_v26 = vmov 14  }
 0xb17   :  { %1347 = vadd.xlane.f32.xlu0 %v4567_v48 }
 0xb1b   :  { %1363 = vadd.xlane.f32.xlu0 %v1356_v29 }
 0xb97   :  { %v1344_v31 = vpop.xlane.xlu1 %1343 }
 0xb98   :  { %v1342_v32 = vpop.xlane.xlu0 %1341  ;;  %v1350_v33 = vmul.f32 0.0078125, %v1344_v31 }
 0xb99   :  { %v1349_v34 = vmul.f32 0.0078125, %v1342_v32 }
 0xb9a   :  { %v1370_v1 = vmul.f32 %v1350_v33, %v1350_v33 }
 0xb9b   :  { %v1369_v0 = vmul.f32 %v1349_v34, %v1349_v34 }
 0xb9c   :  { %v1346_v55 = vpop.xlane.xlu1 %1345  ;;  %v1360_v57 = vpop.xlane.xlu0 %1359 }
 0xb9d   :  { %v1351_v2 = vmul.f32 0.0078125, %v1346_v55  ;;  %v1366_v35 = vmul.f32 0.0078125, %v1360_v57 }
 0xb9f   :  { %v1374_v36 = vsub.f32 %v1366_v35, %v1370_v1  ;;  %v1371_v51 = vmul.f32 %v1351_v2, %v1351_v2  ;;  %v3370_v1 = vld [vmem:[%s5105_s2 + $0x40] sm:$0xff] }
 0xba0   :  { %v1362_v37 = vpop.xlane.xlu1 %1361  ;;  %v1358_v41 = vpop.xlane.xlu0 %1357  ;;  %3637 = vmatprep.mubr.msk.f32.mxu0 %vm299_vm2, %v3370_v1  ;;  %v4112_v1 = vmov 16  }
 0xba1   :  { %v1378_v40 = vadd.f32 1e-05, %v1374_v36  ;;  %v1367_v47 = vmul.f32 0.0078125, %v1362_v37  ;;  %v1365_v62 = vmul.f32 0.0078125, %v1358_v41 }
 0xba3   :  { %4029 = vrsqrt.f32 %v1378_v40  ;;  %v1375_v53 = vsub.f32 %v1367_v47, %v1371_v51  ;;  %v1373_v54 = vsub.f32 %v1365_v62, %v1369_v0 }
 0xba4   :  { %v1348_v56 = vpop.xlane.xlu0 %1347 }
 0xba5   :  { %v1379_v59 = vadd.f32 1e-05, %v1375_v53  ;;  %v1377_v60 = vadd.f32 1e-05, %v1373_v54  ;;  %v1352_v3 = vmul.f32 0.0078125, %v1348_v56 }
 0xba7   :  { %4031 = vrsqrt.f32 %v1379_v59  ;;  %v1372_v7 = vmul.f32 %v1352_v3, %v1352_v3 }
 0xba8   :  { %4033 = vrsqrt.f32 %v1377_v60  ;;  %v1364_v4 = vpop.xlane.xlu0 %1363 }
 0xba9   :  { %v1368_v9 = vmul.f32 0.0078125, %v1364_v4 }
 0xbab   :  { %v1376_v8 = vsub.f32 %v1368_v9, %v1372_v7 }
 0xbad   :  { %v4030_v11 = vpop.eup %4029  ;;  %v1380_v14 = vadd.f32 1e-05, %v1376_v8 }
 0xbae   :  { %v1386_v15 = vmul.f32 %v4458_v6, %v4030_v11 }
 0xbaf   :  { %4035 = vrsqrt.f32 %v1380_v14 }
 0xbb0   :  { %v1390_v39 = vmul.f32 %v1386_v15, %v1350_v33 }
 0xbb1   :  { %v4032_v38 = vpop.eup %4031 }
 0xbb2   :  { %v4034_v19 = vpop.eup %4033  ;;  %1399 = vrot.lane.b32.xlu0 %v1390_v39, %s4097_s11  ;;  %v1387_v45 = vmul.f32 %v4470_v13, %v4032_v38  ;;  %v3371_v39 = vld [vmem:[%s5105_s2 + $0x48] sm:$0xff]  ;;  %v3372_v38 = vld [vmem:[%s5105_s2 + $0x50] sm:$0xff] }
 0xbb3   :  { %v1385_v52 = vmul.f32 %v4464_v10, %v4034_v19  ;;  %v3373_v19 = vld [vmem:[%s5105_s2 + $0x58] sm:$0xff] }
 0xbb4   :  { %v1391_v21 = vmul.f32 %v1387_v45, %v1351_v2  ;;  %v4111_v2 = vmov 15  }
 0xbb5   :  { %v1389_v18 = vmul.f32 %v1385_v52, %v1349_v34 }
 0xbb6   :  { %1415 = vperm.xlu0 %3957, %v1385_v52  }
 0xbb7   :  { %1397 = vrot.lane.b32.xlu1 %v1389_v18, %s4097_s11 }
 0xbb9   :  { %v4036_v22 = vpop.eup %4035 }
 0xbba   :  { %v1388_v25 = vmul.f32 %v4476_v17, %v4036_v22  ;;  %3959 = vset.pattern.permute.xlu0 %v4110_v26 }
 0xbbb   :  { %1401 = vrot.lane.b32.xlu1 %v1391_v21, %s4097_s11 }
 0xbbc   :  { %v1392_v27 = vmul.f32 %v1388_v25, %v1352_v3 }
 0xbbf   :  { %1403 = vrot.lane.b32.xlu1 %v1392_v27, %s4097_s11 }
 0xbc3   :  { %1420 = vperm.xlu1 %3958, %v1386_v15  }
 0xbc7   :  { %1425 = vperm.xlu1 %3958, %v1387_v45  }
 0xbcb   :  { %1430 = vperm.xlu1 %3958, %v1388_v25  }
 0xbcf   :  { %3960 = vset.pattern.permute.xlu1 %v4110_v26 }
 0xc24   :  { %v1400_v29 = vpop.permute.xlu0 %1399 }
 0xc25   :  { %v1410_v30 = vsub.f32 %v4458_v6, %v1400_v29 }
 0xc27   :  { %1444 = vperm.xlu0 %3959, %v1410_v30  }
 0xc29   :  { %v1398_v31 = vpop.permute.xlu1 %1397 }
 0xc2a   :  { %v1409_v32 = vsub.f32 %v4464_v10, %v1398_v31 }
 0xc2c   :  { %1439 = vperm.xlu1 %3960, %v1409_v32  }
 0xc2d   :  { %v1402_v33 = vpop.permute.xlu1 %1401 }
 0xc2e   :  { %v1411_v34 = vsub.f32 %v4470_v13, %v1402_v33 }
 0xc30   :  { %1449 = vperm.xlu0 %3959, %v1411_v34  }
 0xc31   :  { %v1404_v55 = vpop.permute.xlu1 %1403 }
 0xc32   :  { %v1412_v57 = vsub.f32 %v4476_v17, %v1404_v55 }
 0xc34   :  { %1454 = vperm.xlu1 %3960, %v1412_v57   ;;  %3961 = vset.pattern.permute.xlu0 %v4111_v2 }
 0xc35   :  { %1471 = vperm.xlu0 %3961, %v4464_v10   ;;  %v1416_v0 = vpop.permute.xlu0 %1415 }
 0xc36   :  { %v1433_v40 = vmul.f32 %v4558_v28, %v1416_v0 }
 0xc38   :  { %3962 = vset.pattern.permute.xlu1 %v4111_v2 }
 0xc39   :  { %1475 = vperm.xlu1 %3962, %v4458_v6   ;;  %1483 = vperm.xlu0 %3961, %v4476_v17  }
 0xc3d   :  { %1479 = vperm.xlu1 %3962, %v4470_v13   ;;  %3964 = vset.pattern.permute.xlu0 %v4112_v1 }
 0xc41   :  { %3963 = vset.pattern.permute.xlu1 %v4112_v1 }
 0xc42   :  { %v1421_v35 = vpop.permute.xlu1 %1420 }
 0xc43   :  { %v1434_v51 = vmul.f32 %v4552_v43, %v1421_v35 }
 0xc46   :  { %v1426_v36 = vpop.permute.xlu1 %1425 }
 0xc47   :  { %v1435_v60 = vmul.f32 %v4572_v49, %v1426_v36 }
 0xc4a   :  { %v1431_v37 = vpop.permute.xlu1 %1430 }
 0xc4b   :  { %v1436_v4 = vmul.f32 %v4567_v48, %v1431_v37 }
 0xca6   :  { %v1445_v41 = vpop.permute.xlu0 %1444 }
 0xca7   :  { %v1458_v47 = vadd.f32 %v1445_v41, %v1434_v51 }
 0xca9   :  { %v1462_v54 = vmax.f32 %v1458_v47, 0.0 }
 0xcab   :  { %v1440_v62 = vpop.permute.xlu1 %1439 }
 0xcac   :  { %v1457_v53 = vadd.f32 %v1440_v62, %v1433_v40 }
 0xcae   :  { %v1461_v56 = vmax.f32 %v1457_v53, 0.0 }
 0xcaf   :  { %v1450_v59 = vpop.permute.xlu0 %1449 }
 0xcb0   :  { %v3780_v3 = vpack.c.bf16 %v1462_v54, %v1461_v56  ;;  %v1459_v7 = vadd.f32 %v1450_v59, %v1435_v60 }
 0xcb2   :  { %3781 = vmatprep.subr.bf16.mxu0 %v3780_v3  ;;  %v1463_v11 = vmax.f32 %v1459_v7, 0.0 }
 0xcb3   :  { %v1455_v9 = vpop.permute.xlu1 %1454  ;;  %3783 = vmatpush3.bf16.msra.mxu0 %v3780_v3 }
 0xcb4   :  { %v1460_v8 = vadd.f32 %v1455_v9, %v1436_v4  ;;  %v1472_v45 = vpop.permute.xlu0 %1471 }
 0xcb6   :  { %v1464_v14 = vmax.f32 %v1460_v8, 0.0 }
 0xcb8   :  { %v3784_v15 = vpack.c.bf16 %v1464_v14, %v1463_v11  ;;  %v1476_v52 = vpop.permute.xlu1 %1475  ;;  %v1484_v32 = vpop.permute.xlu0 %1483 }
 0xcba   :  { %3785 = vmatprep.subr.bf16.mxu0 %v3784_v15 }
 0xcbb   :  { %3787 = vmatpush3.bf16.msra.mxu0 %v3784_v15 }
 0xcbc   :  { %v1480_v31 = vpop.permute.xlu1 %1479 }
 0xcbe   :  { %3638 = vmatmul.mubr.msk.f32.vlgmr.msra.gmra.mrb[4].mxu0 %vm299_vm2, %v3371_v39 }
 0xcbf   :  { %3640 = vmatprep.mubr.msk.f32.mxu0 %vm299_vm2, %v3372_v38 }
 0xcc2   :  { %3641 = vmatmul.mubr.msk.f32.gmra.mrb[6].mxu0 %vm299_vm2, %v3373_v19 }
 0xd91   :  { %v3639_v18 = vpop.f32.mrb[4].mxu0 }
 0xd92   :  { %v4620_v22 = vadd.f32 %v3639_v18, %v1476_v52  ;;  %v1564_v21 = vpop.f32.mrb[5].mxu0 }
 0xd93   :  { %v4622_v25 = vadd.f32 %v1564_v21, %v1472_v45 }
 0xd94   :  { %1585 = vadd.xlane.f32.xlu0 %v4620_v22  ;;  %v1596_v30 = vmul.f32 %v4620_v22, %v4620_v22 }
 0xd95   :  { %v3642_v26 = vpop.f32.mrb[6].mxu0  ;;  %1583 = vadd.xlane.f32.xlu1 %v4622_v25  ;;  %v1595_v27 = vmul.f32 %v4622_v25, %v4622_v25 }
 0xd96   :  { %v1574_v29 = vpop.f32.mrb[7].mxu0  ;;  %v4632_v34 = vadd.f32 %v3642_v26, %v1484_v32 }
 0xd97   :  { %v4630_v33 = vadd.f32 %v1574_v29, %v1480_v31 }
 0xd98   :  { %1599 = vadd.xlane.f32.xlu0 %v1595_v27  ;;  %v1598_v57 = vmul.f32 %v4632_v34, %v4632_v34 }
 0xd99   :  { %1601 = vadd.xlane.f32.xlu1 %v1596_v30  ;;  %v1597_v55 = vmul.f32 %v4630_v33, %v4630_v33 }
 0xd9c   :  { %1587 = vadd.xlane.f32.xlu0 %v4630_v33 }
 0xd9d   :  { %1589 = vadd.xlane.f32.xlu1 %v4632_v34 }
 0xda0   :  { %1603 = vadd.xlane.f32.xlu0 %v1597_v55 }
 0xda1   :  { %1605 = vadd.xlane.f32.xlu1 %v1598_v57 }
 0xe21   :  { %v1586_v2 = vpop.xlane.xlu0 %1585 }
 0xe22   :  { %v1584_v35 = vpop.xlane.xlu1 %1583  ;;  %v1592_v36 = vmul.f32 0.0078125, %v1586_v2 }
 0xe23   :  { %v1591_v0 = vmul.f32 0.0078125, %v1584_v35  ;;  %v4113_v35 = vmov 17  }
 0xe24   :  { %v1612_v47 = vmul.f32 %v1592_v36, %v1592_v36 }
 0xe25   :  { %v1611_v37 = vmul.f32 %v1591_v0, %v1591_v0  ;;  %v1600_v41 = vpop.xlane.xlu0 %1599 }
 0xe26   :  { %v1607_v51 = vmul.f32 0.0078125, %v1600_v41  ;;  %v1602_v40 = vpop.xlane.xlu1 %1601 }
 0xe27   :  { %v1608_v62 = vmul.f32 0.0078125, %v1602_v40 }
 0xe28   :  { %v1615_v53 = vsub.f32 %v1607_v51, %v1611_v37 }
 0xe29   :  { %v1616_v54 = vsub.f32 %v1608_v62, %v1612_v47  ;;  %v1588_v56 = vpop.xlane.xlu0 %1587 }
 0xe2a   :  { %v1619_v59 = vadd.f32 1e-05, %v1615_v53  ;;  %v1593_v60 = vmul.f32 0.0078125, %v1588_v56  ;;  %v1590_v3 = vpop.xlane.xlu1 %1589  ;;  %v4114_v53 = vmov 18  }
 0xe2b   :  { %v1620_v4 = vadd.f32 1e-05, %v1616_v54  ;;  %v1594_v7 = vmul.f32 0.0078125, %v1590_v3  ;;  %v3378_v54 = vld [vmem:[%s5105_s2 + $0xe0] sm:$0xff] }
 0xe2c   :  { %4037 = vrsqrt.f32 %v1619_v59  ;;  %v1613_v8 = vmul.f32 %v1593_v60, %v1593_v60  ;;  %3651 = vmatprep.mubr.msk.f32.mxu0 %vm299_vm2, %v3378_v54 }
 0xe2d   :  { %4039 = vrsqrt.f32 %v1620_v4  ;;  %v1604_v9 = vpop.xlane.xlu0 %1603  ;;  %v1614_v15 = vmul.f32 %v1594_v7, %v1594_v7 }
 0xe2e   :  { %v1609_v11 = vmul.f32 0.0078125, %v1604_v9  ;;  %v1606_v14 = vpop.xlane.xlu1 %1605 }
 0xe2f   :  { %v1610_v39 = vmul.f32 0.0078125, %v1606_v14 }
 0xe30   :  { %v1617_v38 = vsub.f32 %v1609_v11, %v1613_v8 }
 0xe31   :  { %v1618_v19 = vsub.f32 %v1610_v39, %v1614_v15 }
 0xe32   :  { %v1621_v52 = vadd.f32 1e-05, %v1617_v38 }
 0xe33   :  { %v1622_v18 = vadd.f32 1e-05, %v1618_v19 }
 0xe34   :  { %4041 = vrsqrt.f32 %v1621_v52 }
 0xe35   :  { %4043 = vrsqrt.f32 %v1622_v18 }
 0xe36   :  { %v4038_v45 = vpop.eup %4037 }
 0xe37   :  { %v4040_v21 = vpop.eup %4039  ;;  %v1627_v26 = vmul.f32 %v4464_v10, %v4038_v45 }
 0xe38   :  { %v1628_v27 = vmul.f32 %v4458_v6, %v4040_v21 }
 0xe39   :  { %v1631_v29 = vmul.f32 %v1627_v26, %v1591_v0 }
 0xe3a   :  { %v1632_v30 = vmul.f32 %v1628_v27, %v1592_v36 }
 0xe3b   :  { %1639 = vrot.lane.b32.xlu0 %v1631_v29, %s4097_s11 }
 0xe3c   :  { %1641 = vrot.lane.b32.xlu1 %v1632_v30, %s4097_s11  ;;  %v1825_v30 = vld [vmem:[%s5103_s1 + $0x60] sm:$0xff] }
 0xe3e   :  { %v4042_v31 = vpop.eup %4041 }
 0xe3f   :  { %v4044_v32 = vpop.eup %4043  ;;  %v1629_v55 = vmul.f32 %v4470_v13, %v4042_v31  ;;  %v1826_v31 = vld [vmem:[%s5103_s1 + $0x68] sm:$0xff] }
 0xe40   :  { %v1630_v57 = vmul.f32 %v4476_v17, %v4044_v32  ;;  %v1828_v32 = vld [vmem:[%s5103_s1 + $0x78] sm:$0xff] }
 0xe41   :  { %v1633_v1 = vmul.f32 %v1629_v55, %v1593_v60 }
 0xe42   :  { %v1634_v2 = vmul.f32 %v1630_v57, %v1594_v7 }
 0xe43   :  { %1643 = vrot.lane.b32.xlu1 %v1633_v1, %s4097_s11  ;;  %v1214_v1 = vadd.f32 nan, %v4528_v63 }
 0xe44   :  { %1645 = vrot.lane.b32.xlu0 %v1634_v2, %s4097_s11 }
 0xe47   :  { %1657 = vperm.xlu1 %3963, %v1627_v26  }
 0xe48   :  { %1662 = vperm.xlu0 %3964, %v1628_v27  }
 0xe4b   :  { %1672 = vperm.xlu1 %3963, %v1630_v57   ;;  %v1219_v57 = vadd.f32 nan, %v4538_v12 }
 0xe4c   :  { %1667 = vperm.xlu0 %3964, %v1629_v55  }
 0xe4f   :  { %3965 = vset.pattern.permute.xlu1 %v4113_v35 }
 0xe50   :  { %3966 = vset.pattern.permute.xlu0 %v4113_v35  ;;  %v1229_v35 = vadd.f32 nan, %v4546_v20 }
 0xe52   :  { %v1336_v12 = vadd.f32 %v4386_v58, %v1229_v35 }
 0xead   :  { %v1640_v37 = vpop.permute.xlu0 %1639 }
 0xeae   :  { %v1642_v36 = vpop.permute.xlu1 %1641  ;;  %v1651_v41 = vsub.f32 %v4464_v10, %v1640_v37  ;;  %v1333_v37 = vadd.f32 %v4361_v46, %v1214_v1  ;;  %v1340_v46 = vadd.f32 %v4564_v23, %v1336_v12 }
 0xeaf   :  { %v1652_v0 = vsub.f32 %v4458_v6, %v1642_v36  ;;  %v1334_v36 = vadd.f32 %v4356_v44, %v1219_v57 }
 0xeb1   :  { %1686 = vperm.xlu1 %3965, %v1652_v0   ;;  %v1224_v0 = vadd.f32 nan, %v4532_v5 }
 0xeb5   :  { %v1644_v51 = vpop.permute.xlu1 %1643  ;;  %1681 = vperm.xlu1 %3965, %v1651_v41  }
 0xeb6   :  { %v1653_v40 = vsub.f32 %v4470_v13, %v1644_v51  ;;  %v1646_v47 = vpop.permute.xlu0 %1645  ;;  %v1338_v51 = vadd.f32 %v4548_v16, %v1334_v36 }
 0xeb7   :  { %v1654_v62 = vsub.f32 %v4476_v17, %v1646_v47  ;;  %v1335_v47 = vadd.f32 %v4372_v50, %v1224_v0 }
 0xeb8   :  { %1691 = vperm.xlu0 %3966, %v1653_v40   ;;  %v1337_v40 = vadd.f32 %v1333_v37, %v4554_v42 }
 0xeb9   :  { %1696 = vperm.xlu1 %3965, %v1654_v62   ;;  %v1339_v42 = vadd.f32 %v1335_v47, %v4569_v24 }
 0xebc   :  { %3968 = vset.pattern.permute.xlu0 %v4114_v53 }
 0xebd   :  { %1717 = vperm.xlu0 %3968, %v4458_v6   ;;  %3967 = vset.pattern.permute.xlu1 %v4114_v53 }
 0xebe   :  { %1713 = vperm.xlu1 %3967, %v4464_v10  }
 0xec2   :  { %1721 = vperm.xlu1 %3967, %v4470_v13  }
 0xec6   :  { %1725 = vperm.xlu1 %3967, %v4476_v17   ;;  %v1658_v56 = vpop.permute.xlu1 %1657 }
 0xec7   :  { %v1663_v60 = vpop.permute.xlu0 %1662  ;;  %v1675_v7 = vmul.f32 %v1658_v56, %v4622_v25  ;;  %v3379_v25 = vld [vmem:[%s5105_s2 + $0xe8] sm:$0xff] }
 0xec8   :  { %v1676_v4 = vmul.f32 %v1663_v60, %v4620_v22 }
 0xeca   :  { %v1673_v59 = vpop.permute.xlu1 %1672 }
 0xecb   :  { %v1668_v9 = vpop.permute.xlu0 %1667  ;;  %v1678_v39 = vmul.f32 %v1673_v59, %v4632_v34  ;;  %v3381_v34 = vld [vmem:[%s5105_s2 + $0xf8] sm:$0xff] }
 0xecc   :  { %v1677_v15 = vmul.f32 %v1668_v9, %v4630_v33  ;;  %v3380_v33 = vld [vmem:[%s5105_s2 + $0xf0] sm:$0xff] }
 0xf30   :  { %v1687_v3 = vpop.permute.xlu1 %1686 }
 0xf31   :  { %v1700_v8 = vadd.f32 %v1687_v3, %v1676_v4 }
 0xf33   :  { %v1704_v38 = vmax.f32 %v1700_v8, 0.0 }
 0xf34   :  { %v1682_v11 = vpop.permute.xlu1 %1681 }
 0xf35   :  { %v1699_v14 = vadd.f32 %v1682_v11, %v1675_v7  ;;  %v4115_v7 = vmov 19  }
 0xf36   :  { %3969 = vset.pattern.permute.xlu0 %v4115_v7  ;;  %3970 = vset.pattern.permute.xlu1 %v4115_v7 }
 0xf37   :  { %v1703_v19 = vmax.f32 %v1699_v14, 0.0  ;;  %v1692_v52 = vpop.permute.xlu0 %1691 }
 0xf38   :  { %v1701_v18 = vadd.f32 %v1692_v52, %v1677_v15  ;;  %v1697_v45 = vpop.permute.xlu1 %1696 }
 0xf39   :  { %v1702_v21 = vadd.f32 %v1697_v45, %v1678_v39  ;;  %v3788_v26 = vpack.c.bf16 %v1704_v38, %v1703_v19 }
 0xf3a   :  { %v1705_v27 = vmax.f32 %v1701_v18, 0.0 }
 0xf3b   :  { %v1706_v29 = vmax.f32 %v1702_v21, 0.0  ;;  %3789 = vmatprep.subr.bf16.mxu0 %v3788_v26 }
 0xf3c   :  { %3791 = vmatpush3.bf16.msra.mxu0 %v3788_v26  ;;  %v4706_v41 = vpop.permute.xlu0 %1717 }
 0xf3d   :  { %v3792_v22 = vpack.c.bf16 %v1706_v29, %v1705_v27  ;;  %v4696_v55 = vpop.permute.xlu1 %1713  ;;  %v3850_v63 = vadd.f32 %v4706_v41, %v1338_v51 }
 0xf3e   :  { %v3852_v20 = vadd.f32 %v4696_v55, %v1337_v40 }
 0xf3f   :  { %3793 = vmatprep.subr.bf16.mxu0 %v3792_v22 }
 0xf40   :  { %3795 = vmatpush3.bf16.msra.mxu0 %v3792_v22 }
 0xf41   :  { %3657 = vmatprep.subr.msk.mxu0 %vm62_vm0, %v4497_v61  ;;  %v4700_v2 = vpop.permute.xlu1 %1721 }
 0xf42   :  { %v3856_v53 = vadd.f32 %v4700_v2, %v1339_v42 }
 0xf43   :  { %3652 = vmatmul.mubr.msk.f32.vlgmr.msra.gmra.mrb[8].mxu0 %vm299_vm2, %v3379_v25 }
 0xf44   :  { %3658 = vmatpush3.msk.msra.mxu0 %vm62_vm0, %v4497_v61  ;;  %3654 = vmatprep.mubr.msk.f32.mxu0 %vm299_vm2, %v3380_v33  ;;  %v1827_v61 = vld [vmem:[%s5103_s1 + $0x70] sm:$0xff] }
 0xf45   :  { %v4714_v62 = vpop.permute.xlu1 %1725 }
 0xf46   :  { %v3854_v50 = vadd.f32 %v4714_v62, %v1340_v46 }
 0xf47   :  { %3655 = vmatmul.mubr.msk.f32.gmra.mrb[10].mxu0 %vm299_vm2, %v3381_v34 }
 0xf48   :  { %3659 = vmatprep.mubr.msk.f32.mxu0 %vm49_vm1, %v1825_v30 }
 0xf4b   :  { %3660 = vmatmul.mubr.msk.f32.vlgmr.msra.gmra.mrb[8].mxu0 %vm49_vm1, %v1826_v31 }
 0xf4c   :  { %3662 = vmatprep.mubr.msk.f32.mxu0 %vm49_vm1, %v1827_v61 }
 0xf4f   :  { %3663 = vmatmul.mubr.msk.f32.gmra.mrb[10].mxu0 %vm49_vm1, %v1828_v32 }
0x101e   :  { %v4716_v44 = vpop.f32.mrb[8].mxu0 }
0x101f   :  { %v4720_v5 = vadd.f32 %v3850_v63, %v4716_v44  ;;  %v4722_v16 = vpop.f32.mrb[9].mxu0 }
0x1020   :  { %v4726_v58 = vadd.f32 %v3852_v20, %v4722_v16 }
0x1021   :  { %1936 = vadd.xlane.f32.xlu1 %v4720_v5  ;;  %v1947_v59 = vmul.f32 %v4720_v5, %v4720_v5 }
0x1022   :  { %1934 = vadd.xlane.f32.xlu0 %v4726_v58  ;;  %v4732_v54 = vpop.f32.mrb[10].mxu0  ;;  %v1946_v3 = vmul.f32 %v4726_v58, %v4726_v58 }
0x1023   :  { %v4735_v23 = vadd.f32 %v3854_v50, %v4732_v54  ;;  %v4737_v56 = vpop.f32.mrb[11].mxu0 }
0x1024   :  { %v4740_v24 = vadd.f32 %v3856_v53, %v4737_v56 }
0x1025   :  { %v1949_v4 = vmul.f32 %v4735_v23, %v4735_v23 }
0x1026   :  { %1938 = vadd.xlane.f32.xlu1 %v4740_v24  ;;  %1952 = vadd.xlane.f32.xlu0 %v1947_v59  ;;  %v1948_v60 = vmul.f32 %v4740_v24, %v4740_v24  ;;  %v4116_v59 = vmov 20  }
0x102a   :  { %1954 = vadd.xlane.f32.xlu1 %v1948_v60  ;;  %1950 = vadd.xlane.f32.xlu0 %v1946_v3 }
0x102e   :  { %1940 = vadd.xlane.f32.xlu0 %v4735_v23 }
0x1032   :  { %1956 = vadd.xlane.f32.xlu0 %v1949_v4 }
0x10ae   :  { %v1937_v9 = vpop.xlane.xlu1 %1936 }
0x10af   :  { %v1935_v8 = vpop.xlane.xlu0 %1934  ;;  %v1943_v11 = vmul.f32 0.0078125, %v1937_v9 }
0x10b0   :  { %v1942_v14 = vmul.f32 0.0078125, %v1935_v8 }
0x10b1   :  { %v1963_v38 = vmul.f32 %v1943_v11, %v1943_v11 }
0x10b2   :  { %v1962_v45 = vmul.f32 %v1942_v14, %v1942_v14 }
0x10b3   :  { %v1939_v15 = vpop.xlane.xlu1 %1938  ;;  %v1953_v39 = vpop.xlane.xlu0 %1952 }
0x10b4   :  { %v1944_v19 = vmul.f32 0.0078125, %v1939_v15  ;;  %v1959_v52 = vmul.f32 0.0078125, %v1953_v39  ;;  %v3391_v39 = vld [vmem:[%s5105_s2 + $0x60] sm:$0xff] }
0x10b5   :  { %3673 = vmatprep.mubr.msk.f32.mxu1 %vm299_vm2, %v3391_v39 }
0x10b6   :  { %v1967_v18 = vsub.f32 %v1959_v52, %v1963_v38  ;;  %v1964_v27 = vmul.f32 %v1944_v19, %v1944_v19  ;;  %v4117_v38 = vmov 21  }
0x10b7   :  { %v1955_v21 = vpop.xlane.xlu1 %1954  ;;  %v1951_v26 = vpop.xlane.xlu0 %1950 }
0x10b8   :  { %v1971_v29 = vadd.f32 1e-05, %v1967_v18  ;;  %v1960_v22 = vmul.f32 0.0078125, %v1955_v21  ;;  %v1958_v25 = vmul.f32 0.0078125, %v1951_v26 }
0x10ba   :  { %4045 = vrsqrt.f32 %v1971_v29  ;;  %v1968_v33 = vsub.f32 %v1960_v22, %v1964_v27  ;;  %v1966_v34 = vsub.f32 %v1958_v25, %v1962_v45 }
0x10bb   :  { %v1941_v30 = vpop.xlane.xlu0 %1940 }
0x10bc   :  { %v1972_v31 = vadd.f32 1e-05, %v1968_v33  ;;  %v1970_v61 = vadd.f32 1e-05, %v1966_v34  ;;  %v1945_v32 = vmul.f32 0.0078125, %v1941_v30 }
0x10be   :  { %4047 = vrsqrt.f32 %v1972_v31  ;;  %v1965_v1 = vmul.f32 %v1945_v32, %v1945_v32 }
0x10bf   :  { %4049 = vrsqrt.f32 %v1970_v61  ;;  %v1957_v57 = vpop.xlane.xlu0 %1956 }
0x10c0   :  { %v1961_v35 = vmul.f32 0.0078125, %v1957_v57 }
0x10c2   :  { %v1969_v36 = vsub.f32 %v1961_v35, %v1965_v1  ;;  %v3392_v35 = vld [vmem:[%s5105_s2 + $0x68] sm:$0xff] }
0x10c4   :  { %v4046_v0 = vpop.eup %4045  ;;  %v1973_v37 = vadd.f32 1e-05, %v1969_v36  ;;  %v3393_v36 = vld [vmem:[%s5105_s2 + $0x70] sm:$0xff] }
0x10c5   :  { %v1979_v51 = vmul.f32 %v4458_v6, %v4046_v0  ;;  %v3394_v0 = vld [vmem:[%s5105_s2 + $0x78] sm:$0xff] }
0x10c6   :  { %4051 = vrsqrt.f32 %v1973_v37 }
0x10c7   :  { %v1983_v40 = vmul.f32 %v1979_v51, %v1943_v11 }
0x10c8   :  { %v4048_v12 = vpop.eup %4047 }
0x10c9   :  { %v4050_v63 = vpop.eup %4049  ;;  %1992 = vrot.lane.b32.xlu0 %v1983_v40, %s4097_s11  ;;  %v1980_v46 = vmul.f32 %v4470_v13, %v4048_v12 }
0x10ca   :  { %v1978_v47 = vmul.f32 %v4464_v10, %v4050_v63 }
0x10cb   :  { %v1984_v50 = vmul.f32 %v1980_v46, %v1944_v19 }
0x10cc   :  { %v1982_v20 = vmul.f32 %v1978_v47, %v1942_v14 }
0x10cd   :  { %2008 = vperm.xlu0 %3969, %v1978_v47  }
0x10ce   :  { %1990 = vrot.lane.b32.xlu1 %v1982_v20, %s4097_s11 }
0x10d0   :  { %v4052_v42 = vpop.eup %4051 }
0x10d1   :  { %v1981_v53 = vmul.f32 %v4476_v17, %v4052_v42  ;;  %3971 = vset.pattern.permute.xlu0 %v4116_v59 }
0x10d2   :  { %1994 = vrot.lane.b32.xlu1 %v1984_v50, %s4097_s11 }
0x10d3   :  { %v1985_v60 = vmul.f32 %v1981_v53, %v1945_v32 }
0x10d6   :  { %1996 = vrot.lane.b32.xlu1 %v1985_v60, %s4097_s11 }
0x10da   :  { %2013 = vperm.xlu1 %3970, %v1979_v51  }
0x10de   :  { %2018 = vperm.xlu1 %3970, %v1980_v46  }
0x10e2   :  { %2023 = vperm.xlu1 %3970, %v1981_v53  }
0x10e6   :  { %3972 = vset.pattern.permute.xlu1 %v4116_v59 }
0x113b   :  { %v1993_v3 = vpop.permute.xlu0 %1992 }
0x113c   :  { %v2003_v4 = vsub.f32 %v4458_v6, %v1993_v3 }
0x113e   :  { %2037 = vperm.xlu0 %3971, %v2003_v4  }
0x1140   :  { %v1991_v7 = vpop.permute.xlu1 %1990 }
0x1141   :  { %v2002_v9 = vsub.f32 %v4464_v10, %v1991_v7 }
0x1143   :  { %2032 = vperm.xlu1 %3972, %v2002_v9   ;;  %v4118_v9 = vmov 22  }
0x1144   :  { %v1995_v8 = vpop.permute.xlu1 %1994 }
0x1145   :  { %v2004_v11 = vsub.f32 %v4470_v13, %v1995_v8 }
0x1147   :  { %2042 = vperm.xlu0 %3971, %v2004_v11  }
0x1148   :  { %v1997_v14 = vpop.permute.xlu1 %1996 }
0x1149   :  { %v2005_v15 = vsub.f32 %v4476_v17, %v1997_v14 }
0x114b   :  { %2047 = vperm.xlu1 %3972, %v2005_v15   ;;  %3973 = vset.pattern.permute.xlu0 %v4117_v38 }
0x114c   :  { %2064 = vperm.xlu0 %3973, %v4464_v10   ;;  %v2009_v18 = vpop.permute.xlu0 %2008 }
0x114d   :  { %v2026_v27 = vmul.f32 %v4726_v58, %v2009_v18 }
0x114f   :  { %3974 = vset.pattern.permute.xlu1 %v4117_v38 }
0x1150   :  { %2068 = vperm.xlu1 %3974, %v4458_v6   ;;  %2076 = vperm.xlu0 %3973, %v4476_v17  }
0x1154   :  { %2072 = vperm.xlu1 %3974, %v4470_v13   ;;  %3976 = vset.pattern.permute.xlu0 %v4118_v9 }
0x1158   :  { %3975 = vset.pattern.permute.xlu1 %v4118_v9 }
0x1159   :  { %v2014_v19 = vpop.permute.xlu1 %2013 }
0x115a   :  { %v2027_v26 = vmul.f32 %v4720_v5, %v2014_v19 }
0x115d   :  { %v2019_v52 = vpop.permute.xlu1 %2018 }
0x115e   :  { %v2028_v10 = vmul.f32 %v4740_v24, %v2019_v52 }
0x1161   :  { %v2024_v45 = vpop.permute.xlu1 %2023 }
0x1162   :  { %v2029_v17 = vmul.f32 %v4735_v23, %v2024_v45 }
0x11bd   :  { %v2038_v21 = vpop.permute.xlu0 %2037 }
0x11be   :  { %v2051_v29 = vadd.f32 %v2038_v21, %v2027_v26 }
0x11c0   :  { %v2055_v33 = vmax.f32 %v2051_v29, 0.0 }
0x11c2   :  { %v2033_v22 = vpop.permute.xlu1 %2032 }
0x11c3   :  { %v2050_v25 = vadd.f32 %v2033_v22, %v2026_v27 }
0x11c5   :  { %v2054_v6 = vmax.f32 %v2050_v25, 0.0 }
0x11c6   :  { %v2043_v34 = vpop.permute.xlu0 %2042 }
0x11c7   :  { %v3796_v13 = vpack.c.bf16 %v2055_v33, %v2054_v6  ;;  %v2052_v30 = vadd.f32 %v2043_v34, %v2028_v10 }
0x11c9   :  { %3797 = vmatprep.subr.bf16.mxu1 %v3796_v13  ;;  %v2056_v32 = vmax.f32 %v2052_v30, 0.0 }
0x11ca   :  { %v2048_v31 = vpop.permute.xlu1 %2047  ;;  %3799 = vmatpush3.bf16.msra.mxu1 %v3796_v13 }
0x11cb   :  { %v2053_v61 = vadd.f32 %v2048_v31, %v2029_v17  ;;  %v2065_v40 = vpop.permute.xlu0 %2064 }
0x11cd   :  { %v2057_v57 = vmax.f32 %v2053_v61, 0.0 }
0x11cf   :  { %v3800_v1 = vpack.c.bf16 %v2057_v57, %v2056_v32  ;;  %v2069_v37 = vpop.permute.xlu1 %2068  ;;  %v2077_v59 = vpop.permute.xlu0 %2076 }
0x11d1   :  { %3801 = vmatprep.subr.bf16.mxu1 %v3800_v1 }
0x11d2   :  { %3803 = vmatpush3.bf16.msra.mxu1 %v3800_v1 }
0x11d3   :  { %v2073_v53 = vpop.permute.xlu1 %2072 }
0x11d5   :  { %3674 = vmatmul.mubr.msk.f32.vlgmr.msra.gmra.mrb[16].mxu1 %vm299_vm2, %v3392_v35 }
0x11d6   :  { %3676 = vmatprep.mubr.msk.f32.mxu1 %vm299_vm2, %v3393_v36 }
0x11d9   :  { %3677 = vmatmul.mubr.msk.f32.gmra.mrb[18].mxu1 %vm299_vm2, %v3394_v0  ;;  %v4811_v0 = vld [vmem:[%s5104_s3] sm:$0xff] }
0x12a8   :  { %v3675_v51 = vpop.f32.mrb[16].mxu1 }
0x12a9   :  { %v4788_v12 = vadd.f32 %v3675_v51, %v2069_v37  ;;  %v2157_v63 = vpop.f32.mrb[17].mxu1  ;;  %v4817_v51 = vld [vmem:[%s5104_s3 + $0x8] sm:$0xff] }
0x12aa   :  { %v4790_v47 = vadd.f32 %v2157_v63, %v2065_v40 }
0x12ab   :  { %2178 = vadd.xlane.f32.xlu0 %v4788_v12  ;;  %v2189_v50 = vmul.f32 %v4788_v12, %v4788_v12 }
0x12ac   :  { %v3678_v20 = vpop.f32.mrb[18].mxu1  ;;  %2176 = vadd.xlane.f32.xlu1 %v4790_v47  ;;  %v2188_v46 = vmul.f32 %v4790_v47, %v4790_v47 }
0x12ad   :  { %v2167_v42 = vpop.f32.mrb[19].mxu1  ;;  %v4800_v3 = vadd.f32 %v3678_v20, %v2077_v59  ;;  %v4831_v59 = vld [vmem:[%s5104_s3 + $0x18] sm:$0xff] }
0x12ae   :  { %v4798_v60 = vadd.f32 %v2167_v42, %v2073_v53 }
0x12af   :  { %2192 = vadd.xlane.f32.xlu0 %v2188_v46  ;;  %v2191_v7 = vmul.f32 %v4800_v3, %v4800_v3 }
0x12b0   :  { %2194 = vadd.xlane.f32.xlu1 %v2189_v50  ;;  %v2190_v4 = vmul.f32 %v4798_v60, %v4798_v60  ;;  %v4825_v50 = vld [vmem:[%s5104_s3 + $0x10] sm:$0xff] }
0x12b3   :  { %2180 = vadd.xlane.f32.xlu0 %v4798_v60 }
0x12b4   :  { %2182 = vadd.xlane.f32.xlu1 %v4800_v3 }
0x12b7   :  { %2196 = vadd.xlane.f32.xlu0 %v2190_v4 }
0x12b8   :  { %2198 = vadd.xlane.f32.xlu1 %v2191_v7 }
0x1338   :  { %v2179_v8 = vpop.xlane.xlu0 %2178 }
0x1339   :  { %v2177_v11 = vpop.xlane.xlu1 %2176  ;;  %v2185_v14 = vmul.f32 0.0078125, %v2179_v8  ;;  %v4119_v8 = vmov 23  }
0x133a   :  { %v2184_v15 = vmul.f32 0.0078125, %v2177_v11 }
0x133b   :  { %v2205_v18 = vmul.f32 %v2185_v14, %v2185_v14 }
0x133c   :  { %v2204_v39 = vmul.f32 %v2184_v15, %v2184_v15  ;;  %v2193_v38 = vpop.xlane.xlu0 %2192 }
0x133d   :  { %v2200_v19 = vmul.f32 0.0078125, %v2193_v38  ;;  %v2195_v52 = vpop.xlane.xlu1 %2194 }
0x133e   :  { %v2201_v45 = vmul.f32 0.0078125, %v2195_v52 }
0x133f   :  { %v2208_v21 = vsub.f32 %v2200_v19, %v2204_v39 }
0x1340   :  { %v2209_v26 = vsub.f32 %v2201_v45, %v2205_v18  ;;  %v2181_v27 = vpop.xlane.xlu0 %2180  ;;  %v4120_v45 = vmov 24  }
0x1341   :  { %v2212_v29 = vadd.f32 1e-05, %v2208_v21  ;;  %v2186_v22 = vmul.f32 0.0078125, %v2181_v27  ;;  %v2183_v25 = vpop.xlane.xlu1 %2182  ;;  %v3399_v21 = vld [vmem:[%s5105_s2 + $0x100] sm:$0xff] }
0x1342   :  { %v2213_v33 = vadd.f32 1e-05, %v2209_v26  ;;  %v2187_v6 = vmul.f32 0.0078125, %v2183_v25  ;;  %3687 = vmatprep.mubr.msk.f32.mxu1 %vm299_vm2, %v3399_v21 }
0x1343   :  { %4053 = vrsqrt.f32 %v2212_v29  ;;  %v2206_v10 = vmul.f32 %v2186_v22, %v2186_v22 }
0x1344   :  { %4055 = vrsqrt.f32 %v2213_v33  ;;  %v2197_v34 = vpop.xlane.xlu0 %2196  ;;  %v2207_v30 = vmul.f32 %v2187_v6, %v2187_v6 }
0x1345   :  { %v2202_v13 = vmul.f32 0.0078125, %v2197_v34  ;;  %v2199_v17 = vpop.xlane.xlu1 %2198 }
0x1346   :  { %v2203_v31 = vmul.f32 0.0078125, %v2199_v17 }
0x1347   :  { %v2210_v61 = vsub.f32 %v2202_v13, %v2206_v10 }
0x1348   :  { %v2211_v32 = vsub.f32 %v2203_v31, %v2207_v30 }
0x1349   :  { %v2214_v57 = vadd.f32 1e-05, %v2210_v61 }
0x134a   :  { %v2215_v1 = vadd.f32 1e-05, %v2211_v32 }
0x134b   :  { %4057 = vrsqrt.f32 %v2214_v57 }
0x134c   :  { %4059 = vrsqrt.f32 %v2215_v1 }
0x134d   :  { %v4054_v35 = vpop.eup %4053 }
0x134e   :  { %v4056_v36 = vpop.eup %4055  ;;  %v2220_v37 = vmul.f32 %v4811_v0, %v4054_v35 }
0x134f   :  { %v2221_v40 = vmul.f32 %v4817_v51, %v4056_v36 }
0x1350   :  { %v2224_v63 = vmul.f32 %v2220_v37, %v2184_v15 }
0x1351   :  { %v2225_v20 = vmul.f32 %v2221_v40, %v2185_v14 }
0x1352   :  { %2232 = vrot.lane.b32.xlu0 %v2224_v63, %s4097_s11  ;;  %v3402_v63 = vld [vmem:[%s5105_s2 + $0x118] sm:$0xff] }
0x1353   :  { %2234 = vrot.lane.b32.xlu1 %v2225_v20, %s4097_s11  ;;  %v2418_v20 = vld [vmem:[%s5103_s1 + $0x80] sm:$0xff] }
0x1355   :  { %v4058_v46 = vpop.eup %4057 }
0x1356   :  { %v4060_v42 = vpop.eup %4059  ;;  %v2222_v53 = vmul.f32 %v4825_v50, %v4058_v46  ;;  %v2419_v46 = vld [vmem:[%s5103_s1 + $0x88] sm:$0xff] }
0x1357   :  { %v2223_v4 = vmul.f32 %v4831_v59, %v4060_v42  ;;  %v2420_v42 = vld [vmem:[%s5103_s1 + $0x90] sm:$0xff] }
0x1358   :  { %v2226_v7 = vmul.f32 %v2222_v53, %v2186_v22 }
0x1359   :  { %v2227_v9 = vmul.f32 %v2223_v4, %v2187_v6 }
0x135a   :  { %2236 = vrot.lane.b32.xlu1 %v2226_v7, %s4097_s11  ;;  %v1812_v7 = vadd.f32 nan, %v4706_v41 }
0x135b   :  { %2238 = vrot.lane.b32.xlu0 %v2227_v9, %s4097_s11  ;;  %v1807_v9 = vadd.f32 nan, %v4696_v55 }
0x135e   :  { %2250 = vperm.xlu1 %3975, %v2220_v37  }
0x135f   :  { %2255 = vperm.xlu0 %3976, %v2221_v40  }
0x1362   :  { %2265 = vperm.xlu1 %3975, %v2223_v4  }
0x1363   :  { %2260 = vperm.xlu0 %3976, %v2222_v53   ;;  %v2421_v53 = vld [vmem:[%s5103_s1 + $0x98] sm:$0xff] }
0x1366   :  { %3977 = vset.pattern.permute.xlu1 %v4119_v8 }
0x1367   :  { %3978 = vset.pattern.permute.xlu0 %v4119_v8 }
0x13c4   :  { %v2233_v15 = vpop.permute.xlu0 %2232 }
0x13c5   :  { %v2235_v11 = vpop.permute.xlu1 %2234  ;;  %v2244_v39 = vsub.f32 %v4811_v0, %v2233_v15  ;;  %v1817_v15 = vadd.f32 nan, %v4700_v2 }
0x13c6   :  { %v2245_v14 = vsub.f32 %v4817_v51, %v2235_v11  ;;  %v1822_v11 = vadd.f32 nan, %v4714_v62 }
0x13c8   :  { %2279 = vperm.xlu1 %3977, %v2245_v14   ;;  %v1927_v14 = vadd.f32 %v4552_v43, %v1812_v7  ;;  %v1929_v41 = vadd.f32 %v4567_v48, %v1822_v11 }
0x13cc   :  { %v2237_v38 = vpop.permute.xlu1 %2236  ;;  %2274 = vperm.xlu1 %3977, %v2244_v39   ;;  %v1926_v39 = vadd.f32 %v4558_v28, %v1807_v9 }
0x13cd   :  { %v2246_v19 = vsub.f32 %v4825_v50, %v2237_v38  ;;  %v2239_v52 = vpop.permute.xlu0 %2238 }
0x13ce   :  { %v2247_v18 = vsub.f32 %v4831_v59, %v2239_v52  ;;  %v1931_v52 = vadd.f32 %v4716_v44, %v1927_v14 }
0x13cf   :  { %2284 = vperm.xlu0 %3978, %v2246_v19  }
0x13d0   :  { %2289 = vperm.xlu1 %3977, %v2247_v18   ;;  %v1930_v18 = vadd.f32 %v1926_v39, %v4722_v16 }
0x13d3   :  { %3980 = vset.pattern.permute.xlu0 %v4120_v45 }
0x13d4   :  { %2310 = vperm.xlu0 %3980, %v4817_v51   ;;  %3979 = vset.pattern.permute.xlu1 %v4120_v45  ;;  %v1928_v45 = vadd.f32 %v4572_v49, %v1817_v15 }
0x13d5   :  { %2306 = vperm.xlu1 %3979, %v4811_v0  }
0x13d6   :  { %v1932_v48 = vadd.f32 %v1928_v45, %v4737_v56 }
0x13d9   :  { %2314 = vperm.xlu1 %3979, %v4825_v50  }
0x13dd   :  { %2318 = vperm.xlu1 %3979, %v4831_v59   ;;  %v2251_v26 = vpop.permute.xlu1 %2250 }
0x13de   :  { %v2256_v29 = vpop.permute.xlu0 %2255  ;;  %v2268_v33 = vmul.f32 %v2251_v26, %v4790_v47  ;;  %v3400_v47 = vld [vmem:[%s5105_s2 + $0x108] sm:$0xff]  ;;  %v1933_v26 = vadd.f32 %v4732_v54, %v1929_v41 }
0x13df   :  { %v2269_v25 = vmul.f32 %v2256_v29, %v4788_v12 }
0x13e1   :  { %v2266_v27 = vpop.permute.xlu1 %2265 }
0x13e2   :  { %v2261_v6 = vpop.permute.xlu0 %2260  ;;  %v2271_v30 = vmul.f32 %v2266_v27, %v4800_v3  ;;  %v3401_v3 = vld [vmem:[%s5105_s2 + $0x110] sm:$0xff] }
0x13e3   :  { %v2270_v17 = vmul.f32 %v2261_v6, %v4798_v60  ;;  %v4858_v60 = vld [vmem:[%s5102_s0] sm:$0xf] }
0x1447   :  { %v2280_v22 = vpop.permute.xlu1 %2279 }
0x1448   :  { %v2293_v34 = vadd.f32 %v2280_v22, %v2269_v25 }
0x144a   :  { %v2297_v31 = vmax.f32 %v2293_v34, 0.0 }
0x144b   :  { %v2275_v10 = vpop.permute.xlu1 %2274 }
0x144c   :  { %v2292_v13 = vadd.f32 %v2275_v10, %v2268_v33 }
0x144e   :  { %v2296_v61 = vmax.f32 %v2292_v13, 0.0  ;;  %v2285_v32 = vpop.permute.xlu0 %2284 }
0x144f   :  { %v2294_v57 = vadd.f32 %v2285_v32, %v2270_v17  ;;  %v2290_v1 = vpop.permute.xlu1 %2289  ;;  %v4121_v17 = vmov 25  }
0x1450   :  { %v3804_v35 = vpack.c.bf16 %v2297_v31, %v2296_v61  ;;  %v2295_v36 = vadd.f32 %v2290_v1, %v2271_v30  ;;  %3981 = vset.pattern.permute.xlu0 %v4121_v17  ;;  %3982 = vset.pattern.permute.xlu1 %v4121_v17 }
0x1451   :  { %v2298_v37 = vmax.f32 %v2294_v57, 0.0 }
0x1452   :  { %v2299_v40 = vmax.f32 %v2295_v36, 0.0  ;;  %3805 = vmatprep.subr.bf16.mxu1 %v3804_v35 }
0x1453   :  { %3807 = vmatpush3.bf16.msra.mxu1 %v3804_v35  ;;  %v4895_v38 = vpop.permute.xlu0 %2310 }
0x1454   :  { %v3808_v12 = vpack.c.bf16 %v2299_v40, %v2298_v37  ;;  %v2307_v4 = vpop.permute.xlu1 %2306  ;;  %v3858_v55 = vadd.f32 %v4895_v38, %v1931_v52 }
0x1455   :  { %v2400_v19 = vadd.f32 nan, %v2307_v4  ;;  %v3860_v62 = vadd.f32 %v2307_v4, %v1930_v18 }
0x1456   :  { %3809 = vmatprep.subr.bf16.mxu1 %v3808_v12 }
0x1457   :  { %3811 = vmatpush3.bf16.msra.mxu1 %v3808_v12  ;;  %v2519_v28 = vadd.f32 %v4726_v58, %v2400_v19 }
0x1458   :  { %3693 = vmatprep.subr.msk.mxu1 %vm62_vm0, %v4858_v60  ;;  %v2315_v8 = vpop.permute.xlu1 %2314 }
0x1459   :  { %v2410_v21 = vadd.f32 nan, %v2315_v8  ;;  %v3864_v22 = vadd.f32 %v2315_v8, %v1932_v48 }
0x145a   :  { %3688 = vmatmul.mubr.msk.f32.vlgmr.msra.gmra.mrb[20].mxu1 %vm299_vm2, %v3400_v47 }
0x145b   :  { %3694 = vmatpush3.msk.msra.mxu1 %vm62_vm0, %v4858_v60  ;;  %3690 = vmatprep.mubr.msk.f32.mxu1 %vm299_vm2, %v3401_v3  ;;  %v2521_v54 = vadd.f32 %v4740_v24, %v2410_v21 }
0x145c   :  { %v4902_v43 = vpop.permute.xlu1 %2318 }
0x145d   :  { %v3862_v49 = vadd.f32 %v4902_v43, %v1933_v26 }
0x145e   :  { %3691 = vmatmul.mubr.msk.f32.gmra.mrb[22].mxu1 %vm299_vm2, %v3402_v63 }
0x145f   :  { %3695 = vmatprep.mubr.msk.f32.mxu1 %vm49_vm1, %v2418_v20 }
0x1462   :  { %3696 = vmatmul.mubr.msk.f32.vlgmr.msra.gmra.mrb[20].mxu1 %vm49_vm1, %v2419_v46 }
0x1463   :  { %3698 = vmatprep.mubr.msk.f32.mxu1 %vm49_vm1, %v2420_v42 }
0x1466   :  { %3699 = vmatmul.mubr.msk.f32.gmra.mrb[22].mxu1 %vm49_vm1, %v2421_v53 }
0x1535   :  { %v4904_v2 = vpop.f32.mrb[20].mxu1 }
0x1536   :  { %v4909_v44 = vadd.f32 %v3858_v55, %v4904_v2  ;;  %v2500_v16 = vpop.f32.mrb[21].mxu1 }
0x1537   :  { %v4912_v27 = vadd.f32 %v2519_v28, %v2500_v16  ;;  %v4914_v29 = vadd.f32 %v3860_v62, %v2500_v16 }
0x1538   :  { %2529 = vadd.xlane.f32.xlu1 %v4909_v44  ;;  %v2540_v34 = vmul.f32 %v4909_v44, %v4909_v44 }
0x1539   :  { %2527 = vadd.xlane.f32.xlu0 %v4914_v29  ;;  %v4919_v58 = vpop.f32.mrb[22].mxu1  ;;  %v2539_v24 = vmul.f32 %v4914_v29, %v4914_v29 }
0x153a   :  { %v4923_v25 = vadd.f32 %v3862_v49, %v4919_v58  ;;  %v2510_v33 = vpop.f32.mrb[23].mxu1 }
0x153b   :  { %v4925_v56 = vadd.f32 %v2521_v54, %v2510_v33  ;;  %v4927_v6 = vadd.f32 %v3864_v22, %v2510_v33  ;;  %v4122_v22 = vmov 26  }
0x153c   :  { %v2542_v13 = vmul.f32 %v4923_v25, %v4923_v25 }
0x153d   :  { %2531 = vadd.xlane.f32.xlu1 %v4927_v6  ;;  %2545 = vadd.xlane.f32.xlu0 %v2540_v34  ;;  %v2541_v10 = vmul.f32 %v4927_v6, %v4927_v6 }
0x1541   :  { %2547 = vadd.xlane.f32.xlu1 %v2541_v10  ;;  %2543 = vadd.xlane.f32.xlu0 %v2539_v24 }
0x1545   :  { %2533 = vadd.xlane.f32.xlu0 %v4923_v25 }
0x1549   :  { %2549 = vadd.xlane.f32.xlu0 %v2542_v13 }
0x15c5   :  { %v2530_v30 = vpop.xlane.xlu1 %2529 }
0x15c6   :  { %v2528_v31 = vpop.xlane.xlu0 %2527  ;;  %v2536_v61 = vmul.f32 0.0078125, %v2530_v30 }
0x15c7   :  { %v2535_v32 = vmul.f32 0.0078125, %v2528_v31 }
0x15c8   :  { %v2556_v35 = vmul.f32 %v2536_v61, %v2536_v61 }
0x15c9   :  { %v2555_v12 = vmul.f32 %v2535_v32, %v2535_v32 }
0x15ca   :  { %v2532_v57 = vpop.xlane.xlu1 %2531  ;;  %v2546_v1 = vpop.xlane.xlu0 %2545 }
0x15cb   :  { %v2537_v36 = vmul.f32 0.0078125, %v2532_v57  ;;  %v2552_v37 = vmul.f32 0.0078125, %v2546_v1 }
0x15cd   :  { %v2560_v40 = vsub.f32 %v2552_v37, %v2556_v35  ;;  %v2557_v63 = vmul.f32 %v2537_v36, %v2537_v36 }
0x15ce   :  { %v2548_v47 = vpop.xlane.xlu1 %2547  ;;  %v2544_v3 = vpop.xlane.xlu0 %2543 }
0x15cf   :  { %v2564_v20 = vadd.f32 1e-05, %v2560_v40  ;;  %v2553_v46 = vmul.f32 0.0078125, %v2548_v47  ;;  %v2551_v42 = vmul.f32 0.0078125, %v2544_v3 }
0x15d1   :  { %4061 = vrsqrt.f32 %v2564_v20  ;;  %v2561_v53 = vsub.f32 %v2553_v46, %v2557_v63  ;;  %v2559_v4 = vsub.f32 %v2551_v42, %v2555_v12 }
0x15d2   :  { %v2534_v7 = vpop.xlane.xlu0 %2533 }
0x15d3   :  { %v2565_v9 = vadd.f32 1e-05, %v2561_v53  ;;  %v2563_v8 = vadd.f32 1e-05, %v2559_v4  ;;  %v2538_v11 = vmul.f32 0.0078125, %v2534_v7 }
0x15d5   :  { %4063 = vrsqrt.f32 %v2565_v9  ;;  %v2558_v15 = vmul.f32 %v2538_v11, %v2538_v11 }
0x15d6   :  { %4065 = vrsqrt.f32 %v2563_v8  ;;  %v2550_v14 = vpop.xlane.xlu0 %2549 }
0x15d7   :  { %v2554_v39 = vmul.f32 0.0078125, %v2550_v14 }
0x15d9   :  { %v2562_v19 = vsub.f32 %v2554_v39, %v2558_v15 }
0x15db   :  { %v4062_v52 = vpop.eup %4061  ;;  %v2566_v18 = vadd.f32 1e-05, %v2562_v19 }
0x15dc   :  { %v2572_v41 = vmul.f32 %v4817_v51, %v4062_v52 }
0x15dd   :  { %4067 = vrsqrt.f32 %v2566_v18 }
0x15de   :  { %v2576_v55 = vmul.f32 %v2572_v41, %v2536_v61  ;;  %v3412_v61 = vld [vmem:[%s5105_s2 + $0x80] sm:$0xff] }
0x15df   :  { %v4064_v45 = vpop.eup %4063  ;;  %3709 = vmatprep.mubr.msk.f32.mxu0 %vm299_vm2, %v3412_v61 }
0x15e0   :  { %v4066_v62 = vpop.eup %4065  ;;  %2585 = vrot.lane.b32.xlu0 %v2576_v55, %s4097_s11  ;;  %v2573_v26 = vmul.f32 %v4825_v50, %v4064_v45 }
0x15e1   :  { %v2571_v21 = vmul.f32 %v4811_v0, %v4066_v62 }
0x15e2   :  { %v2577_v48 = vmul.f32 %v2573_v26, %v2537_v36 }
0x15e3   :  { %v2575_v28 = vmul.f32 %v2571_v21, %v2535_v32  ;;  %v4123_v32 = vmov 27  }
0x15e4   :  { %2601 = vperm.xlu0 %3981, %v2571_v21  }
0x15e5   :  { %2583 = vrot.lane.b32.xlu1 %v2575_v28, %s4097_s11 }
0x15e7   :  { %v4068_v16 = vpop.eup %4067 }
0x15e8   :  { %v2574_v49 = vmul.f32 %v4831_v59, %v4068_v16  ;;  %3983 = vset.pattern.permute.xlu0 %v4122_v22 }
0x15e9   :  { %2587 = vrot.lane.b32.xlu1 %v2577_v48, %s4097_s11 }
0x15ea   :  { %v2578_v54 = vmul.f32 %v2574_v49, %v2538_v11 }
0x15ed   :  { %2589 = vrot.lane.b32.xlu1 %v2578_v54, %s4097_s11 }
0x15f1   :  { %2606 = vperm.xlu1 %3982, %v2572_v41  }
0x15f5   :  { %2611 = vperm.xlu1 %3982, %v2573_v26  }
0x15f9   :  { %2616 = vperm.xlu1 %3982, %v2574_v49  }
0x15fd   :  { %3984 = vset.pattern.permute.xlu1 %v4122_v22 }
0x1652   :  { %v2586_v33 = vpop.permute.xlu0 %2585 }
0x1653   :  { %v2596_v34 = vsub.f32 %v4817_v51, %v2586_v33  ;;  %v4124_v33 = vmov 28  }
0x1655   :  { %2630 = vperm.xlu0 %3983, %v2596_v34  }
0x1657   :  { %v2584_v10 = vpop.permute.xlu1 %2583 }
0x1658   :  { %v2595_v24 = vsub.f32 %v4811_v0, %v2584_v10 }
0x165a   :  { %2625 = vperm.xlu1 %3984, %v2595_v24  }
0x165b   :  { %v2588_v13 = vpop.permute.xlu1 %2587 }
0x165c   :  { %v2597_v17 = vsub.f32 %v4825_v50, %v2588_v13 }
0x165e   :  { %2635 = vperm.xlu0 %3983, %v2597_v17  }
0x165f   :  { %v2590_v30 = vpop.permute.xlu1 %2589 }
0x1660   :  { %v2598_v31 = vsub.f32 %v4831_v59, %v2590_v30 }
0x1662   :  { %2640 = vperm.xlu1 %3984, %v2598_v31   ;;  %3985 = vset.pattern.permute.xlu0 %v4123_v32 }
0x1663   :  { %2657 = vperm.xlu0 %3985, %v4811_v0   ;;  %v2602_v35 = vpop.permute.xlu0 %2601 }
0x1664   :  { %v2619_v12 = vmul.f32 %v4914_v29, %v2602_v35  ;;  %v3413_v29 = vld [vmem:[%s5105_s2 + $0x88] sm:$0xff] }
0x1666   :  { %3986 = vset.pattern.permute.xlu1 %v4123_v32 }
0x1667   :  { %2661 = vperm.xlu1 %3986, %v4817_v51   ;;  %2669 = vperm.xlu0 %3985, %v4831_v59  }
0x166b   :  { %2665 = vperm.xlu1 %3986, %v4825_v50   ;;  %3988 = vset.pattern.permute.xlu0 %v4124_v33 }
0x166f   :  { %3987 = vset.pattern.permute.xlu1 %v4124_v33 }
0x1670   :  { %v2607_v57 = vpop.permute.xlu1 %2606 }
0x1671   :  { %v2620_v40 = vmul.f32 %v4909_v44, %v2607_v57 }
0x1674   :  { %v2612_v1 = vpop.permute.xlu1 %2611 }
0x1675   :  { %v2621_v53 = vmul.f32 %v4927_v6, %v2612_v1  ;;  %v3414_v6 = vld [vmem:[%s5105_s2 + $0x90] sm:$0xff] }
0x1678   :  { %v2617_v36 = vpop.permute.xlu1 %2616 }
0x1679   :  { %v2622_v7 = vmul.f32 %v4923_v25, %v2617_v36  ;;  %v3415_v25 = vld [vmem:[%s5105_s2 + $0x98] sm:$0xff] }
0x16d4   :  { %v2631_v37 = vpop.permute.xlu0 %2630 }
0x16d5   :  { %v2644_v47 = vadd.f32 %v2631_v37, %v2620_v40 }
0x16d7   :  { %v2648_v20 = vmax.f32 %v2644_v47, 0.0 }
0x16d9   :  { %v2626_v3 = vpop.permute.xlu1 %2625 }
0x16da   :  { %v2643_v63 = vadd.f32 %v2626_v3, %v2619_v12 }
0x16dc   :  { %v2647_v46 = vmax.f32 %v2643_v63, 0.0 }
0x16dd   :  { %v2636_v42 = vpop.permute.xlu0 %2635 }
0x16de   :  { %v3812_v4 = vpack.c.bf16 %v2648_v20, %v2647_v46  ;;  %v2645_v9 = vadd.f32 %v2636_v42, %v2621_v53 }
0x16e0   :  { %3813 = vmatprep.subr.bf16.mxu0 %v3812_v4  ;;  %v2649_v14 = vmax.f32 %v2645_v9, 0.0 }
0x16e1   :  { %v2641_v8 = vpop.permute.xlu1 %2640  ;;  %3815 = vmatpush3.bf16.msra.mxu0 %v3812_v4 }
0x16e2   :  { %v2646_v11 = vadd.f32 %v2641_v8, %v2622_v7  ;;  %v2658_v52 = vpop.permute.xlu0 %2657 }
0x16e4   :  { %v2650_v44 = vmax.f32 %v2646_v11, 0.0 }
0x16e6   :  { %v3816_v15 = vpack.c.bf16 %v2650_v44, %v2649_v14  ;;  %v2662_v39 = vpop.permute.xlu1 %2661  ;;  %v2670_v16 = vpop.permute.xlu0 %2669 }
0x16e8   :  { %3817 = vmatprep.subr.bf16.mxu0 %v3816_v15 }
0x16e9   :  { %3819 = vmatpush3.bf16.msra.mxu0 %v3816_v15 }
0x16ea   :  { %v2666_v26 = vpop.permute.xlu1 %2665 }
0x16ec   :  { %3710 = vmatmul.mubr.msk.f32.vlgmr.msra.gmra.mrb[12].mxu0 %vm299_vm2, %v3413_v29 }
0x16ed   :  { %3712 = vmatprep.mubr.msk.f32.mxu0 %vm299_vm2, %v3414_v6 }
0x16f0   :  { %3713 = vmatmul.mubr.msk.f32.gmra.mrb[14].mxu0 %vm299_vm2, %v3415_v25 }
0x17bf   :  { %v3711_v19 = vpop.f32.mrb[12].mxu0 }
0x17c0   :  { %v4975_v18 = vadd.f32 %v3711_v19, %v2662_v39  ;;  %v2750_v41 = vpop.f32.mrb[13].mxu0 }
0x17c1   :  { %v4977_v55 = vadd.f32 %v2750_v41, %v2658_v52 }
0x17c2   :  { %2771 = vadd.xlane.f32.xlu0 %v4975_v18  ;;  %v2782_v28 = vmul.f32 %v4975_v18, %v4975_v18 }
0x17c3   :  { %v3714_v45 = vpop.f32.mrb[14].mxu0  ;;  %2769 = vadd.xlane.f32.xlu1 %v4977_v55  ;;  %v2781_v62 = vmul.f32 %v4977_v55, %v4977_v55 }
0x17c4   :  { %v2760_v21 = vpop.f32.mrb[15].mxu0  ;;  %v4987_v49 = vadd.f32 %v3714_v45, %v2670_v16 }
0x17c5   :  { %v4985_v48 = vadd.f32 %v2760_v21, %v2666_v26  ;;  %v4125_v21 = vmov 29  }
0x17c6   :  { %2785 = vadd.xlane.f32.xlu0 %v2781_v62  ;;  %v2784_v54 = vmul.f32 %v4987_v49, %v4987_v49 }
0x17c7   :  { %2787 = vadd.xlane.f32.xlu1 %v2782_v28  ;;  %v2783_v22 = vmul.f32 %v4985_v48, %v4985_v48 }
0x17ca   :  { %2773 = vadd.xlane.f32.xlu0 %v4985_v48 }
0x17cb   :  { %2775 = vadd.xlane.f32.xlu1 %v4987_v49 }
0x17ce   :  { %2789 = vadd.xlane.f32.xlu0 %v2783_v22 }
0x17cf   :  { %2791 = vadd.xlane.f32.xlu1 %v2784_v54 }
0x184f   :  { %v2772_v34 = vpop.xlane.xlu0 %2771 }
0x1850   :  { %v2770_v10 = vpop.xlane.xlu1 %2769  ;;  %v2778_v24 = vmul.f32 0.0078125, %v2772_v34 }
0x1851   :  { %v2777_v13 = vmul.f32 0.0078125, %v2770_v10 }
0x1852   :  { %v2798_v32 = vmul.f32 %v2778_v24, %v2778_v24 }
0x1853   :  { %v2797_v17 = vmul.f32 %v2777_v13, %v2777_v13  ;;  %v2786_v30 = vpop.xlane.xlu0 %2785 }
0x1854   :  { %v2793_v31 = vmul.f32 0.0078125, %v2786_v30  ;;  %v2788_v61 = vpop.xlane.xlu1 %2787 }
0x1855   :  { %v2794_v57 = vmul.f32 0.0078125, %v2788_v61 }
0x1856   :  { %v2801_v1 = vsub.f32 %v2793_v31, %v2797_v17 }
0x1857   :  { %v2802_v35 = vsub.f32 %v2794_v57, %v2798_v32  ;;  %v2774_v36 = vpop.xlane.xlu0 %2773 }
0x1858   :  { %v2805_v37 = vadd.f32 1e-05, %v2801_v1  ;;  %v2779_v40 = vmul.f32 0.0078125, %v2774_v36  ;;  %v2776_v12 = vpop.xlane.xlu1 %2775 }
0x1859   :  { %v2806_v47 = vadd.f32 1e-05, %v2802_v35  ;;  %v2780_v3 = vmul.f32 0.0078125, %v2776_v12 }
0x185a   :  { %4069 = vrsqrt.f32 %v2805_v37  ;;  %v2799_v20 = vmul.f32 %v2779_v40, %v2779_v40 }
0x185b   :  { %4071 = vrsqrt.f32 %v2806_v47  ;;  %v2790_v63 = vpop.xlane.xlu0 %2789  ;;  %v2800_v53 = vmul.f32 %v2780_v3, %v2780_v3 }
0x185c   :  { %v2795_v46 = vmul.f32 0.0078125, %v2790_v63  ;;  %v2792_v42 = vpop.xlane.xlu1 %2791 }
0x185d   :  { %v2796_v4 = vmul.f32 0.0078125, %v2792_v42 }
0x185e   :  { %v2803_v7 = vsub.f32 %v2795_v46, %v2799_v20 }
0x185f   :  { %v2804_v9 = vsub.f32 %v2796_v4, %v2800_v53 }
0x1860   :  { %v2807_v8 = vadd.f32 1e-05, %v2803_v7 }
0x1861   :  { %v2808_v11 = vadd.f32 1e-05, %v2804_v9  ;;  %v3011_v9 = vld [vmem:[%s5103_s1 + $0xa0] sm:$0xff] }
0x1862   :  { %4073 = vrsqrt.f32 %v2807_v8  ;;  %v3012_v8 = vld [vmem:[%s5103_s1 + $0xa8] sm:$0xff] }
0x1863   :  { %4075 = vrsqrt.f32 %v2808_v11  ;;  %v3014_v11 = vld [vmem:[%s5103_s1 + $0xb8] sm:$0xff] }
0x1864   :  { %v4070_v14 = vpop.eup %4069 }
0x1865   :  { %v4072_v44 = vpop.eup %4071  ;;  %v2813_v15 = vmul.f32 %v4811_v0, %v4070_v14 }
0x1866   :  { %v2814_v29 = vmul.f32 %v4817_v51, %v4072_v44  ;;  %v2405_v44 = vadd.f32 nan, %v4895_v38 }
0x1867   :  { %v2817_v6 = vmul.f32 %v2813_v15, %v2777_v13  ;;  %v3420_v13 = vld [vmem:[%s5105_s2 + $0x120] sm:$0xff] }
0x1868   :  { %v2818_v25 = vmul.f32 %v2814_v29, %v2778_v24  ;;  %v4126_v24 = vmov 30   ;;  %3723 = vmatprep.mubr.msk.f32.mxu0 %vm299_vm2, %v3420_v13 }
0x1869   :  { %2825 = vrot.lane.b32.xlu0 %v2817_v6, %s4097_s11  ;;  %v2520_v6 = vadd.f32 %v4720_v5, %v2405_v44 }
0x186a   :  { %2827 = vrot.lane.b32.xlu1 %v2818_v25, %s4097_s11 }
0x186c   :  { %v4074_v39 = vpop.eup %4073 }
0x186d   :  { %v4076_v19 = vpop.eup %4075  ;;  %v2815_v52 = vmul.f32 %v4825_v50, %v4074_v39  ;;  %v2524_v39 = vadd.f32 %v4904_v2, %v2520_v6 }
0x186e   :  { %v2816_v41 = vmul.f32 %v4831_v59, %v4076_v19 }
0x186f   :  { %v2819_v45 = vmul.f32 %v2815_v52, %v2779_v40 }
0x1870   :  { %v2820_v62 = vmul.f32 %v2816_v41, %v2780_v3 }
0x1871   :  { %2829 = vrot.lane.b32.xlu1 %v2819_v45, %s4097_s11 }
0x1872   :  { %2831 = vrot.lane.b32.xlu0 %v2820_v62, %s4097_s11 }
0x1875   :  { %2843 = vperm.xlu1 %3987, %v2813_v15  }
0x1876   :  { %2848 = vperm.xlu0 %3988, %v2814_v29   ;;  %v2415_v29 = vadd.f32 nan, %v4902_v43 }
0x1878   :  { %v2522_v19 = vadd.f32 %v4735_v23, %v2415_v29 }
0x1879   :  { %2858 = vperm.xlu1 %3987, %v2816_v41  }
0x187a   :  { %2853 = vperm.xlu0 %3988, %v2815_v52  }
0x187d   :  { %3989 = vset.pattern.permute.xlu1 %v4125_v21 }
0x187e   :  { %3990 = vset.pattern.permute.xlu0 %v4125_v21  ;;  %v2526_v21 = vadd.f32 %v4919_v58, %v2522_v19 }
0x18db   :  { %v2826_v16 = vpop.permute.xlu0 %2825 }
0x18dc   :  { %v2828_v28 = vpop.permute.xlu1 %2827  ;;  %v2837_v22 = vsub.f32 %v4811_v0, %v2826_v16 }
0x18dd   :  { %v2838_v26 = vsub.f32 %v4817_v51, %v2828_v28 }
0x18df   :  { %2872 = vperm.xlu1 %3989, %v2838_v26  }
0x18e3   :  { %v2830_v54 = vpop.permute.xlu1 %2829  ;;  %2867 = vperm.xlu1 %3989, %v2837_v22  }
0x18e4   :  { %v2839_v33 = vsub.f32 %v4825_v50, %v2830_v54  ;;  %v2832_v34 = vpop.permute.xlu0 %2831 }
0x18e5   :  { %v2840_v10 = vsub.f32 %v4831_v59, %v2832_v34 }
0x18e6   :  { %2877 = vperm.xlu0 %3990, %v2839_v33   ;;  %v4127_v33 = vmov 31  }
0x18e7   :  { %2882 = vperm.xlu1 %3989, %v2840_v10  }
0x18ea   :  { %3992 = vset.pattern.permute.xlu0 %v4126_v24 }
0x18eb   :  { %2903 = vperm.xlu0 %3992, %v4817_v51   ;;  %3991 = vset.pattern.permute.xlu1 %v4126_v24 }
0x18ec   :  { %2899 = vperm.xlu1 %3991, %v4811_v0  }
0x18ef   :  { %3993 = vset.pattern.permute.xlu0 %v4127_v33 }
0x18f0   :  { %2907 = vperm.xlu1 %3991, %v4825_v50  }
0x18f4   :  { %2911 = vperm.xlu1 %3991, %v4831_v59   ;;  %v2844_v17 = vpop.permute.xlu1 %2843 }
0x18f5   :  { %v2849_v31 = vpop.permute.xlu0 %2848  ;;  %v2861_v57 = vmul.f32 %v2844_v17, %v4977_v55  ;;  %v3421_v55 = vld [vmem:[%s5105_s2 + $0x128] sm:$0xff] }
0x18f6   :  { %v2862_v32 = vmul.f32 %v2849_v31, %v4975_v18 }
0x18f8   :  { %v2859_v30 = vpop.permute.xlu1 %2858  ;;  %3994 = vset.pattern.permute.xlu1 %v4127_v33 }
0x18f9   :  { %v2854_v1 = vpop.permute.xlu0 %2853  ;;  %v2864_v12 = vmul.f32 %v2859_v30, %v4987_v49  ;;  %v3423_v49 = vld [vmem:[%s5105_s2 + $0x138] sm:$0xff] }
0x18fa   :  { %v2863_v40 = vmul.f32 %v2854_v1, %v4985_v48  ;;  %v3422_v48 = vld [vmem:[%s5105_s2 + $0x130] sm:$0xff] }
0x195e   :  { %v2873_v61 = vpop.permute.xlu1 %2872 }
0x195f   :  { %v2886_v35 = vadd.f32 %v2873_v61, %v2862_v32 }
0x1961   :  { %v2890_v47 = vmax.f32 %v2886_v35, 0.0 }
0x1962   :  { %v2868_v36 = vpop.permute.xlu1 %2867 }
0x1963   :  { %v2885_v37 = vadd.f32 %v2868_v36, %v2861_v57 }
0x1965   :  { %v2889_v3 = vmax.f32 %v2885_v37, 0.0  ;;  %v2878_v63 = vpop.permute.xlu0 %2877 }
0x1966   :  { %v2887_v20 = vadd.f32 %v2878_v63, %v2863_v40  ;;  %v2883_v46 = vpop.permute.xlu1 %2882 }
0x1967   :  { %v3820_v42 = vpack.c.bf16 %v2890_v47, %v2889_v3  ;;  %v2888_v53 = vadd.f32 %v2883_v46, %v2864_v12 }
0x1968   :  { %v2891_v4 = vmax.f32 %v2887_v20, 0.0 }
0x1969   :  { %v2892_v7 = vmax.f32 %v2888_v53, 0.0  ;;  %3821 = vmatprep.subr.bf16.mxu0 %v3820_v42 }
0x196a   :  { %3823 = vmatpush3.bf16.msra.mxu0 %v3820_v42  ;;  %v2904_v25 = vpop.permute.xlu0 %2903 }
0x196b   :  { %v3824_v18 = vpack.c.bf16 %v2892_v7, %v2891_v4  ;;  %v2900_v14 = vpop.permute.xlu1 %2899  ;;  %v3866_v52 = vadd.f32 %v2904_v25, %v2524_v39  ;;  %v4128_v39 = vmov 32  }
0x196c   :  { %v3868_v41 = vadd.f32 %v2900_v14, %v4912_v27 }
0x196d   :  { %3825 = vmatprep.subr.bf16.mxu0 %v3824_v18 }
0x196e   :  { %3827 = vmatpush3.bf16.msra.mxu0 %v3824_v18 }
0x196f   :  { %3729 = vmatprep.subr.msk.mxu0 %vm62_vm0, %v4858_v60  ;;  %v2908_v15 = vpop.permute.xlu1 %2907 }
0x1970   :  { %v3872_v5 = vadd.f32 %v2908_v15, %v4925_v56 }
0x1971   :  { %3724 = vmatmul.mubr.msk.f32.vlgmr.msra.gmra.mrb[16].mxu0 %vm299_vm2, %v3421_v55 }
0x1972   :  { %3730 = vmatpush3.msk.msra.mxu0 %vm62_vm0, %v4858_v60  ;;  %3726 = vmatprep.mubr.msk.f32.mxu0 %vm299_vm2, %v3422_v48  ;;  %v3013_v60 = vld [vmem:[%s5103_s1 + $0xb0] sm:$0xff] }
0x1973   :  { %v2912_v45 = vpop.permute.xlu1 %2911 }
0x1974   :  { %v3870_v43 = vadd.f32 %v2912_v45, %v2526_v21 }
0x1975   :  { %3727 = vmatmul.mubr.msk.f32.gmra.mrb[18].mxu0 %vm299_vm2, %v3423_v49 }
0x1976   :  { %3731 = vmatprep.mubr.msk.f32.mxu0 %vm49_vm1, %v3011_v9 }
0x1979   :  { %3732 = vmatmul.mubr.msk.f32.vlgmr.msra.gmra.mrb[16].mxu0 %vm49_vm1, %v3012_v8 }
0x197a   :  { %3734 = vmatprep.mubr.msk.f32.mxu0 %vm49_vm1, %v3013_v60 }
0x197d   :  { %3735 = vmatmul.mubr.msk.f32.gmra.mrb[18].mxu0 %vm49_vm1, %v3014_v11 }
0x1a4c   :  { %v3733_v62 = vpop.f32.mrb[16].mxu0 }
0x1a4d   :  { %v5058_v28 = vadd.f32 %v3866_v52, %v3733_v62  ;;  %v3093_v38 = vpop.f32.mrb[17].mxu0 }
0x1a4e   :  { %v5060_v26 = vadd.f32 %v3868_v41, %v3093_v38 }
0x1a4f   :  { %3122 = vadd.xlane.f32.xlu1 %v5058_v28  ;;  %v3133_v58 = vmul.f32 %v5058_v28, %v5058_v28 }
0x1a50   :  { %3120 = vadd.xlane.f32.xlu0 %v5060_v26  ;;  %v3736_v23 = vpop.f32.mrb[18].mxu0  ;;  %v3132_v56 = vmul.f32 %v5060_v26, %v5060_v26 }
0x1a51   :  { %v5065_v2 = vadd.f32 %v3870_v43, %v3736_v23  ;;  %v3103_v27 = vpop.f32.mrb[19].mxu0  ;;  %v4129_v23 = vmov 0.0|0.0  }
0x1a52   :  { %v5067_v16 = vadd.f32 %v3872_v5, %v3103_v27  ;;  %v3244_v5 = vld [vmem:[%s5106_s4] sm:$0x7]  ;;  %3828 = vmatprep.subr.bf16.mxu1 %v4129_v23 }
0x1a53   :  { %v3135_v54 = vmul.f32 %v5065_v2, %v5065_v2 }
0x1a54   :  { %3124 = vadd.xlane.f32.xlu1 %v5067_v16  ;;  %3138 = vadd.xlane.f32.xlu0 %v3133_v58  ;;  %v3134_v22 = vmul.f32 %v5067_v16, %v5067_v16 }
0x1a58   :  { %3140 = vadd.xlane.f32.xlu1 %v3134_v22  ;;  %3136 = vadd.xlane.f32.xlu0 %v3132_v56 }
0x1a5c   :  { %3126 = vadd.xlane.f32.xlu0 %v5065_v2 }
0x1a60   :  { %3142 = vadd.xlane.f32.xlu0 %v3135_v54 }
0x1adc   :  { %v3123_v34 = vpop.xlane.xlu1 %3122 }
0x1add   :  { %v3121_v10 = vpop.xlane.xlu0 %3120  ;;  %v3129_v24 = vmul.f32 0.0078125, %v3123_v34 }
0x1ade   :  { %v3128_v13 = vmul.f32 0.0078125, %v3121_v10 }
0x1adf   :  { %v3149_v31 = vmul.f32 %v3129_v24, %v3129_v24 }
0x1ae0   :  { %v3148_v1 = vmul.f32 %v3128_v13, %v3128_v13 }
0x1ae1   :  { %v3125_v17 = vpop.xlane.xlu1 %3124  ;;  %v3139_v30 = vpop.xlane.xlu0 %3138 }
0x1ae2   :  { %v3130_v61 = vmul.f32 0.0078125, %v3125_v17  ;;  %v3145_v32 = vmul.f32 0.0078125, %v3139_v30 }
0x1ae4   :  { %v3153_v57 = vsub.f32 %v3145_v32, %v3149_v31  ;;  %v3150_v37 = vmul.f32 %v3130_v61, %v3130_v61 }
0x1ae5   :  { %v3141_v35 = vpop.xlane.xlu1 %3140  ;;  %v3137_v36 = vpop.xlane.xlu0 %3136 }
0x1ae6   :  { %v3157_v40 = vadd.f32 1e-05, %v3153_v57  ;;  %v3146_v12 = vmul.f32 0.0078125, %v3141_v35  ;;  %v3144_v47 = vmul.f32 0.0078125, %v3137_v36 }
0x1ae8   :  { %4077 = vrsqrt.f32 %v3157_v40  ;;  %v3154_v3 = vsub.f32 %v3146_v12, %v3150_v37  ;;  %v3152_v63 = vsub.f32 %v3144_v47, %v3148_v1 }
0x1ae9   :  { %v3127_v20 = vpop.xlane.xlu0 %3126 }
0x1aea   :  { %v3158_v46 = vadd.f32 1e-05, %v3154_v3  ;;  %v3156_v42 = vadd.f32 1e-05, %v3152_v63  ;;  %v3131_v53 = vmul.f32 0.0078125, %v3127_v20 }
0x1aec   :  { %4079 = vrsqrt.f32 %v3158_v46  ;;  %v3151_v7 = vmul.f32 %v3131_v53, %v3131_v53 }
0x1aed   :  { %4081 = vrsqrt.f32 %v3156_v42  ;;  %v3143_v4 = vpop.xlane.xlu0 %3142 }
0x1aee   :  { %v3147_v18 = vmul.f32 0.0078125, %v3143_v4 }
0x1af0   :  { %v3155_v55 = vsub.f32 %v3147_v18, %v3151_v7 }
0x1af2   :  { %v4078_v48 = vpop.eup %4077  ;;  %v3159_v49 = vadd.f32 1e-05, %v3155_v55 }
0x1af3   :  { %v3165_v9 = vmul.f32 %v4817_v51, %v4078_v48 }
0x1af4   :  { %4083 = vrsqrt.f32 %v3159_v49 }
0x1af5   :  { %v3169_v8 = vmul.f32 %v3165_v9, %v3129_v24 }
0x1af6   :  { %v4080_v60 = vpop.eup %4079 }
0x1af7   :  { %v4082_v11 = vpop.eup %4081  ;;  %3178 = vrot.lane.b32.xlu0 %v3169_v8, %s4097_s11  ;;  %v3166_v15 = vmul.f32 %v4825_v50, %v4080_v60 }
0x1af8   :  { %v3164_v14 = vmul.f32 %v4811_v0, %v4082_v11 }
0x1af9   :  { %v3170_v6 = vmul.f32 %v3166_v15, %v3130_v61 }
0x1afa   :  { %v3168_v44 = vmul.f32 %v3164_v14, %v3128_v13 }
0x1afb   :  { %3194 = vperm.xlu0 %3993, %v3164_v14  }
0x1afc   :  { %3176 = vrot.lane.b32.xlu1 %v3168_v44, %s4097_s11 }
0x1afe   :  { %v4084_v29 = vpop.eup %4083 }
0x1aff   :  { %v3167_v25 = vmul.f32 %v4831_v59, %v4084_v29  ;;  %3995 = vset.pattern.permute.xlu0 %v4128_v39 }
0x1b00   :  { %3180 = vrot.lane.b32.xlu1 %v3170_v6, %s4097_s11 }
0x1b01   :  { %v3171_v19 = vmul.f32 %v3167_v25, %v3131_v53 }
0x1b04   :  { %3182 = vrot.lane.b32.xlu1 %v3171_v19, %s4097_s11 }
0x1b08   :  { %3199 = vperm.xlu1 %3994, %v3165_v9  }
0x1b0c   :  { %3204 = vperm.xlu1 %3994, %v3166_v15  }
0x1b10   :  { %3209 = vperm.xlu1 %3994, %v3167_v25  }
0x1b14   :  { %3996 = vset.pattern.permute.xlu1 %v4128_v39 }
0x1b69   :  { %v3179_v52 = vpop.permute.xlu0 %3178 }
0x1b6a   :  { %v3189_v41 = vsub.f32 %v4817_v51, %v3179_v52  ;;  %v4131_v51 = vmov 0.0  }
0x1b6b   :  { %3745 = vmatprep.mubr.msk.f32.mxu1 %vm4130_vm3, %v4131_v51 }
0x1b6c   :  { %3223 = vperm.xlu0 %3995, %v3189_v41  }
0x1b6e   :  { %v3177_v45 = vpop.permute.xlu1 %3176 }
0x1b6f   :  { %v3188_v62 = vsub.f32 %v4811_v0, %v3177_v45 }
0x1b71   :  { %3218 = vperm.xlu1 %3996, %v3188_v62  }
0x1b72   :  { %v3181_v21 = vpop.permute.xlu1 %3180 }
0x1b73   :  { %v3190_v38 = vsub.f32 %v4825_v50, %v3181_v21 }
0x1b75   :  { %3228 = vperm.xlu0 %3995, %v3190_v38  }
0x1b76   :  { %v3183_v43 = vpop.permute.xlu1 %3182 }
0x1b77   :  { %v3191_v27 = vsub.f32 %v4831_v59, %v3183_v43 }
0x1b79   :  { %3233 = vperm.xlu1 %3996, %v3191_v27   ;;  %3247 = vperm.xlu0 %3995, %v3244_v5  }
0x1b7a   :  { %v3195_v22 = vpop.permute.xlu0 %3194 }
0x1b7b   :  { %v3212_v33 = vmul.f32 %v5060_v26, %v3195_v22 }
0x1b87   :  { %v3200_v0 = vpop.permute.xlu1 %3199 }
0x1b88   :  { %v3213_v54 = vmul.f32 %v5058_v28, %v3200_v0 }
0x1b8b   :  { %v3205_v58 = vpop.permute.xlu1 %3204 }
0x1b8c   :  { %v3214_v30 = vmul.f32 %v5067_v16, %v3205_v58 }
0x1b8f   :  { %v3210_v56 = vpop.permute.xlu1 %3209 }
0x1b90   :  { %v3215_v61 = vmul.f32 %v5065_v2, %v3210_v56 }
0x1beb   :  { %v3224_v50 = vpop.permute.xlu0 %3223 }
0x1bec   :  { %v3237_v34 = vadd.f32 %v3224_v50, %v3213_v54 }
0x1bee   :  { %v3241_v13 = vmax.f32 %v3237_v34, 0.0 }
0x1bf0   :  { %v3219_v10 = vpop.permute.xlu1 %3218 }
0x1bf1   :  { %v3236_v24 = vadd.f32 %v3219_v10, %v3212_v33 }
0x1bf3   :  { %v3240_v17 = vmax.f32 %v3236_v24, 0.0 }
0x1bf4   :  { %v3229_v59 = vpop.permute.xlu0 %3228 }
0x1bf5   :  { %v3829_v31 = vpack.c.bf16 %v3241_v13, %v3240_v17  ;;  %v3238_v32 = vadd.f32 %v3229_v59, %v3214_v30 }
0x1bf7   :  { %3830 = vmatpush3.bf16.msra.mxu1 %v3829_v31  ;;  %v3242_v35 = vmax.f32 %v3238_v32, 0.0 }
0x1bf8   :  { %v3234_v57 = vpop.permute.xlu1 %3233  ;;  %3831 = vmatprep.subr.bf16.mxu1 %v4129_v23  ;;  %v3248_v26 = vpop.permute.xlu0 %3247 }
0x1bf9   :  { %v3239_v1 = vadd.f32 %v3234_v57, %v3215_v61 }
0x1bfb   :  { %v3243_v28 = vmax.f32 %v3239_v1, 0.0 }
0x1bfd   :  { %v3832_v36 = vpack.c.bf16 %v3243_v28, %v3242_v35 }
0x1bff   :  { %3833 = vmatpush3.bf16.msra.mxu1 %v3832_v36 }
0x1c02   :  { %3746 = vmatmul.mubr.msk.f32.vlgmr.msra.gmra.mrb[24].mxu1 %vm299_vm2, %v3244_v5 }
0x1cd5   :  { %v3318_v37 = vpop.f32.mrb[24].mxu1 }
0x1cd6   :  { %v3319_v40 = vadd.f32 %v3318_v37, %v3248_v26  ;;  %v3747_v12 = vpop.f32.mrb[25].mxu1 }
0x1cd8   :  { %3322 = vst [vmem:[%s5107_s5] sm:$0x7] %v3319_v40 }

</bundles_post_ra>
